<compile_context>
chip_gen: v5e
topology: v5e:2x2
jax: 0.10.0
libtpu: 0.0.40
codegen_flags: <defaults>
</compile_context>

<pallas_src>
import random

import jax
import jax.numpy as jnp
import numpy as np
from jax import lax
from jax.experimental import pallas as pl
from jax.experimental.pallas import tpu as pltpu


_PARAMS_LEN = 16          # [x0,y0,z0,sx,sy,sz] at offset 0 (source) and 8 (target)
_SRC_BASE = 0
_TGT_BASE = 8

_KERNEL_CACHE = {}        # (src_shape, src_dtype, tgt_shape, tgt_dtype) -> jitted callable


def _round_up(a, b):
    return (a + b - 1) // b * b


def _origin_crop_body(p_ref, in_ref, out_ref, *, base, shape):
    """Write in_ref[x0:x0+sx, y0:y0+sy, z0:z0+sz] to out_ref[:sx, :sy, :sz],
    zero elsewhere.  Offsets/sizes are runtime scalars read from SMEM."""
    X, Y, Z = shape
    x0 = p_ref[base + 0]
    y0 = p_ref[base + 1]
    z0 = p_ref[base + 2]
    sx = p_ref[base + 3]
    sy = p_ref[base + 4]
    sz = p_ref[base + 5]

    # Dynamic sublane shift as a 0/1 matrix:  (P @ plane)[j, :] = plane[j + y0, :]
    # for j < sy, else 0.  Size mask folded in -> no OOB, no masked stores later.
    jr = lax.broadcasted_iota(jnp.int32, (Y, Y), 0)          # output row j
    jc = lax.broadcasted_iota(jnp.int32, (Y, Y), 1)          # input row w
    P = ((jc == jr + y0) & (jr < sy)).astype(jnp.float32)    # (Y, Y)

    # Dynamic lane shift:  (plane @ Q)[:, k] = plane[:, k + z0] for k < sz, else 0.
    kr = lax.broadcasted_iota(jnp.int32, (Z, Z), 0)          # input col m
    kc = lax.broadcasted_iota(jnp.int32, (Z, Z), 1)          # output col k
    Q = ((kr == kc + z0) & (kc < sz)).astype(jnp.float32)    # (Z, Z)

    # X handled with dynamic leading-axis reads; store indices stay static.
    for i in range(X):
        src_i = jnp.minimum(x0 + i, X - 1)                   # clamp dummy reads
        plane = in_ref[src_i].astype(jnp.float32)            # (Y, Z)
        shifted = jnp.dot(
            jnp.dot(P, plane, preferred_element_type=jnp.float32),
            Q, preferred_element_type=jnp.float32)
        xvalid = (sx > jnp.int32(i)).astype(jnp.float32)     # scalar 0/1
        out_ref[i] = (shifted * xvalid).astype(out_ref.dtype)


def _make_fused_kernel(src_shape, tgt_shape):
    def kernel(p_ref, src_ref, tgt_ref, src_out_ref, tgt_out_ref):
        _origin_crop_body(p_ref, src_ref, src_out_ref, base=_SRC_BASE, shape=src_shape)
        _origin_crop_body(p_ref, tgt_ref, tgt_out_ref, base=_TGT_BASE, shape=tgt_shape)
    return kernel


def _get_padded_crop_fn(src_shape, src_dtype, tgt_shape, tgt_dtype):
    """One compiled kernel per (shapes, dtypes) key; crop boxes are runtime args."""
    key = (tuple(src_shape), np.dtype(src_dtype).name,
           tuple(tgt_shape), np.dtype(tgt_dtype).name)
    fn = _KERNEL_CACHE.get(key)
    if fn is not None:
        return fn

    def padded_bytes(shape, dtype):
        X, Y, Z = shape
        return X * _round_up(Y, 8) * _round_up(Z, 128) * np.dtype(dtype).itemsize

    def shift_flops(shape):
        X, Y, Z = shape
        return 2 * X * (Y * Y * Z + Y * Z * Z)

    bytes_accessed = 2 * (padded_bytes(src_shape, src_dtype)
                          + padded_bytes(tgt_shape, tgt_dtype))
    flops = shift_flops(src_shape) + shift_flops(tgt_shape)

    grid_spec = pltpu.PrefetchScalarGridSpec(
        num_scalar_prefetch=1,
        grid=(1,),
        in_specs=[
            pl.BlockSpec(tuple(src_shape), lambda i, p: (0, 0, 0)),
            pl.BlockSpec(tuple(tgt_shape), lambda i, p: (0, 0, 0)),
        ],
        out_specs=(
            pl.BlockSpec(tuple(src_shape), lambda i, p: (0, 0, 0)),
            pl.BlockSpec(tuple(tgt_shape), lambda i, p: (0, 0, 0)),
        ),
    )

    call = pl.pallas_call(
        _make_fused_kernel(tuple(src_shape), tuple(tgt_shape)),
        out_shape=(jax.ShapeDtypeStruct(tuple(src_shape), src_dtype),
                   jax.ShapeDtypeStruct(tuple(tgt_shape), tgt_dtype)),
        grid_spec=grid_spec,
        compiler_params=pltpu.CompilerParams(
            dimension_semantics=("arbitrary",)),
        cost_estimate=pl.CostEstimate(flops=int(flops), transcendentals=0,
                                      bytes_accessed=int(bytes_accessed)),
    )
    fn = jax.jit(call)
    _KERNEL_CACHE[key] = fn
    return fn


def crop3d_pair_padded(source, target, s_box, t_box):
    """Pallas path: returns full-shape padded outputs with each crop placed at
    the origin (zeros elsewhere).  s_box/t_box = ((x0,y0,z0), (sx,sy,sz))."""
    fn = _get_padded_crop_fn(source.shape, source.dtype, target.shape, target.dtype)
    params = np.zeros((_PARAMS_LEN,), np.int32)
    params[_SRC_BASE:_SRC_BASE + 3] = s_box[0]
    params[_SRC_BASE + 3:_SRC_BASE + 6] = s_box[1]
    params[_TGT_BASE:_TGT_BASE + 3] = t_box[0]
    params[_TGT_BASE + 3:_TGT_BASE + 6] = t_box[1]
    return fn(jnp.asarray(params), source, target)


def _crop_direct(vol, start, size):
    """Non-Pallas fast path (review item #2): plain XLA slice."""
    (x0, y0, z0), (sx, sy, sz) = start, size
    return vol[x0:x0 + sx, y0:y0 + sy, z0:z0 + sz]


class RandomCrop3D:
    """JAX/Pallas port of the PyTorch RandomCrop3D module.

    Do NOT wrap __call__ in jax.jit (host RNG advances per call); only the
    inner pallas_call is jitted and cached.
    """

    def __init__(self, size=5, fixed=False, seed=0, use_pallas=True):
        self.size = size
        self.fixed = fixed
        self.use_pallas = use_pallas
        self._rng = random.Random(seed)     # deterministic host-side RNG

    def _get_random_size(self, source_size, target_size, fixed_size):
        temp_size = self.size
        if fixed_size > 0:
            source_size = fixed_size
            temp_size = 1
        if self.fixed:
            source = round(source_size / temp_size)
        else:
            source = self._rng.randint(round(source_size / temp_size), source_size)
        width = self._rng.randint(0, source_size - source)
        target = source * 2
        if target > target_size:
            target = target_size
        return source + width, target + width * 2, width

    @staticmethod
    def _slice_params(start, end, dim):
        # Python/PyTorch slicing semantics: clamp, non-negative length.
        start_c = min(max(start, 0), dim)
        end_c = min(max(end, 0), dim)
        return start_c, max(end_c - start_c, 0)

    def __call__(self, source, target, return_slices=False):
        set_x = set_y = set_z = 0
        if isinstance(self.size, tuple):
            set_x, set_y, set_z = self.size

        src_x_end, tgt_x_end, x_start = self._get_random_size(
            source.shape[0], target.shape[0], set_x)
        src_y_end, tgt_y_end, y_start = self._get_random_size(
            source.shape[1], target.shape[1], set_y)
        src_z_end, tgt_z_end, z_start = self._get_random_size(
            source.shape[2], target.shape[2], set_z)

        s_params = [
            self._slice_params(x_start, src_x_end, source.shape[0]),
            self._slice_params(y_start, src_y_end, source.shape[1]),
            self._slice_params(z_start, src_z_end, source.shape[2]),
        ]
        t_params = [
            self._slice_params(x_start * 2, tgt_x_end, target.shape[0]),
            self._slice_params(y_start * 2, tgt_y_end, target.shape[1]),
            self._slice_params(z_start * 2, tgt_z_end, target.shape[2]),
        ]
        s_starts = tuple(p[0] for p in s_params)
        s_sizes = tuple(p[1] for p in s_params)
        t_starts = tuple(p[0] for p in t_params)
        t_sizes = tuple(p[1] for p in t_params)

        if self.use_pallas:
            src_pad, tgt_pad = crop3d_pair_padded(
                source, target, (s_starts, s_sizes), (t_starts, t_sizes))
            # Exact PyTorch-shaped view: leading-corner slice of the padded
            # output (plain XLA slice; no Mosaic recompilation involved).
            src_crop = src_pad[:s_sizes[0], :s_sizes[1], :s_sizes[2]]
            tgt_crop = tgt_pad[:t_sizes[0], :t_sizes[1], :t_sizes[2]]
        else:
            src_crop = _crop_direct(source, s_starts, s_sizes)
            tgt_crop = _crop_direct(target, t_starts, t_sizes)

        if return_slices:
            return (src_crop, tgt_crop), ((s_starts, s_sizes), (t_starts, t_sizes))
        return src_crop, tgt_crop


if __name__ == "__main__":
    key = jax.random.PRNGKey(0)
    k_src, k_tgt = jax.random.split(key)

    # Small shapes: source 3-D volume, target is the 2x-resolution volume.
    source = jax.random.normal(k_src, (16, 16, 16), dtype=jnp.float32)
    target = jax.random.normal(k_tgt, (32, 32, 32), dtype=jnp.float32)

    crop = RandomCrop3D(size=5, fixed=False, seed=0, use_pallas=True)

    src_np = np.asarray(source)
    tgt_np = np.asarray(target)

    # Several calls with fresh random crop boxes all hit the SAME compiled
    # Pallas kernel (offsets/sizes are runtime SMEM scalars).
    for _ in range(3):
        (src_crop, tgt_crop), ((s_st, s_sz), (t_st, t_sz)) = crop(
            source, target, return_slices=True)
        jax.block_until_ready(src_crop)
        jax.block_until_ready(tgt_crop)

        ref_src = src_np[s_st[0]:s_st[0] + s_sz[0],
                         s_st[1]:s_st[1] + s_sz[1],
                         s_st[2]:s_st[2] + s_sz[2]]
        ref_tgt = tgt_np[t_st[0]:t_st[0] + t_sz[0],
                         t_st[1]:t_st[1] + t_sz[1],
                         t_st[2]:t_st[2] + t_sz[2]]
        np.testing.assert_array_equal(np.asarray(src_crop), ref_src)
        np.testing.assert_array_equal(np.asarray(tgt_crop), ref_tgt)

    # Exactly one compiled Pallas kernel serves every random crop box.
    assert len(_KERNEL_CACHE) == 1

    print("KERNEL_OK")
</pallas_src>

<mosaic_0001>
module attributes {stable_mosaic.version = 11 : i64} {
  func.func @kernel(%arg0: i32, %arg1: memref<16xi32, #tpu.memory_space<smem>>, %arg2: memref<16x16x16xf32, #tpu.memory_space<vmem>>, %arg3: memref<32x32x32xf32, #tpu.memory_space<vmem>>, %arg4: memref<16x16x16xf32, #tpu.memory_space<vmem>>, %arg5: memref<32x32x32xf32, #tpu.memory_space<vmem>>) attributes {dimension_semantics = [#tpu.dimension_semantics<arbitrary>], iteration_bounds = array<i64: 1>, scalar_prefetch = 1 : i64, scratch_operands = 0 : i64, tpu.core_type = #tpu.core_type<tc>, window_params = [{pipeline_mode = #tpu.pipeline_mode<synchronous>, transform_indices = @transform_0, window_bounds = array<i64: 16, 16, 16>}, {pipeline_mode = #tpu.pipeline_mode<synchronous>, transform_indices = @transform_1, window_bounds = array<i64: 32, 32, 32>}, {pipeline_mode = #tpu.pipeline_mode<synchronous>, transform_indices = @transform_2, window_bounds = array<i64: 16, 16, 16>}, {pipeline_mode = #tpu.pipeline_mode<synchronous>, transform_indices = @transform_3, window_bounds = array<i64: 32, 32, 32>}]} {
    %c0 = arith.constant 0 : index
    %0 = memref.load %arg1[%c0] : memref<16xi32, #tpu.memory_space<smem>>
    %c1 = arith.constant 1 : index
    %1 = memref.load %arg1[%c1] : memref<16xi32, #tpu.memory_space<smem>>
    %c2 = arith.constant 2 : index
    %2 = memref.load %arg1[%c2] : memref<16xi32, #tpu.memory_space<smem>>
    %c3 = arith.constant 3 : index
    %3 = memref.load %arg1[%c3] : memref<16xi32, #tpu.memory_space<smem>>
    %c4 = arith.constant 4 : index
    %4 = memref.load %arg1[%c4] : memref<16xi32, #tpu.memory_space<smem>>
    %c5 = arith.constant 5 : index
    %5 = memref.load %arg1[%c5] : memref<16xi32, #tpu.memory_space<smem>>
    %6 = tpu.iota {dimensions = array<i32: 0>} : vector<16x16xi32>
    %7 = tpu.iota {dimensions = array<i32: 1>} : vector<16x16xi32>
    %8 = vector.broadcast %1 : i32 to vector<16x16xi32>
    %9 = arith.addi %6, %8 : vector<16x16xi32>
    %10 = arith.cmpi eq, %7, %9 : vector<16x16xi32>
    %11 = vector.broadcast %4 : i32 to vector<16x16xi32>
    %12 = arith.cmpi slt, %6, %11 : vector<16x16xi32>
    %13 = arith.andi %10, %12 : vector<16x16xi1>
    %14 = arith.extui %13 : vector<16x16xi1> to vector<16x16xi32>
    %15 = arith.sitofp %14 : vector<16x16xi32> to vector<16x16xf32>
    %16 = tpu.iota {dimensions = array<i32: 0>} : vector<16x16xi32>
    %17 = tpu.iota {dimensions = array<i32: 1>} : vector<16x16xi32>
    %18 = vector.broadcast %2 : i32 to vector<16x16xi32>
    %19 = arith.addi %17, %18 : vector<16x16xi32>
    %20 = arith.cmpi eq, %16, %19 : vector<16x16xi32>
    %21 = vector.broadcast %5 : i32 to vector<16x16xi32>
    %22 = arith.cmpi slt, %17, %21 : vector<16x16xi32>
    %23 = arith.andi %20, %22 : vector<16x16xi1>
    %24 = arith.extui %23 : vector<16x16xi1> to vector<16x16xi32>
    %25 = arith.sitofp %24 : vector<16x16xi32> to vector<16x16xf32>
    %c0_i32 = arith.constant 0 : i32
    %26 = arith.addi %0, %c0_i32 : i32
    %c15_i32 = arith.constant 15 : i32
    %27 = arith.minsi %26, %c15_i32 : i32
    %28 = arith.index_cast %27 : i32 to index
    %c0_0 = arith.constant 0 : index
    %c0_1 = arith.constant 0 : index
    %29 = vector.load %arg2[%28, %c0_0, %c0_1] : memref<16x16x16xf32, #tpu.memory_space<vmem>>, vector<1x16x16xf32>
    %30 = vector.shape_cast %29 : vector<1x16x16xf32> to vector<16x16xf32>
    %cst = arith.constant dense<0.000000e+00> : vector<16x16xf32>
    %31 = tpu.matmul %15, %30, %cst {dimension_numbers = #tpu.dot_dimension_numbers<[1], [0], [0], [1], [0, 0, 1, 1], [], []>} : vector<16x16xf32>, vector<16x16xf32>, vector<16x16xf32> -> vector<16x16xf32>
    %cst_2 = arith.constant dense<0.000000e+00> : vector<16x16xf32>
    %32 = tpu.matmul %31, %25, %cst_2 {dimension_numbers = #tpu.dot_dimension_numbers<[1], [0], [0], [1], [0, 0, 1, 1], [], []>} : vector<16x16xf32>, vector<16x16xf32>, vector<16x16xf32> -> vector<16x16xf32>
    %c0_i32_3 = arith.constant 0 : i32
    %33 = arith.cmpi sgt, %3, %c0_i32_3 : i32
    %34 = arith.extui %33 : i1 to i32
    %35 = arith.sitofp %34 : i32 to f32
    %36 = vector.broadcast %35 : f32 to vector<16x16xf32>
    %37 = arith.mulf %32, %36 : vector<16x16xf32>
    %c0_4 = arith.constant 0 : index
    %c0_5 = arith.constant 0 : index
    %c0_6 = arith.constant 0 : index
    %38 = vector.load %arg4[%c0_4, %c0_5, %c0_6] : memref<16x16x16xf32, #tpu.memory_space<vmem>>, vector<1x16x16xf32>
    %39 = vector.shape_cast %38 : vector<1x16x16xf32> to vector<16x16xf32>
    %40 = vector.shape_cast %37 : vector<16x16xf32> to vector<1x16x16xf32>
    tpu.vector_store %arg4[%c0_4, %c0_5, %c0_6], %40 {strides = array<i32>} : memref<16x16x16xf32, #tpu.memory_space<vmem>>, vector<1x16x16xf32>,
    %c1_i32 = arith.constant 1 : i32
    %41 = arith.addi %0, %c1_i32 : i32
    %c15_i32_7 = arith.constant 15 : i32
    %42 = arith.minsi %41, %c15_i32_7 : i32
    %43 = arith.index_cast %42 : i32 to index
    %c0_8 = arith.constant 0 : index
    %c0_9 = arith.constant 0 : index
    %44 = vector.load %arg2[%43, %c0_8, %c0_9] : memref<16x16x16xf32, #tpu.memory_space<vmem>>, vector<1x16x16xf32>
    %45 = vector.shape_cast %44 : vector<1x16x16xf32> to vector<16x16xf32>
    %cst_10 = arith.constant dense<0.000000e+00> : vector<16x16xf32>
    %46 = tpu.matmul %15, %45, %cst_10 {dimension_numbers = #tpu.dot_dimension_numbers<[1], [0], [0], [1], [0, 0, 1, 1], [], []>} : vector<16x16xf32>, vector<16x16xf32>, vector<16x16xf32> -> vector<16x16xf32>
    %cst_11 = arith.constant dense<0.000000e+00> : vector<16x16xf32>
    %47 = tpu.matmul %46, %25, %cst_11 {dimension_numbers = #tpu.dot_dimension_numbers<[1], [0], [0], [1], [0, 0, 1, 1], [], []>} : vector<16x16xf32>, vector<16x16xf32>, vector<16x16xf32> -> vector<16x16xf32>
    %c1_i32_12 = arith.constant 1 : i32
    %48 = arith.cmpi sgt, %3, %c1_i32_12 : i32
    %49 = arith.extui %48 : i1 to i32
    %50 = arith.sitofp %49 : i32 to f32
    %51 = vector.broadcast %50 : f32 to vector<16x16xf32>
    %52 = arith.mulf %47, %51 : vector<16x16xf32>
    %c1_13 = arith.constant 1 : index
    %c0_14 = arith.constant 0 : index
    %c0_15 = arith.constant 0 : index
    %53 = vector.load %arg4[%c1_13, %c0_14, %c0_15] : memref<16x16x16xf32, #tpu.memory_space<vmem>>, vector<1x16x16xf32>
    %54 = vector.shape_cast %53 : vector<1x16x16xf32> to vector<16x16xf32>
    %55 = vector.shape_cast %52 : vector<16x16xf32> to vector<1x16x16xf32>
    tpu.vector_store %arg4[%c1_13, %c0_14, %c0_15], %55 {strides = array<i32>} : memref<16x16x16xf32, #tpu.memory_space<vmem>>, vector<1x16x16xf32>,
    %c2_i32 = arith.constant 2 : i32
    %56 = arith.addi %0, %c2_i32 : i32
    %c15_i32_16 = arith.constant 15 : i32
    %57 = arith.minsi %56, %c15_i32_16 : i32
    %58 = arith.index_cast %57 : i32 to index
    %c0_17 = arith.constant 0 : index
    %c0_18 = arith.constant 0 : index
    %59 = vector.load %arg2[%58, %c0_17, %c0_18] : memref<16x16x16xf32, #tpu.memory_space<vmem>>, vector<1x16x16xf32>
    %60 = vector.shape_cast %59 : vector<1x16x16xf32> to vector<16x16xf32>
    %cst_19 = arith.constant dense<0.000000e+00> : vector<16x16xf32>
    %61 = tpu.matmul %15, %60, %cst_19 {dimension_numbers = #tpu.dot_dimension_numbers<[1], [0], [0], [1], [0, 0, 1, 1], [], []>} : vector<16x16xf32>, vector<16x16xf32>, vector<16x16xf32> -> vector<16x16xf32>
    %cst_20 = arith.constant dense<0.000000e+00> : vector<16x16xf32>
    %62 = tpu.matmul %61, %25, %cst_20 {dimension_numbers = #tpu.dot_dimension_numbers<[1], [0], [0], [1], [0, 0, 1, 1], [], []>} : vector<16x16xf32>, vector<16x16xf32>, vector<16x16xf32> -> vector<16x16xf32>
    %c2_i32_21 = arith.constant 2 : i32
    %63 = arith.cmpi sgt, %3, %c2_i32_21 : i32
    %64 = arith.extui %63 : i1 to i32
    %65 = arith.sitofp %64 : i32 to f32
    %66 = vector.broadcast %65 : f32 to vector<16x16xf32>
    %67 = arith.mulf %62, %66 : vector<16x16xf32>
    %c2_22 = arith.constant 2 : index
    %c0_23 = arith.constant 0 : index
    %c0_24 = arith.constant 0 : index
    %68 = vector.load %arg4[%c2_22, %c0_23, %c0_24] : memref<16x16x16xf32, #tpu.memory_space<vmem>>, vector<1x16x16xf32>
    %69 = vector.shape_cast %68 : vector<1x16x16xf32> to vector<16x16xf32>
    %70 = vector.shape_cast %67 : vector<16x16xf32> to vector<1x16x16xf32>
    tpu.vector_store %arg4[%c2_22, %c0_23, %c0_24], %70 {strides = array<i32>} : memref<16x16x16xf32, #tpu.memory_space<vmem>>, vector<1x16x16xf32>,
    %c3_i32 = arith.constant 3 : i32
    %71 = arith.addi %0, %c3_i32 : i32
    %c15_i32_25 = arith.constant 15 : i32
    %72 = arith.minsi %71, %c15_i32_25 : i32
    %73 = arith.index_cast %72 : i32 to index
    %c0_26 = arith.constant 0 : index
    %c0_27 = arith.constant 0 : index
    %74 = vector.load %arg2[%73, %c0_26, %c0_27] : memref<16x16x16xf32, #tpu.memory_space<vmem>>, vector<1x16x16xf32>
    %75 = vector.shape_cast %74 : vector<1x16x16xf32> to vector<16x16xf32>
    %cst_28 = arith.constant dense<0.000000e+00> : vector<16x16xf32>
    %76 = tpu.matmul %15, %75, %cst_28 {dimension_numbers = #tpu.dot_dimension_numbers<[1], [0], [0], [1], [0, 0, 1, 1], [], []>} : vector<16x16xf32>, vector<16x16xf32>, vector<16x16xf32> -> vector<16x16xf32>
    %cst_29 = arith.constant dense<0.000000e+00> : vector<16x16xf32>
    %77 = tpu.matmul %76, %25, %cst_29 {dimension_numbers = #tpu.dot_dimension_numbers<[1], [0], [0], [1], [0, 0, 1, 1], [], []>} : vector<16x16xf32>, vector<16x16xf32>, vector<16x16xf32> -> vector<16x16xf32>
    %c3_i32_30 = arith.constant 3 : i32
    %78 = arith.cmpi sgt, %3, %c3_i32_30 : i32
    %79 = arith.extui %78 : i1 to i32
    %80 = arith.sitofp %79 : i32 to f32
    %81 = vector.broadcast %80 : f32 to vector<16x16xf32>
    %82 = arith.mulf %77, %81 : vector<16x16xf32>
    %c3_31 = arith.constant 3 : index
    %c0_32 = arith.constant 0 : index
    %c0_33 = arith.constant 0 : index
    %83 = vector.load %arg4[%c3_31, %c0_32, %c0_33] : memref<16x16x16xf32, #tpu.memory_space<vmem>>, vector<1x16x16xf32>
    %84 = vector.shape_cast %83 : vector<1x16x16xf32> to vector<16x16xf32>
    %85 = vector.shape_cast %82 : vector<16x16xf32> to vector<1x16x16xf32>
    tpu.vector_store %arg4[%c3_31, %c0_32, %c0_33], %85 {strides = array<i32>} : memref<16x16x16xf32, #tpu.memory_space<vmem>>, vector<1x16x16xf32>,
    %c4_i32 = arith.constant 4 : i32
    %86 = arith.addi %0, %c4_i32 : i32
    %c15_i32_34 = arith.constant 15 : i32
    %87 = arith.minsi %86, %c15_i32_34 : i32
    %88 = arith.index_cast %87 : i32 to index
    %c0_35 = arith.constant 0 : index
    %c0_36 = arith.constant 0 : index
    %89 = vector.load %arg2[%88, %c0_35, %c0_36] : memref<16x16x16xf32, #tpu.memory_space<vmem>>, vector<1x16x16xf32>
    %90 = vector.shape_cast %89 : vector<1x16x16xf32> to vector<16x16xf32>
    %cst_37 = arith.constant dense<0.000000e+00> : vector<16x16xf32>
    %91 = tpu.matmul %15, %90, %cst_37 {dimension_numbers = #tpu.dot_dimension_numbers<[1], [0], [0], [1], [0, 0, 1, 1], [], []>} : vector<16x16xf32>, vector<16x16xf32>, vector<16x16xf32> -> vector<16x16xf32>
    %cst_38 = arith.constant dense<0.000000e+00> : vector<16x16xf32>
    %92 = tpu.matmul %91, %25, %cst_38 {dimension_numbers = #tpu.dot_dimension_numbers<[1], [0], [0], [1], [0, 0, 1, 1], [], []>} : vector<16x16xf32>, vector<16x16xf32>, vector<16x16xf32> -> vector<16x16xf32>
    %c4_i32_39 = arith.constant 4 : i32
    %93 = arith.cmpi sgt, %3, %c4_i32_39 : i32
    %94 = arith.extui %93 : i1 to i32
    %95 = arith.sitofp %94 : i32 to f32
    %96 = vector.broadcast %95 : f32 to vector<16x16xf32>
    %97 = arith.mulf %92, %96 : vector<16x16xf32>
    %c4_40 = arith.constant 4 : index
    %c0_41 = arith.constant 0 : index
    %c0_42 = arith.constant 0 : index
    %98 = vector.load %arg4[%c4_40, %c0_41, %c0_42] : memref<16x16x16xf32, #tpu.memory_space<vmem>>, vector<1x16x16xf32>
    %99 = vector.shape_cast %98 : vector<1x16x16xf32> to vector<16x16xf32>
    %100 = vector.shape_cast %97 : vector<16x16xf32> to vector<1x16x16xf32>
    tpu.vector_store %arg4[%c4_40, %c0_41, %c0_42], %100 {strides = array<i32>} : memref<16x16x16xf32, #tpu.memory_space<vmem>>, vector<1x16x16xf32>,
    %c5_i32 = arith.constant 5 : i32
    %101 = arith.addi %0, %c5_i32 : i32
    %c15_i32_43 = arith.constant 15 : i32
    %102 = arith.minsi %101, %c15_i32_43 : i32
    %103 = arith.index_cast %102 : i32 to index
    %c0_44 = arith.constant 0 : index
    %c0_45 = arith.constant 0 : index
    %104 = vector.load %arg2[%103, %c0_44, %c0_45] : memref<16x16x16xf32, #tpu.memory_space<vmem>>, vector<1x16x16xf32>
    %105 = vector.shape_cast %104 : vector<1x16x16xf32> to vector<16x16xf32>
    %cst_46 = arith.constant dense<0.000000e+00> : vector<16x16xf32>
    %106 = tpu.matmul %15, %105, %cst_46 {dimension_numbers = #tpu.dot_dimension_numbers<[1], [0], [0], [1], [0, 0, 1, 1], [], []>} : vector<16x16xf32>, vector<16x16xf32>, vector<16x16xf32> -> vector<16x16xf32>
    %cst_47 = arith.constant dense<0.000000e+00> : vector<16x16xf32>
    %107 = tpu.matmul %106, %25, %cst_47 {dimension_numbers = #tpu.dot_dimension_numbers<[1], [0], [0], [1], [0, 0, 1, 1], [], []>} : vector<16x16xf32>, vector<16x16xf32>, vector<16x16xf32> -> vector<16x16xf32>
    %c5_i32_48 = arith.constant 5 : i32
    %108 = arith.cmpi sgt, %3, %c5_i32_48 : i32
    %109 = arith.extui %108 : i1 to i32
    %110 = arith.sitofp %109 : i32 to f32
    %111 = vector.broadcast %110 : f32 to vector<16x16xf32>
    %112 = arith.mulf %107, %111 : vector<16x16xf32>
    %c5_49 = arith.constant 5 : index
    %c0_50 = arith.constant 0 : index
    %c0_51 = arith.constant 0 : index
    %113 = vector.load %arg4[%c5_49, %c0_50, %c0_51] : memref<16x16x16xf32, #tpu.memory_space<vmem>>, vector<1x16x16xf32>
    %114 = vector.shape_cast %113 : vector<1x16x16xf32> to vector<16x16xf32>
    %115 = vector.shape_cast %112 : vector<16x16xf32> to vector<1x16x16xf32>
    tpu.vector_store %arg4[%c5_49, %c0_50, %c0_51], %115 {strides = array<i32>} : memref<16x16x16xf32, #tpu.memory_space<vmem>>, vector<1x16x16xf32>,
    %c6_i32 = arith.constant 6 : i32
    %116 = arith.addi %0, %c6_i32 : i32
    %c15_i32_52 = arith.constant 15 : i32
    %117 = arith.minsi %116, %c15_i32_52 : i32
    %118 = arith.index_cast %117 : i32 to index
    %c0_53 = arith.constant 0 : index
    %c0_54 = arith.constant 0 : index
    %119 = vector.load %arg2[%118, %c0_53, %c0_54] : memref<16x16x16xf32, #tpu.memory_space<vmem>>, vector<1x16x16xf32>
    %120 = vector.shape_cast %119 : vector<1x16x16xf32> to vector<16x16xf32>
    %cst_55 = arith.constant dense<0.000000e+00> : vector<16x16xf32>
    %121 = tpu.matmul %15, %120, %cst_55 {dimension_numbers = #tpu.dot_dimension_numbers<[1], [0], [0], [1], [0, 0, 1, 1], [], []>} : vector<16x16xf32>, vector<16x16xf32>, vector<16x16xf32> -> vector<16x16xf32>
    %cst_56 = arith.constant dense<0.000000e+00> : vector<16x16xf32>
    %122 = tpu.matmul %121, %25, %cst_56 {dimension_numbers = #tpu.dot_dimension_numbers<[1], [0], [0], [1], [0, 0, 1, 1], [], []>} : vector<16x16xf32>, vector<16x16xf32>, vector<16x16xf32> -> vector<16x16xf32>
    %c6_i32_57 = arith.constant 6 : i32
    %123 = arith.cmpi sgt, %3, %c6_i32_57 : i32
    %124 = arith.extui %123 : i1 to i32
    %125 = arith.sitofp %124 : i32 to f32
    %126 = vector.broadcast %125 : f32 to vector<16x16xf32>
    %127 = arith.mulf %122, %126 : vector<16x16xf32>
    %c6 = arith.constant 6 : index
    %c0_58 = arith.constant 0 : index
    %c0_59 = arith.constant 0 : index
    %128 = vector.load %arg4[%c6, %c0_58, %c0_59] : memref<16x16x16xf32, #tpu.memory_space<vmem>>, vector<1x16x16xf32>
    %129 = vector.shape_cast %128 : vector<1x16x16xf32> to vector<16x16xf32>
    %130 = vector.shape_cast %127 : vector<16x16xf32> to vector<1x16x16xf32>
    tpu.vector_store %arg4[%c6, %c0_58, %c0_59], %130 {strides = array<i32>} : memref<16x16x16xf32, #tpu.memory_space<vmem>>, vector<1x16x16xf32>,
    %c7_i32 = arith.constant 7 : i32
    %131 = arith.addi %0, %c7_i32 : i32
    %c15_i32_60 = arith.constant 15 : i32
    %132 = arith.minsi %131, %c15_i32_60 : i32
    %133 = arith.index_cast %132 : i32 to index
    %c0_61 = arith.constant 0 : index
    %c0_62 = arith.constant 0 : index
    %134 = vector.load %arg2[%133, %c0_61, %c0_62] : memref<16x16x16xf32, #tpu.memory_space<vmem>>, vector<1x16x16xf32>
    %135 = vector.shape_cast %134 : vector<1x16x16xf32> to vector<16x16xf32>
    %cst_63 = arith.constant dense<0.000000e+00> : vector<16x16xf32>
    %136 = tpu.matmul %15, %135, %cst_63 {dimension_numbers = #tpu.dot_dimension_numbers<[1], [0], [0], [1], [0, 0, 1, 1], [], []>} : vector<16x16xf32>, vector<16x16xf32>, vector<16x16xf32> -> vector<16x16xf32>
    %cst_64 = arith.constant dense<0.000000e+00> : vector<16x16xf32>
    %137 = tpu.matmul %136, %25, %cst_64 {dimension_numbers = #tpu.dot_dimension_numbers<[1], [0], [0], [1], [0, 0, 1, 1], [], []>} : vector<16x16xf32>, vector<16x16xf32>, vector<16x16xf32> -> vector<16x16xf32>
    %c7_i32_65 = arith.constant 7 : i32
    %138 = arith.cmpi sgt, %3, %c7_i32_65 : i32
    %139 = arith.extui %138 : i1 to i32
    %140 = arith.sitofp %139 : i32 to f32
    %141 = vector.broadcast %140 : f32 to vector<16x16xf32>
    %142 = arith.mulf %137, %141 : vector<16x16xf32>
    %c7 = arith.constant 7 : index
    %c0_66 = arith.constant 0 : index
    %c0_67 = arith.constant 0 : index
    %143 = vector.load %arg4[%c7, %c0_66, %c0_67] : memref<16x16x16xf32, #tpu.memory_space<vmem>>, vector<1x16x16xf32>
    %144 = vector.shape_cast %143 : vector<1x16x16xf32> to vector<16x16xf32>
    %145 = vector.shape_cast %142 : vector<16x16xf32> to vector<1x16x16xf32>
    tpu.vector_store %arg4[%c7, %c0_66, %c0_67], %145 {strides = array<i32>} : memref<16x16x16xf32, #tpu.memory_space<vmem>>, vector<1x16x16xf32>,
    %c8_i32 = arith.constant 8 : i32
    %146 = arith.addi %0, %c8_i32 : i32
    %c15_i32_68 = arith.constant 15 : i32
    %147 = arith.minsi %146, %c15_i32_68 : i32
    %148 = arith.index_cast %147 : i32 to index
    %c0_69 = arith.constant 0 : index
    %c0_70 = arith.constant 0 : index
    %149 = vector.load %arg2[%148, %c0_69, %c0_70] : memref<16x16x16xf32, #tpu.memory_space<vmem>>, vector<1x16x16xf32>
    %150 = vector.shape_cast %149 : vector<1x16x16xf32> to vector<16x16xf32>
    %cst_71 = arith.constant dense<0.000000e+00> : vector<16x16xf32>
    %151 = tpu.matmul %15, %150, %cst_71 {dimension_numbers = #tpu.dot_dimension_numbers<[1], [0], [0], [1], [0, 0, 1, 1], [], []>} : vector<16x16xf32>, vector<16x16xf32>, vector<16x16xf32> -> vector<16x16xf32>
    %cst_72 = arith.constant dense<0.000000e+00> : vector<16x16xf32>
    %152 = tpu.matmul %151, %25, %cst_72 {dimension_numbers = #tpu.dot_dimension_numbers<[1], [0], [0], [1], [0, 0, 1, 1], [], []>} : vector<16x16xf32>, vector<16x16xf32>, vector<16x16xf32> -> vector<16x16xf32>
    %c8_i32_73 = arith.constant 8 : i32
    %153 = arith.cmpi sgt, %3, %c8_i32_73 : i32
    %154 = arith.extui %153 : i1 to i32
    %155 = arith.sitofp %154 : i32 to f32
    %156 = vector.broadcast %155 : f32 to vector<16x16xf32>
    %157 = arith.mulf %152, %156 : vector<16x16xf32>
    %c8 = arith.constant 8 : index
    %c0_74 = arith.constant 0 : index
    %c0_75 = arith.constant 0 : index
    %158 = vector.load %arg4[%c8, %c0_74, %c0_75] : memref<16x16x16xf32, #tpu.memory_space<vmem>>, vector<1x16x16xf32>
    %159 = vector.shape_cast %158 : vector<1x16x16xf32> to vector<16x16xf32>
    %160 = vector.shape_cast %157 : vector<16x16xf32> to vector<1x16x16xf32>
    tpu.vector_store %arg4[%c8, %c0_74, %c0_75], %160 {strides = array<i32>} : memref<16x16x16xf32, #tpu.memory_space<vmem>>, vector<1x16x16xf32>,
    %c9_i32 = arith.constant 9 : i32
    %161 = arith.addi %0, %c9_i32 : i32
    %c15_i32_76 = arith.constant 15 : i32
    %162 = arith.minsi %161, %c15_i32_76 : i32
    %163 = arith.index_cast %162 : i32 to index
    %c0_77 = arith.constant 0 : index
    %c0_78 = arith.constant 0 : index
    %164 = vector.load %arg2[%163, %c0_77, %c0_78] : memref<16x16x16xf32, #tpu.memory_space<vmem>>, vector<1x16x16xf32>
    %165 = vector.shape_cast %164 : vector<1x16x16xf32> to vector<16x16xf32>
    %cst_79 = arith.constant dense<0.000000e+00> : vector<16x16xf32>
    %166 = tpu.matmul %15, %165, %cst_79 {dimension_numbers = #tpu.dot_dimension_numbers<[1], [0], [0], [1], [0, 0, 1, 1], [], []>} : vector<16x16xf32>, vector<16x16xf32>, vector<16x16xf32> -> vector<16x16xf32>
    %cst_80 = arith.constant dense<0.000000e+00> : vector<16x16xf32>
    %167 = tpu.matmul %166, %25, %cst_80 {dimension_numbers = #tpu.dot_dimension_numbers<[1], [0], [0], [1], [0, 0, 1, 1], [], []>} : vector<16x16xf32>, vector<16x16xf32>, vector<16x16xf32> -> vector<16x16xf32>
    %c9_i32_81 = arith.constant 9 : i32
    %168 = arith.cmpi sgt, %3, %c9_i32_81 : i32
    %169 = arith.extui %168 : i1 to i32
    %170 = arith.sitofp %169 : i32 to f32
    %171 = vector.broadcast %170 : f32 to vector<16x16xf32>
    %172 = arith.mulf %167, %171 : vector<16x16xf32>
    %c9 = arith.constant 9 : index
    %c0_82 = arith.constant 0 : index
    %c0_83 = arith.constant 0 : index
    %173 = vector.load %arg4[%c9, %c0_82, %c0_83] : memref<16x16x16xf32, #tpu.memory_space<vmem>>, vector<1x16x16xf32>
    %174 = vector.shape_cast %173 : vector<1x16x16xf32> to vector<16x16xf32>
    %175 = vector.shape_cast %172 : vector<16x16xf32> to vector<1x16x16xf32>
    tpu.vector_store %arg4[%c9, %c0_82, %c0_83], %175 {strides = array<i32>} : memref<16x16x16xf32, #tpu.memory_space<vmem>>, vector<1x16x16xf32>,
    %c10_i32 = arith.constant 10 : i32
    %176 = arith.addi %0, %c10_i32 : i32
    %c15_i32_84 = arith.constant 15 : i32
    %177 = arith.minsi %176, %c15_i32_84 : i32
    %178 = arith.index_cast %177 : i32 to index
    %c0_85 = arith.constant 0 : index
    %c0_86 = arith.constant 0 : index
    %179 = vector.load %arg2[%178, %c0_85, %c0_86] : memref<16x16x16xf32, #tpu.memory_space<vmem>>, vector<1x16x16xf32>
    %180 = vector.shape_cast %179 : vector<1x16x16xf32> to vector<16x16xf32>
    %cst_87 = arith.constant dense<0.000000e+00> : vector<16x16xf32>
    %181 = tpu.matmul %15, %180, %cst_87 {dimension_numbers = #tpu.dot_dimension_numbers<[1], [0], [0], [1], [0, 0, 1, 1], [], []>} : vector<16x16xf32>, vector<16x16xf32>, vector<16x16xf32> -> vector<16x16xf32>
    %cst_88 = arith.constant dense<0.000000e+00> : vector<16x16xf32>
    %182 = tpu.matmul %181, %25, %cst_88 {dimension_numbers = #tpu.dot_dimension_numbers<[1], [0], [0], [1], [0, 0, 1, 1], [], []>} : vector<16x16xf32>, vector<16x16xf32>, vector<16x16xf32> -> vector<16x16xf32>
    %c10_i32_89 = arith.constant 10 : i32
    %183 = arith.cmpi sgt, %3, %c10_i32_89 : i32
    %184 = arith.extui %183 : i1 to i32
    %185 = arith.sitofp %184 : i32 to f32
    %186 = vector.broadcast %185 : f32 to vector<16x16xf32>
    %187 = arith.mulf %182, %186 : vector<16x16xf32>
    %c10 = arith.constant 10 : index
    %c0_90 = arith.constant 0 : index
    %c0_91 = arith.constant 0 : index
    %188 = vector.load %arg4[%c10, %c0_90, %c0_91] : memref<16x16x16xf32, #tpu.memory_space<vmem>>, vector<1x16x16xf32>
    %189 = vector.shape_cast %188 : vector<1x16x16xf32> to vector<16x16xf32>
    %190 = vector.shape_cast %187 : vector<16x16xf32> to vector<1x16x16xf32>
    tpu.vector_store %arg4[%c10, %c0_90, %c0_91], %190 {strides = array<i32>} : memref<16x16x16xf32, #tpu.memory_space<vmem>>, vector<1x16x16xf32>,
    %c11_i32 = arith.constant 11 : i32
    %191 = arith.addi %0, %c11_i32 : i32
    %c15_i32_92 = arith.constant 15 : i32
    %192 = arith.minsi %191, %c15_i32_92 : i32
    %193 = arith.index_cast %192 : i32 to index
    %c0_93 = arith.constant 0 : index
    %c0_94 = arith.constant 0 : index
    %194 = vector.load %arg2[%193, %c0_93, %c0_94] : memref<16x16x16xf32, #tpu.memory_space<vmem>>, vector<1x16x16xf32>
    %195 = vector.shape_cast %194 : vector<1x16x16xf32> to vector<16x16xf32>
    %cst_95 = arith.constant dense<0.000000e+00> : vector<16x16xf32>
    %196 = tpu.matmul %15, %195, %cst_95 {dimension_numbers = #tpu.dot_dimension_numbers<[1], [0], [0], [1], [0, 0, 1, 1], [], []>} : vector<16x16xf32>, vector<16x16xf32>, vector<16x16xf32> -> vector<16x16xf32>
    %cst_96 = arith.constant dense<0.000000e+00> : vector<16x16xf32>
    %197 = tpu.matmul %196, %25, %cst_96 {dimension_numbers = #tpu.dot_dimension_numbers<[1], [0], [0], [1], [0, 0, 1, 1], [], []>} : vector<16x16xf32>, vector<16x16xf32>, vector<16x16xf32> -> vector<16x16xf32>
    %c11_i32_97 = arith.constant 11 : i32
    %198 = arith.cmpi sgt, %3, %c11_i32_97 : i32
    %199 = arith.extui %198 : i1 to i32
    %200 = arith.sitofp %199 : i32 to f32
    %201 = vector.broadcast %200 : f32 to vector<16x16xf32>
    %202 = arith.mulf %197, %201 : vector<16x16xf32>
    %c11 = arith.constant 11 : index
    %c0_98 = arith.constant 0 : index
    %c0_99 = arith.constant 0 : index
    %203 = vector.load %arg4[%c11, %c0_98, %c0_99] : memref<16x16x16xf32, #tpu.memory_space<vmem>>, vector<1x16x16xf32>
    %204 = vector.shape_cast %203 : vector<1x16x16xf32> to vector<16x16xf32>
    %205 = vector.shape_cast %202 : vector<16x16xf32> to vector<1x16x16xf32>
    tpu.vector_store %arg4[%c11, %c0_98, %c0_99], %205 {strides = array<i32>} : memref<16x16x16xf32, #tpu.memory_space<vmem>>, vector<1x16x16xf32>,
    %c12_i32 = arith.constant 12 : i32
    %206 = arith.addi %0, %c12_i32 : i32
    %c15_i32_100 = arith.constant 15 : i32
    %207 = arith.minsi %206, %c15_i32_100 : i32
    %208 = arith.index_cast %207 : i32 to index
    %c0_101 = arith.constant 0 : index
    %c0_102 = arith.constant 0 : index
    %209 = vector.load %arg2[%208, %c0_101, %c0_102] : memref<16x16x16xf32, #tpu.memory_space<vmem>>, vector<1x16x16xf32>
    %210 = vector.shape_cast %209 : vector<1x16x16xf32> to vector<16x16xf32>
    %cst_103 = arith.constant dense<0.000000e+00> : vector<16x16xf32>
    %211 = tpu.matmul %15, %210, %cst_103 {dimension_numbers = #tpu.dot_dimension_numbers<[1], [0], [0], [1], [0, 0, 1, 1], [], []>} : vector<16x16xf32>, vector<16x16xf32>, vector<16x16xf32> -> vector<16x16xf32>
    %cst_104 = arith.constant dense<0.000000e+00> : vector<16x16xf32>
    %212 = tpu.matmul %211, %25, %cst_104 {dimension_numbers = #tpu.dot_dimension_numbers<[1], [0], [0], [1], [0, 0, 1, 1], [], []>} : vector<16x16xf32>, vector<16x16xf32>, vector<16x16xf32> -> vector<16x16xf32>
    %c12_i32_105 = arith.constant 12 : i32
    %213 = arith.cmpi sgt, %3, %c12_i32_105 : i32
    %214 = arith.extui %213 : i1 to i32
    %215 = arith.sitofp %214 : i32 to f32
    %216 = vector.broadcast %215 : f32 to vector<16x16xf32>
    %217 = arith.mulf %212, %216 : vector<16x16xf32>
    %c12 = arith.constant 12 : index
    %c0_106 = arith.constant 0 : index
    %c0_107 = arith.constant 0 : index
    %218 = vector.load %arg4[%c12, %c0_106, %c0_107] : memref<16x16x16xf32, #tpu.memory_space<vmem>>, vector<1x16x16xf32>
    %219 = vector.shape_cast %218 : vector<1x16x16xf32> to vector<16x16xf32>
    %220 = vector.shape_cast %217 : vector<16x16xf32> to vector<1x16x16xf32>
    tpu.vector_store %arg4[%c12, %c0_106, %c0_107], %220 {strides = array<i32>} : memref<16x16x16xf32, #tpu.memory_space<vmem>>, vector<1x16x16xf32>,
    %c13_i32 = arith.constant 13 : i32
    %221 = arith.addi %0, %c13_i32 : i32
    %c15_i32_108 = arith.constant 15 : i32
    %222 = arith.minsi %221, %c15_i32_108 : i32
    %223 = arith.index_cast %222 : i32 to index
    %c0_109 = arith.constant 0 : index
    %c0_110 = arith.constant 0 : index
    %224 = vector.load %arg2[%223, %c0_109, %c0_110] : memref<16x16x16xf32, #tpu.memory_space<vmem>>, vector<1x16x16xf32>
    %225 = vector.shape_cast %224 : vector<1x16x16xf32> to vector<16x16xf32>
    %cst_111 = arith.constant dense<0.000000e+00> : vector<16x16xf32>
    %226 = tpu.matmul %15, %225, %cst_111 {dimension_numbers = #tpu.dot_dimension_numbers<[1], [0], [0], [1], [0, 0, 1, 1], [], []>} : vector<16x16xf32>, vector<16x16xf32>, vector<16x16xf32> -> vector<16x16xf32>
    %cst_112 = arith.constant dense<0.000000e+00> : vector<16x16xf32>
    %227 = tpu.matmul %226, %25, %cst_112 {dimension_numbers = #tpu.dot_dimension_numbers<[1], [0], [0], [1], [0, 0, 1, 1], [], []>} : vector<16x16xf32>, vector<16x16xf32>, vector<16x16xf32> -> vector<16x16xf32>
    %c13_i32_113 = arith.constant 13 : i32
    %228 = arith.cmpi sgt, %3, %c13_i32_113 : i32
    %229 = arith.extui %228 : i1 to i32
    %230 = arith.sitofp %229 : i32 to f32
    %231 = vector.broadcast %230 : f32 to vector<16x16xf32>
    %232 = arith.mulf %227, %231 : vector<16x16xf32>
    %c13 = arith.constant 13 : index
    %c0_114 = arith.constant 0 : index
    %c0_115 = arith.constant 0 : index
    %233 = vector.load %arg4[%c13, %c0_114, %c0_115] : memref<16x16x16xf32, #tpu.memory_space<vmem>>, vector<1x16x16xf32>
    %234 = vector.shape_cast %233 : vector<1x16x16xf32> to vector<16x16xf32>
    %235 = vector.shape_cast %232 : vector<16x16xf32> to vector<1x16x16xf32>
    tpu.vector_store %arg4[%c13, %c0_114, %c0_115], %235 {strides = array<i32>} : memref<16x16x16xf32, #tpu.memory_space<vmem>>, vector<1x16x16xf32>,
    %c14_i32 = arith.constant 14 : i32
    %236 = arith.addi %0, %c14_i32 : i32
    %c15_i32_116 = arith.constant 15 : i32
    %237 = arith.minsi %236, %c15_i32_116 : i32
    %238 = arith.index_cast %237 : i32 to index
    %c0_117 = arith.constant 0 : index
    %c0_118 = arith.constant 0 : index
    %239 = vector.load %arg2[%238, %c0_117, %c0_118] : memref<16x16x16xf32, #tpu.memory_space<vmem>>, vector<1x16x16xf32>
    %240 = vector.shape_cast %239 : vector<1x16x16xf32> to vector<16x16xf32>
    %cst_119 = arith.constant dense<0.000000e+00> : vector<16x16xf32>
    %241 = tpu.matmul %15, %240, %cst_119 {dimension_numbers = #tpu.dot_dimension_numbers<[1], [0], [0], [1], [0, 0, 1, 1], [], []>} : vector<16x16xf32>, vector<16x16xf32>, vector<16x16xf32> -> vector<16x16xf32>
    %cst_120 = arith.constant dense<0.000000e+00> : vector<16x16xf32>
    %242 = tpu.matmul %241, %25, %cst_120 {dimension_numbers = #tpu.dot_dimension_numbers<[1], [0], [0], [1], [0, 0, 1, 1], [], []>} : vector<16x16xf32>, vector<16x16xf32>, vector<16x16xf32> -> vector<16x16xf32>
    %c14_i32_121 = arith.constant 14 : i32
    %243 = arith.cmpi sgt, %3, %c14_i32_121 : i32
    %244 = arith.extui %243 : i1 to i32
    %245 = arith.sitofp %244 : i32 to f32
    %246 = vector.broadcast %245 : f32 to vector<16x16xf32>
    %247 = arith.mulf %242, %246 : vector<16x16xf32>
    %c14 = arith.constant 14 : index
    %c0_122 = arith.constant 0 : index
    %c0_123 = arith.constant 0 : index
    %248 = vector.load %arg4[%c14, %c0_122, %c0_123] : memref<16x16x16xf32, #tpu.memory_space<vmem>>, vector<1x16x16xf32>
    %249 = vector.shape_cast %248 : vector<1x16x16xf32> to vector<16x16xf32>
    %250 = vector.shape_cast %247 : vector<16x16xf32> to vector<1x16x16xf32>
    tpu.vector_store %arg4[%c14, %c0_122, %c0_123], %250 {strides = array<i32>} : memref<16x16x16xf32, #tpu.memory_space<vmem>>, vector<1x16x16xf32>,
    %c15_i32_124 = arith.constant 15 : i32
    %251 = arith.addi %0, %c15_i32_124 : i32
    %c15_i32_125 = arith.constant 15 : i32
    %252 = arith.minsi %251, %c15_i32_125 : i32
    %253 = arith.index_cast %252 : i32 to index
    %c0_126 = arith.constant 0 : index
    %c0_127 = arith.constant 0 : index
    %254 = vector.load %arg2[%253, %c0_126, %c0_127] : memref<16x16x16xf32, #tpu.memory_space<vmem>>, vector<1x16x16xf32>
    %255 = vector.shape_cast %254 : vector<1x16x16xf32> to vector<16x16xf32>
    %cst_128 = arith.constant dense<0.000000e+00> : vector<16x16xf32>
    %256 = tpu.matmul %15, %255, %cst_128 {dimension_numbers = #tpu.dot_dimension_numbers<[1], [0], [0], [1], [0, 0, 1, 1], [], []>} : vector<16x16xf32>, vector<16x16xf32>, vector<16x16xf32> -> vector<16x16xf32>
    %cst_129 = arith.constant dense<0.000000e+00> : vector<16x16xf32>
    %257 = tpu.matmul %256, %25, %cst_129 {dimension_numbers = #tpu.dot_dimension_numbers<[1], [0], [0], [1], [0, 0, 1, 1], [], []>} : vector<16x16xf32>, vector<16x16xf32>, vector<16x16xf32> -> vector<16x16xf32>
    %c15_i32_130 = arith.constant 15 : i32
    %258 = arith.cmpi sgt, %3, %c15_i32_130 : i32
    %259 = arith.extui %258 : i1 to i32
    %260 = arith.sitofp %259 : i32 to f32
    %261 = vector.broadcast %260 : f32 to vector<16x16xf32>
    %262 = arith.mulf %257, %261 : vector<16x16xf32>
    %c15 = arith.constant 15 : index
    %c0_131 = arith.constant 0 : index
    %c0_132 = arith.constant 0 : index
    %263 = vector.load %arg4[%c15, %c0_131, %c0_132] : memref<16x16x16xf32, #tpu.memory_space<vmem>>, vector<1x16x16xf32>
    %264 = vector.shape_cast %263 : vector<1x16x16xf32> to vector<16x16xf32>
    %265 = vector.shape_cast %262 : vector<16x16xf32> to vector<1x16x16xf32>
    tpu.vector_store %arg4[%c15, %c0_131, %c0_132], %265 {strides = array<i32>} : memref<16x16x16xf32, #tpu.memory_space<vmem>>, vector<1x16x16xf32>,
    %c8_133 = arith.constant 8 : index
    %266 = memref.load %arg1[%c8_133] : memref<16xi32, #tpu.memory_space<smem>>
    %c9_134 = arith.constant 9 : index
    %267 = memref.load %arg1[%c9_134] : memref<16xi32, #tpu.memory_space<smem>>
    %c10_135 = arith.constant 10 : index
    %268 = memref.load %arg1[%c10_135] : memref<16xi32, #tpu.memory_space<smem>>
    %c11_136 = arith.constant 11 : index
    %269 = memref.load %arg1[%c11_136] : memref<16xi32, #tpu.memory_space<smem>>
    %c12_137 = arith.constant 12 : index
    %270 = memref.load %arg1[%c12_137] : memref<16xi32, #tpu.memory_space<smem>>
    %c13_138 = arith.constant 13 : index
    %271 = memref.load %arg1[%c13_138] : memref<16xi32, #tpu.memory_space<smem>>
    %272 = tpu.iota {dimensions = array<i32: 0>} : vector<32x32xi32>
    %273 = tpu.iota {dimensions = array<i32: 1>} : vector<32x32xi32>
    %274 = vector.broadcast %267 : i32 to vector<32x32xi32>
    %275 = arith.addi %272, %274 : vector<32x32xi32>
    %276 = arith.cmpi eq, %273, %275 : vector<32x32xi32>
    %277 = vector.broadcast %270 : i32 to vector<32x32xi32>
    %278 = arith.cmpi slt, %272, %277 : vector<32x32xi32>
    %279 = arith.andi %276, %278 : vector<32x32xi1>
    %280 = arith.extui %279 : vector<32x32xi1> to vector<32x32xi32>
    %281 = arith.sitofp %280 : vector<32x32xi32> to vector<32x32xf32>
    %282 = tpu.iota {dimensions = array<i32: 0>} : vector<32x32xi32>
    %283 = tpu.iota {dimensions = array<i32: 1>} : vector<32x32xi32>
    %284 = vector.broadcast %268 : i32 to vector<32x32xi32>
    %285 = arith.addi %283, %284 : vector<32x32xi32>
    %286 = arith.cmpi eq, %282, %285 : vector<32x32xi32>
    %287 = vector.broadcast %271 : i32 to vector<32x32xi32>
    %288 = arith.cmpi slt, %283, %287 : vector<32x32xi32>
    %289 = arith.andi %286, %288 : vector<32x32xi1>
    %290 = arith.extui %289 : vector<32x32xi1> to vector<32x32xi32>
    %291 = arith.sitofp %290 : vector<32x32xi32> to vector<32x32xf32>
    %c0_i32_139 = arith.constant 0 : i32
    %292 = arith.addi %266, %c0_i32_139 : i32
    %c31_i32 = arith.constant 31 : i32
    %293 = arith.minsi %292, %c31_i32 : i32
    %294 = arith.index_cast %293 : i32 to index
    %c0_140 = arith.constant 0 : index
    %c0_141 = arith.constant 0 : index
    %295 = vector.load %arg3[%294, %c0_140, %c0_141] : memref<32x32x32xf32, #tpu.memory_space<vmem>>, vector<1x32x32xf32>
    %296 = vector.shape_cast %295 : vector<1x32x32xf32> to vector<32x32xf32>
    %cst_142 = arith.constant dense<0.000000e+00> : vector<32x32xf32>
    %297 = tpu.matmul %281, %296, %cst_142 {dimension_numbers = #tpu.dot_dimension_numbers<[1], [0], [0], [1], [0, 0, 1, 1], [], []>} : vector<32x32xf32>, vector<32x32xf32>, vector<32x32xf32> -> vector<32x32xf32>
    %cst_143 = arith.constant dense<0.000000e+00> : vector<32x32xf32>
    %298 = tpu.matmul %297, %291, %cst_143 {dimension_numbers = #tpu.dot_dimension_numbers<[1], [0], [0], [1], [0, 0, 1, 1], [], []>} : vector<32x32xf32>, vector<32x32xf32>, vector<32x32xf32> -> vector<32x32xf32>
    %c0_i32_144 = arith.constant 0 : i32
    %299 = arith.cmpi sgt, %269, %c0_i32_144 : i32
    %300 = arith.extui %299 : i1 to i32
    %301 = arith.sitofp %300 : i32 to f32
    %302 = vector.broadcast %301 : f32 to vector<32x32xf32>
    %303 = arith.mulf %298, %302 : vector<32x32xf32>
    %c0_145 = arith.constant 0 : index
    %c0_146 = arith.constant 0 : index
    %c0_147 = arith.constant 0 : index
    %304 = vector.load %arg5[%c0_145, %c0_146, %c0_147] : memref<32x32x32xf32, #tpu.memory_space<vmem>>, vector<1x32x32xf32>
    %305 = vector.shape_cast %304 : vector<1x32x32xf32> to vector<32x32xf32>
    %306 = vector.shape_cast %303 : vector<32x32xf32> to vector<1x32x32xf32>
    tpu.vector_store %arg5[%c0_145, %c0_146, %c0_147], %306 {strides = array<i32>} : memref<32x32x32xf32, #tpu.memory_space<vmem>>, vector<1x32x32xf32>,
    %c1_i32_148 = arith.constant 1 : i32
    %307 = arith.addi %266, %c1_i32_148 : i32
    %c31_i32_149 = arith.constant 31 : i32
    %308 = arith.minsi %307, %c31_i32_149 : i32
    %309 = arith.index_cast %308 : i32 to index
    %c0_150 = arith.constant 0 : index
    %c0_151 = arith.constant 0 : index
    %310 = vector.load %arg3[%309, %c0_150, %c0_151] : memref<32x32x32xf32, #tpu.memory_space<vmem>>, vector<1x32x32xf32>
    %311 = vector.shape_cast %310 : vector<1x32x32xf32> to vector<32x32xf32>
    %cst_152 = arith.constant dense<0.000000e+00> : vector<32x32xf32>
    %312 = tpu.matmul %281, %311, %cst_152 {dimension_numbers = #tpu.dot_dimension_numbers<[1], [0], [0], [1], [0, 0, 1, 1], [], []>} : vector<32x32xf32>, vector<32x32xf32>, vector<32x32xf32> -> vector<32x32xf32>
    %cst_153 = arith.constant dense<0.000000e+00> : vector<32x32xf32>
    %313 = tpu.matmul %312, %291, %cst_153 {dimension_numbers = #tpu.dot_dimension_numbers<[1], [0], [0], [1], [0, 0, 1, 1], [], []>} : vector<32x32xf32>, vector<32x32xf32>, vector<32x32xf32> -> vector<32x32xf32>
    %c1_i32_154 = arith.constant 1 : i32
    %314 = arith.cmpi sgt, %269, %c1_i32_154 : i32
    %315 = arith.extui %314 : i1 to i32
    %316 = arith.sitofp %315 : i32 to f32
    %317 = vector.broadcast %316 : f32 to vector<32x32xf32>
    %318 = arith.mulf %313, %317 : vector<32x32xf32>
    %c1_155 = arith.constant 1 : index
    %c0_156 = arith.constant 0 : index
    %c0_157 = arith.constant 0 : index
    %319 = vector.load %arg5[%c1_155, %c0_156, %c0_157] : memref<32x32x32xf32, #tpu.memory_space<vmem>>, vector<1x32x32xf32>
    %320 = vector.shape_cast %319 : vector<1x32x32xf32> to vector<32x32xf32>
    %321 = vector.shape_cast %318 : vector<32x32xf32> to vector<1x32x32xf32>
    tpu.vector_store %arg5[%c1_155, %c0_156, %c0_157], %321 {strides = array<i32>} : memref<32x32x32xf32, #tpu.memory_space<vmem>>, vector<1x32x32xf32>,
    %c2_i32_158 = arith.constant 2 : i32
    %322 = arith.addi %266, %c2_i32_158 : i32
    %c31_i32_159 = arith.constant 31 : i32
    %323 = arith.minsi %322, %c31_i32_159 : i32
    %324 = arith.index_cast %323 : i32 to index
    %c0_160 = arith.constant 0 : index
    %c0_161 = arith.constant 0 : index
    %325 = vector.load %arg3[%324, %c0_160, %c0_161] : memref<32x32x32xf32, #tpu.memory_space<vmem>>, vector<1x32x32xf32>
    %326 = vector.shape_cast %325 : vector<1x32x32xf32> to vector<32x32xf32>
    %cst_162 = arith.constant dense<0.000000e+00> : vector<32x32xf32>
    %327 = tpu.matmul %281, %326, %cst_162 {dimension_numbers = #tpu.dot_dimension_numbers<[1], [0], [0], [1], [0, 0, 1, 1], [], []>} : vector<32x32xf32>, vector<32x32xf32>, vector<32x32xf32> -> vector<32x32xf32>
    %cst_163 = arith.constant dense<0.000000e+00> : vector<32x32xf32>
    %328 = tpu.matmul %327, %291, %cst_163 {dimension_numbers = #tpu.dot_dimension_numbers<[1], [0], [0], [1], [0, 0, 1, 1], [], []>} : vector<32x32xf32>, vector<32x32xf32>, vector<32x32xf32> -> vector<32x32xf32>
    %c2_i32_164 = arith.constant 2 : i32
    %329 = arith.cmpi sgt, %269, %c2_i32_164 : i32
    %330 = arith.extui %329 : i1 to i32
    %331 = arith.sitofp %330 : i32 to f32
    %332 = vector.broadcast %331 : f32 to vector<32x32xf32>
    %333 = arith.mulf %328, %332 : vector<32x32xf32>
    %c2_165 = arith.constant 2 : index
    %c0_166 = arith.constant 0 : index
    %c0_167 = arith.constant 0 : index
    %334 = vector.load %arg5[%c2_165, %c0_166, %c0_167] : memref<32x32x32xf32, #tpu.memory_space<vmem>>, vector<1x32x32xf32>
    %335 = vector.shape_cast %334 : vector<1x32x32xf32> to vector<32x32xf32>
    %336 = vector.shape_cast %333 : vector<32x32xf32> to vector<1x32x32xf32>
    tpu.vector_store %arg5[%c2_165, %c0_166, %c0_167], %336 {strides = array<i32>} : memref<32x32x32xf32, #tpu.memory_space<vmem>>, vector<1x32x32xf32>,
    %c3_i32_168 = arith.constant 3 : i32
    %337 = arith.addi %266, %c3_i32_168 : i32
    %c31_i32_169 = arith.constant 31 : i32
    %338 = arith.minsi %337, %c31_i32_169 : i32
    %339 = arith.index_cast %338 : i32 to index
    %c0_170 = arith.constant 0 : index
    %c0_171 = arith.constant 0 : index
    %340 = vector.load %arg3[%339, %c0_170, %c0_171] : memref<32x32x32xf32, #tpu.memory_space<vmem>>, vector<1x32x32xf32>
    %341 = vector.shape_cast %340 : vector<1x32x32xf32> to vector<32x32xf32>
    %cst_172 = arith.constant dense<0.000000e+00> : vector<32x32xf32>
    %342 = tpu.matmul %281, %341, %cst_172 {dimension_numbers = #tpu.dot_dimension_numbers<[1], [0], [0], [1], [0, 0, 1, 1], [], []>} : vector<32x32xf32>, vector<32x32xf32>, vector<32x32xf32> -> vector<32x32xf32>
    %cst_173 = arith.constant dense<0.000000e+00> : vector<32x32xf32>
    %343 = tpu.matmul %342, %291, %cst_173 {dimension_numbers = #tpu.dot_dimension_numbers<[1], [0], [0], [1], [0, 0, 1, 1], [], []>} : vector<32x32xf32>, vector<32x32xf32>, vector<32x32xf32> -> vector<32x32xf32>
    %c3_i32_174 = arith.constant 3 : i32
    %344 = arith.cmpi sgt, %269, %c3_i32_174 : i32
    %345 = arith.extui %344 : i1 to i32
    %346 = arith.sitofp %345 : i32 to f32
    %347 = vector.broadcast %346 : f32 to vector<32x32xf32>
    %348 = arith.mulf %343, %347 : vector<32x32xf32>
    %c3_175 = arith.constant 3 : index
    %c0_176 = arith.constant 0 : index
    %c0_177 = arith.constant 0 : index
    %349 = vector.load %arg5[%c3_175, %c0_176, %c0_177] : memref<32x32x32xf32, #tpu.memory_space<vmem>>, vector<1x32x32xf32>
    %350 = vector.shape_cast %349 : vector<1x32x32xf32> to vector<32x32xf32>
    %351 = vector.shape_cast %348 : vector<32x32xf32> to vector<1x32x32xf32>
    tpu.vector_store %arg5[%c3_175, %c0_176, %c0_177], %351 {strides = array<i32>} : memref<32x32x32xf32, #tpu.memory_space<vmem>>, vector<1x32x32xf32>,
    %c4_i32_178 = arith.constant 4 : i32
    %352 = arith.addi %266, %c4_i32_178 : i32
    %c31_i32_179 = arith.constant 31 : i32
    %353 = arith.minsi %352, %c31_i32_179 : i32
    %354 = arith.index_cast %353 : i32 to index
    %c0_180 = arith.constant 0 : index
    %c0_181 = arith.constant 0 : index
    %355 = vector.load %arg3[%354, %c0_180, %c0_181] : memref<32x32x32xf32, #tpu.memory_space<vmem>>, vector<1x32x32xf32>
    %356 = vector.shape_cast %355 : vector<1x32x32xf32> to vector<32x32xf32>
    %cst_182 = arith.constant dense<0.000000e+00> : vector<32x32xf32>
    %357 = tpu.matmul %281, %356, %cst_182 {dimension_numbers = #tpu.dot_dimension_numbers<[1], [0], [0], [1], [0, 0, 1, 1], [], []>} : vector<32x32xf32>, vector<32x32xf32>, vector<32x32xf32> -> vector<32x32xf32>
    %cst_183 = arith.constant dense<0.000000e+00> : vector<32x32xf32>
    %358 = tpu.matmul %357, %291, %cst_183 {dimension_numbers = #tpu.dot_dimension_numbers<[1], [0], [0], [1], [0, 0, 1, 1], [], []>} : vector<32x32xf32>, vector<32x32xf32>, vector<32x32xf32> -> vector<32x32xf32>
    %c4_i32_184 = arith.constant 4 : i32
    %359 = arith.cmpi sgt, %269, %c4_i32_184 : i32
    %360 = arith.extui %359 : i1 to i32
    %361 = arith.sitofp %360 : i32 to f32
    %362 = vector.broadcast %361 : f32 to vector<32x32xf32>
    %363 = arith.mulf %358, %362 : vector<32x32xf32>
    %c4_185 = arith.constant 4 : index
    %c0_186 = arith.constant 0 : index
    %c0_187 = arith.constant 0 : index
    %364 = vector.load %arg5[%c4_185, %c0_186, %c0_187] : memref<32x32x32xf32, #tpu.memory_space<vmem>>, vector<1x32x32xf32>
    %365 = vector.shape_cast %364 : vector<1x32x32xf32> to vector<32x32xf32>
    %366 = vector.shape_cast %363 : vector<32x32xf32> to vector<1x32x32xf32>
    tpu.vector_store %arg5[%c4_185, %c0_186, %c0_187], %366 {strides = array<i32>} : memref<32x32x32xf32, #tpu.memory_space<vmem>>, vector<1x32x32xf32>,
    %c5_i32_188 = arith.constant 5 : i32
    %367 = arith.addi %266, %c5_i32_188 : i32
    %c31_i32_189 = arith.constant 31 : i32
    %368 = arith.minsi %367, %c31_i32_189 : i32
    %369 = arith.index_cast %368 : i32 to index
    %c0_190 = arith.constant 0 : index
    %c0_191 = arith.constant 0 : index
    %370 = vector.load %arg3[%369, %c0_190, %c0_191] : memref<32x32x32xf32, #tpu.memory_space<vmem>>, vector<1x32x32xf32>
    %371 = vector.shape_cast %370 : vector<1x32x32xf32> to vector<32x32xf32>
    %cst_192 = arith.constant dense<0.000000e+00> : vector<32x32xf32>
    %372 = tpu.matmul %281, %371, %cst_192 {dimension_numbers = #tpu.dot_dimension_numbers<[1], [0], [0], [1], [0, 0, 1, 1], [], []>} : vector<32x32xf32>, vector<32x32xf32>, vector<32x32xf32> -> vector<32x32xf32>
    %cst_193 = arith.constant dense<0.000000e+00> : vector<32x32xf32>
    %373 = tpu.matmul %372, %291, %cst_193 {dimension_numbers = #tpu.dot_dimension_numbers<[1], [0], [0], [1], [0, 0, 1, 1], [], []>} : vector<32x32xf32>, vector<32x32xf32>, vector<32x32xf32> -> vector<32x32xf32>
    %c5_i32_194 = arith.constant 5 : i32
    %374 = arith.cmpi sgt, %269, %c5_i32_194 : i32
    %375 = arith.extui %374 : i1 to i32
    %376 = arith.sitofp %375 : i32 to f32
    %377 = vector.broadcast %376 : f32 to vector<32x32xf32>
    %378 = arith.mulf %373, %377 : vector<32x32xf32>
    %c5_195 = arith.constant 5 : index
    %c0_196 = arith.constant 0 : index
    %c0_197 = arith.constant 0 : index
    %379 = vector.load %arg5[%c5_195, %c0_196, %c0_197] : memref<32x32x32xf32, #tpu.memory_space<vmem>>, vector<1x32x32xf32>
    %380 = vector.shape_cast %379 : vector<1x32x32xf32> to vector<32x32xf32>
    %381 = vector.shape_cast %378 : vector<32x32xf32> to vector<1x32x32xf32>
    tpu.vector_store %arg5[%c5_195, %c0_196, %c0_197], %381 {strides = array<i32>} : memref<32x32x32xf32, #tpu.memory_space<vmem>>, vector<1x32x32xf32>,
    %c6_i32_198 = arith.constant 6 : i32
    %382 = arith.addi %266, %c6_i32_198 : i32
    %c31_i32_199 = arith.constant 31 : i32
    %383 = arith.minsi %382, %c31_i32_199 : i32
    %384 = arith.index_cast %383 : i32 to index
    %c0_200 = arith.constant 0 : index
    %c0_201 = arith.constant 0 : index
    %385 = vector.load %arg3[%384, %c0_200, %c0_201] : memref<32x32x32xf32, #tpu.memory_space<vmem>>, vector<1x32x32xf32>
    %386 = vector.shape_cast %385 : vector<1x32x32xf32> to vector<32x32xf32>
    %cst_202 = arith.constant dense<0.000000e+00> : vector<32x32xf32>
    %387 = tpu.matmul %281, %386, %cst_202 {dimension_numbers = #tpu.dot_dimension_numbers<[1], [0], [0], [1], [0, 0, 1, 1], [], []>} : vector<32x32xf32>, vector<32x32xf32>, vector<32x32xf32> -> vector<32x32xf32>
    %cst_203 = arith.constant dense<0.000000e+00> : vector<32x32xf32>
    %388 = tpu.matmul %387, %291, %cst_203 {dimension_numbers = #tpu.dot_dimension_numbers<[1], [0], [0], [1], [0, 0, 1, 1], [], []>} : vector<32x32xf32>, vector<32x32xf32>, vector<32x32xf32> -> vector<32x32xf32>
    %c6_i32_204 = arith.constant 6 : i32
    %389 = arith.cmpi sgt, %269, %c6_i32_204 : i32
    %390 = arith.extui %389 : i1 to i32
    %391 = arith.sitofp %390 : i32 to f32
    %392 = vector.broadcast %391 : f32 to vector<32x32xf32>
    %393 = arith.mulf %388, %392 : vector<32x32xf32>
    %c6_205 = arith.constant 6 : index
    %c0_206 = arith.constant 0 : index
    %c0_207 = arith.constant 0 : index
    %394 = vector.load %arg5[%c6_205, %c0_206, %c0_207] : memref<32x32x32xf32, #tpu.memory_space<vmem>>, vector<1x32x32xf32>
    %395 = vector.shape_cast %394 : vector<1x32x32xf32> to vector<32x32xf32>
    %396 = vector.shape_cast %393 : vector<32x32xf32> to vector<1x32x32xf32>
    tpu.vector_store %arg5[%c6_205, %c0_206, %c0_207], %396 {strides = array<i32>} : memref<32x32x32xf32, #tpu.memory_space<vmem>>, vector<1x32x32xf32>,
    %c7_i32_208 = arith.constant 7 : i32
    %397 = arith.addi %266, %c7_i32_208 : i32
    %c31_i32_209 = arith.constant 31 : i32
    %398 = arith.minsi %397, %c31_i32_209 : i32
    %399 = arith.index_cast %398 : i32 to index
    %c0_210 = arith.constant 0 : index
    %c0_211 = arith.constant 0 : index
    %400 = vector.load %arg3[%399, %c0_210, %c0_211] : memref<32x32x32xf32, #tpu.memory_space<vmem>>, vector<1x32x32xf32>
    %401 = vector.shape_cast %400 : vector<1x32x32xf32> to vector<32x32xf32>
    %cst_212 = arith.constant dense<0.000000e+00> : vector<32x32xf32>
    %402 = tpu.matmul %281, %401, %cst_212 {dimension_numbers = #tpu.dot_dimension_numbers<[1], [0], [0], [1], [0, 0, 1, 1], [], []>} : vector<32x32xf32>, vector<32x32xf32>, vector<32x32xf32> -> vector<32x32xf32>
    %cst_213 = arith.constant dense<0.000000e+00> : vector<32x32xf32>
    %403 = tpu.matmul %402, %291, %cst_213 {dimension_numbers = #tpu.dot_dimension_numbers<[1], [0], [0], [1], [0, 0, 1, 1], [], []>} : vector<32x32xf32>, vector<32x32xf32>, vector<32x32xf32> -> vector<32x32xf32>
    %c7_i32_214 = arith.constant 7 : i32
    %404 = arith.cmpi sgt, %269, %c7_i32_214 : i32
    %405 = arith.extui %404 : i1 to i32
    %406 = arith.sitofp %405 : i32 to f32
    %407 = vector.broadcast %406 : f32 to vector<32x32xf32>
    %408 = arith.mulf %403, %407 : vector<32x32xf32>
    %c7_215 = arith.constant 7 : index
    %c0_216 = arith.constant 0 : index
    %c0_217 = arith.constant 0 : index
    %409 = vector.load %arg5[%c7_215, %c0_216, %c0_217] : memref<32x32x32xf32, #tpu.memory_space<vmem>>, vector<1x32x32xf32>
    %410 = vector.shape_cast %409 : vector<1x32x32xf32> to vector<32x32xf32>
    %411 = vector.shape_cast %408 : vector<32x32xf32> to vector<1x32x32xf32>
    tpu.vector_store %arg5[%c7_215, %c0_216, %c0_217], %411 {strides = array<i32>} : memref<32x32x32xf32, #tpu.memory_space<vmem>>, vector<1x32x32xf32>,
    %c8_i32_218 = arith.constant 8 : i32
    %412 = arith.addi %266, %c8_i32_218 : i32
    %c31_i32_219 = arith.constant 31 : i32
    %413 = arith.minsi %412, %c31_i32_219 : i32
    %414 = arith.index_cast %413 : i32 to index
    %c0_220 = arith.constant 0 : index
    %c0_221 = arith.constant 0 : index
    %415 = vector.load %arg3[%414, %c0_220, %c0_221] : memref<32x32x32xf32, #tpu.memory_space<vmem>>, vector<1x32x32xf32>
    %416 = vector.shape_cast %415 : vector<1x32x32xf32> to vector<32x32xf32>
    %cst_222 = arith.constant dense<0.000000e+00> : vector<32x32xf32>
    %417 = tpu.matmul %281, %416, %cst_222 {dimension_numbers = #tpu.dot_dimension_numbers<[1], [0], [0], [1], [0, 0, 1, 1], [], []>} : vector<32x32xf32>, vector<32x32xf32>, vector<32x32xf32> -> vector<32x32xf32>
    %cst_223 = arith.constant dense<0.000000e+00> : vector<32x32xf32>
    %418 = tpu.matmul %417, %291, %cst_223 {dimension_numbers = #tpu.dot_dimension_numbers<[1], [0], [0], [1], [0, 0, 1, 1], [], []>} : vector<32x32xf32>, vector<32x32xf32>, vector<32x32xf32> -> vector<32x32xf32>
    %c8_i32_224 = arith.constant 8 : i32
    %419 = arith.cmpi sgt, %269, %c8_i32_224 : i32
    %420 = arith.extui %419 : i1 to i32
    %421 = arith.sitofp %420 : i32 to f32
    %422 = vector.broadcast %421 : f32 to vector<32x32xf32>
    %423 = arith.mulf %418, %422 : vector<32x32xf32>
    %c8_225 = arith.constant 8 : index
    %c0_226 = arith.constant 0 : index
    %c0_227 = arith.constant 0 : index
    %424 = vector.load %arg5[%c8_225, %c0_226, %c0_227] : memref<32x32x32xf32, #tpu.memory_space<vmem>>, vector<1x32x32xf32>
    %425 = vector.shape_cast %424 : vector<1x32x32xf32> to vector<32x32xf32>
    %426 = vector.shape_cast %423 : vector<32x32xf32> to vector<1x32x32xf32>
    tpu.vector_store %arg5[%c8_225, %c0_226, %c0_227], %426 {strides = array<i32>} : memref<32x32x32xf32, #tpu.memory_space<vmem>>, vector<1x32x32xf32>,
    %c9_i32_228 = arith.constant 9 : i32
    %427 = arith.addi %266, %c9_i32_228 : i32
    %c31_i32_229 = arith.constant 31 : i32
    %428 = arith.minsi %427, %c31_i32_229 : i32
    %429 = arith.index_cast %428 : i32 to index
    %c0_230 = arith.constant 0 : index
    %c0_231 = arith.constant 0 : index
    %430 = vector.load %arg3[%429, %c0_230, %c0_231] : memref<32x32x32xf32, #tpu.memory_space<vmem>>, vector<1x32x32xf32>
    %431 = vector.shape_cast %430 : vector<1x32x32xf32> to vector<32x32xf32>
    %cst_232 = arith.constant dense<0.000000e+00> : vector<32x32xf32>
    %432 = tpu.matmul %281, %431, %cst_232 {dimension_numbers = #tpu.dot_dimension_numbers<[1], [0], [0], [1], [0, 0, 1, 1], [], []>} : vector<32x32xf32>, vector<32x32xf32>, vector<32x32xf32> -> vector<32x32xf32>
    %cst_233 = arith.constant dense<0.000000e+00> : vector<32x32xf32>
    %433 = tpu.matmul %432, %291, %cst_233 {dimension_numbers = #tpu.dot_dimension_numbers<[1], [0], [0], [1], [0, 0, 1, 1], [], []>} : vector<32x32xf32>, vector<32x32xf32>, vector<32x32xf32> -> vector<32x32xf32>
    %c9_i32_234 = arith.constant 9 : i32
    %434 = arith.cmpi sgt, %269, %c9_i32_234 : i32
    %435 = arith.extui %434 : i1 to i32
    %436 = arith.sitofp %435 : i32 to f32
    %437 = vector.broadcast %436 : f32 to vector<32x32xf32>
    %438 = arith.mulf %433, %437 : vector<32x32xf32>
    %c9_235 = arith.constant 9 : index
    %c0_236 = arith.constant 0 : index
    %c0_237 = arith.constant 0 : index
    %439 = vector.load %arg5[%c9_235, %c0_236, %c0_237] : memref<32x32x32xf32, #tpu.memory_space<vmem>>, vector<1x32x32xf32>
    %440 = vector.shape_cast %439 : vector<1x32x32xf32> to vector<32x32xf32>
    %441 = vector.shape_cast %438 : vector<32x32xf32> to vector<1x32x32xf32>
    tpu.vector_store %arg5[%c9_235, %c0_236, %c0_237], %441 {strides = array<i32>} : memref<32x32x32xf32, #tpu.memory_space<vmem>>, vector<1x32x32xf32>,
    %c10_i32_238 = arith.constant 10 : i32
    %442 = arith.addi %266, %c10_i32_238 : i32
    %c31_i32_239 = arith.constant 31 : i32
    %443 = arith.minsi %442, %c31_i32_239 : i32
    %444 = arith.index_cast %443 : i32 to index
    %c0_240 = arith.constant 0 : index
    %c0_241 = arith.constant 0 : index
    %445 = vector.load %arg3[%444, %c0_240, %c0_241] : memref<32x32x32xf32, #tpu.memory_space<vmem>>, vector<1x32x32xf32>
    %446 = vector.shape_cast %445 : vector<1x32x32xf32> to vector<32x32xf32>
    %cst_242 = arith.constant dense<0.000000e+00> : vector<32x32xf32>
    %447 = tpu.matmul %281, %446, %cst_242 {dimension_numbers = #tpu.dot_dimension_numbers<[1], [0], [0], [1], [0, 0, 1, 1], [], []>} : vector<32x32xf32>, vector<32x32xf32>, vector<32x32xf32> -> vector<32x32xf32>
    %cst_243 = arith.constant dense<0.000000e+00> : vector<32x32xf32>
    %448 = tpu.matmul %447, %291, %cst_243 {dimension_numbers = #tpu.dot_dimension_numbers<[1], [0], [0], [1], [0, 0, 1, 1], [], []>} : vector<32x32xf32>, vector<32x32xf32>, vector<32x32xf32> -> vector<32x32xf32>
    %c10_i32_244 = arith.constant 10 : i32
    %449 = arith.cmpi sgt, %269, %c10_i32_244 : i32
    %450 = arith.extui %449 : i1 to i32
    %451 = arith.sitofp %450 : i32 to f32
    %452 = vector.broadcast %451 : f32 to vector<32x32xf32>
    %453 = arith.mulf %448, %452 : vector<32x32xf32>
    %c10_245 = arith.constant 10 : index
    %c0_246 = arith.constant 0 : index
    %c0_247 = arith.constant 0 : index
    %454 = vector.load %arg5[%c10_245, %c0_246, %c0_247] : memref<32x32x32xf32, #tpu.memory_space<vmem>>, vector<1x32x32xf32>
    %455 = vector.shape_cast %454 : vector<1x32x32xf32> to vector<32x32xf32>
    %456 = vector.shape_cast %453 : vector<32x32xf32> to vector<1x32x32xf32>
    tpu.vector_store %arg5[%c10_245, %c0_246, %c0_247], %456 {strides = array<i32>} : memref<32x32x32xf32, #tpu.memory_space<vmem>>, vector<1x32x32xf32>,
    %c11_i32_248 = arith.constant 11 : i32
    %457 = arith.addi %266, %c11_i32_248 : i32
    %c31_i32_249 = arith.constant 31 : i32
    %458 = arith.minsi %457, %c31_i32_249 : i32
    %459 = arith.index_cast %458 : i32 to index
    %c0_250 = arith.constant 0 : index
    %c0_251 = arith.constant 0 : index
    %460 = vector.load %arg3[%459, %c0_250, %c0_251] : memref<32x32x32xf32, #tpu.memory_space<vmem>>, vector<1x32x32xf32>
    %461 = vector.shape_cast %460 : vector<1x32x32xf32> to vector<32x32xf32>
    %cst_252 = arith.constant dense<0.000000e+00> : vector<32x32xf32>
    %462 = tpu.matmul %281, %461, %cst_252 {dimension_numbers = #tpu.dot_dimension_numbers<[1], [0], [0], [1], [0, 0, 1, 1], [], []>} : vector<32x32xf32>, vector<32x32xf32>, vector<32x32xf32> -> vector<32x32xf32>
    %cst_253 = arith.constant dense<0.000000e+00> : vector<32x32xf32>
    %463 = tpu.matmul %462, %291, %cst_253 {dimension_numbers = #tpu.dot_dimension_numbers<[1], [0], [0], [1], [0, 0, 1, 1], [], []>} : vector<32x32xf32>, vector<32x32xf32>, vector<32x32xf32> -> vector<32x32xf32>
    %c11_i32_254 = arith.constant 11 : i32
    %464 = arith.cmpi sgt, %269, %c11_i32_254 : i32
    %465 = arith.extui %464 : i1 to i32
    %466 = arith.sitofp %465 : i32 to f32
    %467 = vector.broadcast %466 : f32 to vector<32x32xf32>
    %468 = arith.mulf %463, %467 : vector<32x32xf32>
    %c11_255 = arith.constant 11 : index
    %c0_256 = arith.constant 0 : index
    %c0_257 = arith.constant 0 : index
    %469 = vector.load %arg5[%c11_255, %c0_256, %c0_257] : memref<32x32x32xf32, #tpu.memory_space<vmem>>, vector<1x32x32xf32>
    %470 = vector.shape_cast %469 : vector<1x32x32xf32> to vector<32x32xf32>
    %471 = vector.shape_cast %468 : vector<32x32xf32> to vector<1x32x32xf32>
    tpu.vector_store %arg5[%c11_255, %c0_256, %c0_257], %471 {strides = array<i32>} : memref<32x32x32xf32, #tpu.memory_space<vmem>>, vector<1x32x32xf32>,
    %c12_i32_258 = arith.constant 12 : i32
    %472 = arith.addi %266, %c12_i32_258 : i32
    %c31_i32_259 = arith.constant 31 : i32
    %473 = arith.minsi %472, %c31_i32_259 : i32
    %474 = arith.index_cast %473 : i32 to index
    %c0_260 = arith.constant 0 : index
    %c0_261 = arith.constant 0 : index
    %475 = vector.load %arg3[%474, %c0_260, %c0_261] : memref<32x32x32xf32, #tpu.memory_space<vmem>>, vector<1x32x32xf32>
    %476 = vector.shape_cast %475 : vector<1x32x32xf32> to vector<32x32xf32>
    %cst_262 = arith.constant dense<0.000000e+00> : vector<32x32xf32>
    %477 = tpu.matmul %281, %476, %cst_262 {dimension_numbers = #tpu.dot_dimension_numbers<[1], [0], [0], [1], [0, 0, 1, 1], [], []>} : vector<32x32xf32>, vector<32x32xf32>, vector<32x32xf32> -> vector<32x32xf32>
    %cst_263 = arith.constant dense<0.000000e+00> : vector<32x32xf32>
    %478 = tpu.matmul %477, %291, %cst_263 {dimension_numbers = #tpu.dot_dimension_numbers<[1], [0], [0], [1], [0, 0, 1, 1], [], []>} : vector<32x32xf32>, vector<32x32xf32>, vector<32x32xf32> -> vector<32x32xf32>
    %c12_i32_264 = arith.constant 12 : i32
    %479 = arith.cmpi sgt, %269, %c12_i32_264 : i32
    %480 = arith.extui %479 : i1 to i32
    %481 = arith.sitofp %480 : i32 to f32
    %482 = vector.broadcast %481 : f32 to vector<32x32xf32>
    %483 = arith.mulf %478, %482 : vector<32x32xf32>
    %c12_265 = arith.constant 12 : index
    %c0_266 = arith.constant 0 : index
    %c0_267 = arith.constant 0 : index
    %484 = vector.load %arg5[%c12_265, %c0_266, %c0_267] : memref<32x32x32xf32, #tpu.memory_space<vmem>>, vector<1x32x32xf32>
    %485 = vector.shape_cast %484 : vector<1x32x32xf32> to vector<32x32xf32>
    %486 = vector.shape_cast %483 : vector<32x32xf32> to vector<1x32x32xf32>
    tpu.vector_store %arg5[%c12_265, %c0_266, %c0_267], %486 {strides = array<i32>} : memref<32x32x32xf32, #tpu.memory_space<vmem>>, vector<1x32x32xf32>,
    %c13_i32_268 = arith.constant 13 : i32
    %487 = arith.addi %266, %c13_i32_268 : i32
    %c31_i32_269 = arith.constant 31 : i32
    %488 = arith.minsi %487, %c31_i32_269 : i32
    %489 = arith.index_cast %488 : i32 to index
    %c0_270 = arith.constant 0 : index
    %c0_271 = arith.constant 0 : index
    %490 = vector.load %arg3[%489, %c0_270, %c0_271] : memref<32x32x32xf32, #tpu.memory_space<vmem>>, vector<1x32x32xf32>
    %491 = vector.shape_cast %490 : vector<1x32x32xf32> to vector<32x32xf32>
    %cst_272 = arith.constant dense<0.000000e+00> : vector<32x32xf32>
    %492 = tpu.matmul %281, %491, %cst_272 {dimension_numbers = #tpu.dot_dimension_numbers<[1], [0], [0], [1], [0, 0, 1, 1], [], []>} : vector<32x32xf32>, vector<32x32xf32>, vector<32x32xf32> -> vector<32x32xf32>
    %cst_273 = arith.constant dense<0.000000e+00> : vector<32x32xf32>
    %493 = tpu.matmul %492, %291, %cst_273 {dimension_numbers = #tpu.dot_dimension_numbers<[1], [0], [0], [1], [0, 0, 1, 1], [], []>} : vector<32x32xf32>, vector<32x32xf32>, vector<32x32xf32> -> vector<32x32xf32>
    %c13_i32_274 = arith.constant 13 : i32
    %494 = arith.cmpi sgt, %269, %c13_i32_274 : i32
    %495 = arith.extui %494 : i1 to i32
    %496 = arith.sitofp %495 : i32 to f32
    %497 = vector.broadcast %496 : f32 to vector<32x32xf32>
    %498 = arith.mulf %493, %497 : vector<32x32xf32>
    %c13_275 = arith.constant 13 : index
    %c0_276 = arith.constant 0 : index
    %c0_277 = arith.constant 0 : index
    %499 = vector.load %arg5[%c13_275, %c0_276, %c0_277] : memref<32x32x32xf32, #tpu.memory_space<vmem>>, vector<1x32x32xf32>
    %500 = vector.shape_cast %499 : vector<1x32x32xf32> to vector<32x32xf32>
    %501 = vector.shape_cast %498 : vector<32x32xf32> to vector<1x32x32xf32>
    tpu.vector_store %arg5[%c13_275, %c0_276, %c0_277], %501 {strides = array<i32>} : memref<32x32x32xf32, #tpu.memory_space<vmem>>, vector<1x32x32xf32>,
    %c14_i32_278 = arith.constant 14 : i32
    %502 = arith.addi %266, %c14_i32_278 : i32
    %c31_i32_279 = arith.constant 31 : i32
    %503 = arith.minsi %502, %c31_i32_279 : i32
    %504 = arith.index_cast %503 : i32 to index
    %c0_280 = arith.constant 0 : index
    %c0_281 = arith.constant 0 : index
    %505 = vector.load %arg3[%504, %c0_280, %c0_281] : memref<32x32x32xf32, #tpu.memory_space<vmem>>, vector<1x32x32xf32>
    %506 = vector.shape_cast %505 : vector<1x32x32xf32> to vector<32x32xf32>
    %cst_282 = arith.constant dense<0.000000e+00> : vector<32x32xf32>
    %507 = tpu.matmul %281, %506, %cst_282 {dimension_numbers = #tpu.dot_dimension_numbers<[1], [0], [0], [1], [0, 0, 1, 1], [], []>} : vector<32x32xf32>, vector<32x32xf32>, vector<32x32xf32> -> vector<32x32xf32>
    %cst_283 = arith.constant dense<0.000000e+00> : vector<32x32xf32>
    %508 = tpu.matmul %507, %291, %cst_283 {dimension_numbers = #tpu.dot_dimension_numbers<[1], [0], [0], [1], [0, 0, 1, 1], [], []>} : vector<32x32xf32>, vector<32x32xf32>, vector<32x32xf32> -> vector<32x32xf32>
    %c14_i32_284 = arith.constant 14 : i32
    %509 = arith.cmpi sgt, %269, %c14_i32_284 : i32
    %510 = arith.extui %509 : i1 to i32
    %511 = arith.sitofp %510 : i32 to f32
    %512 = vector.broadcast %511 : f32 to vector<32x32xf32>
    %513 = arith.mulf %508, %512 : vector<32x32xf32>
    %c14_285 = arith.constant 14 : index
    %c0_286 = arith.constant 0 : index
    %c0_287 = arith.constant 0 : index
    %514 = vector.load %arg5[%c14_285, %c0_286, %c0_287] : memref<32x32x32xf32, #tpu.memory_space<vmem>>, vector<1x32x32xf32>
    %515 = vector.shape_cast %514 : vector<1x32x32xf32> to vector<32x32xf32>
    %516 = vector.shape_cast %513 : vector<32x32xf32> to vector<1x32x32xf32>
    tpu.vector_store %arg5[%c14_285, %c0_286, %c0_287], %516 {strides = array<i32>} : memref<32x32x32xf32, #tpu.memory_space<vmem>>, vector<1x32x32xf32>,
    %c15_i32_288 = arith.constant 15 : i32
    %517 = arith.addi %266, %c15_i32_288 : i32
    %c31_i32_289 = arith.constant 31 : i32
    %518 = arith.minsi %517, %c31_i32_289 : i32
    %519 = arith.index_cast %518 : i32 to index
    %c0_290 = arith.constant 0 : index
    %c0_291 = arith.constant 0 : index
    %520 = vector.load %arg3[%519, %c0_290, %c0_291] : memref<32x32x32xf32, #tpu.memory_space<vmem>>, vector<1x32x32xf32>
    %521 = vector.shape_cast %520 : vector<1x32x32xf32> to vector<32x32xf32>
    %cst_292 = arith.constant dense<0.000000e+00> : vector<32x32xf32>
    %522 = tpu.matmul %281, %521, %cst_292 {dimension_numbers = #tpu.dot_dimension_numbers<[1], [0], [0], [1], [0, 0, 1, 1], [], []>} : vector<32x32xf32>, vector<32x32xf32>, vector<32x32xf32> -> vector<32x32xf32>
    %cst_293 = arith.constant dense<0.000000e+00> : vector<32x32xf32>
    %523 = tpu.matmul %522, %291, %cst_293 {dimension_numbers = #tpu.dot_dimension_numbers<[1], [0], [0], [1], [0, 0, 1, 1], [], []>} : vector<32x32xf32>, vector<32x32xf32>, vector<32x32xf32> -> vector<32x32xf32>
    %c15_i32_294 = arith.constant 15 : i32
    %524 = arith.cmpi sgt, %269, %c15_i32_294 : i32
    %525 = arith.extui %524 : i1 to i32
    %526 = arith.sitofp %525 : i32 to f32
    %527 = vector.broadcast %526 : f32 to vector<32x32xf32>
    %528 = arith.mulf %523, %527 : vector<32x32xf32>
    %c15_295 = arith.constant 15 : index
    %c0_296 = arith.constant 0 : index
    %c0_297 = arith.constant 0 : index
    %529 = vector.load %arg5[%c15_295, %c0_296, %c0_297] : memref<32x32x32xf32, #tpu.memory_space<vmem>>, vector<1x32x32xf32>
    %530 = vector.shape_cast %529 : vector<1x32x32xf32> to vector<32x32xf32>
    %531 = vector.shape_cast %528 : vector<32x32xf32> to vector<1x32x32xf32>
    tpu.vector_store %arg5[%c15_295, %c0_296, %c0_297], %531 {strides = array<i32>} : memref<32x32x32xf32, #tpu.memory_space<vmem>>, vector<1x32x32xf32>,
    %c16_i32 = arith.constant 16 : i32
    %532 = arith.addi %266, %c16_i32 : i32
    %c31_i32_298 = arith.constant 31 : i32
    %533 = arith.minsi %532, %c31_i32_298 : i32
    %534 = arith.index_cast %533 : i32 to index
    %c0_299 = arith.constant 0 : index
    %c0_300 = arith.constant 0 : index
    %535 = vector.load %arg3[%534, %c0_299, %c0_300] : memref<32x32x32xf32, #tpu.memory_space<vmem>>, vector<1x32x32xf32>
    %536 = vector.shape_cast %535 : vector<1x32x32xf32> to vector<32x32xf32>
    %cst_301 = arith.constant dense<0.000000e+00> : vector<32x32xf32>
    %537 = tpu.matmul %281, %536, %cst_301 {dimension_numbers = #tpu.dot_dimension_numbers<[1], [0], [0], [1], [0, 0, 1, 1], [], []>} : vector<32x32xf32>, vector<32x32xf32>, vector<32x32xf32> -> vector<32x32xf32>
    %cst_302 = arith.constant dense<0.000000e+00> : vector<32x32xf32>
    %538 = tpu.matmul %537, %291, %cst_302 {dimension_numbers = #tpu.dot_dimension_numbers<[1], [0], [0], [1], [0, 0, 1, 1], [], []>} : vector<32x32xf32>, vector<32x32xf32>, vector<32x32xf32> -> vector<32x32xf32>
    %c16_i32_303 = arith.constant 16 : i32
    %539 = arith.cmpi sgt, %269, %c16_i32_303 : i32
    %540 = arith.extui %539 : i1 to i32
    %541 = arith.sitofp %540 : i32 to f32
    %542 = vector.broadcast %541 : f32 to vector<32x32xf32>
    %543 = arith.mulf %538, %542 : vector<32x32xf32>
    %c16 = arith.constant 16 : index
    %c0_304 = arith.constant 0 : index
    %c0_305 = arith.constant 0 : index
    %544 = vector.load %arg5[%c16, %c0_304, %c0_305] : memref<32x32x32xf32, #tpu.memory_space<vmem>>, vector<1x32x32xf32>
    %545 = vector.shape_cast %544 : vector<1x32x32xf32> to vector<32x32xf32>
    %546 = vector.shape_cast %543 : vector<32x32xf32> to vector<1x32x32xf32>
    tpu.vector_store %arg5[%c16, %c0_304, %c0_305], %546 {strides = array<i32>} : memref<32x32x32xf32, #tpu.memory_space<vmem>>, vector<1x32x32xf32>,
    %c17_i32 = arith.constant 17 : i32
    %547 = arith.addi %266, %c17_i32 : i32
    %c31_i32_306 = arith.constant 31 : i32
    %548 = arith.minsi %547, %c31_i32_306 : i32
    %549 = arith.index_cast %548 : i32 to index
    %c0_307 = arith.constant 0 : index
    %c0_308 = arith.constant 0 : index
    %550 = vector.load %arg3[%549, %c0_307, %c0_308] : memref<32x32x32xf32, #tpu.memory_space<vmem>>, vector<1x32x32xf32>
    %551 = vector.shape_cast %550 : vector<1x32x32xf32> to vector<32x32xf32>
    %cst_309 = arith.constant dense<0.000000e+00> : vector<32x32xf32>
    %552 = tpu.matmul %281, %551, %cst_309 {dimension_numbers = #tpu.dot_dimension_numbers<[1], [0], [0], [1], [0, 0, 1, 1], [], []>} : vector<32x32xf32>, vector<32x32xf32>, vector<32x32xf32> -> vector<32x32xf32>
    %cst_310 = arith.constant dense<0.000000e+00> : vector<32x32xf32>
    %553 = tpu.matmul %552, %291, %cst_310 {dimension_numbers = #tpu.dot_dimension_numbers<[1], [0], [0], [1], [0, 0, 1, 1], [], []>} : vector<32x32xf32>, vector<32x32xf32>, vector<32x32xf32> -> vector<32x32xf32>
    %c17_i32_311 = arith.constant 17 : i32
    %554 = arith.cmpi sgt, %269, %c17_i32_311 : i32
    %555 = arith.extui %554 : i1 to i32
    %556 = arith.sitofp %555 : i32 to f32
    %557 = vector.broadcast %556 : f32 to vector<32x32xf32>
    %558 = arith.mulf %553, %557 : vector<32x32xf32>
    %c17 = arith.constant 17 : index
    %c0_312 = arith.constant 0 : index
    %c0_313 = arith.constant 0 : index
    %559 = vector.load %arg5[%c17, %c0_312, %c0_313] : memref<32x32x32xf32, #tpu.memory_space<vmem>>, vector<1x32x32xf32>
    %560 = vector.shape_cast %559 : vector<1x32x32xf32> to vector<32x32xf32>
    %561 = vector.shape_cast %558 : vector<32x32xf32> to vector<1x32x32xf32>
    tpu.vector_store %arg5[%c17, %c0_312, %c0_313], %561 {strides = array<i32>} : memref<32x32x32xf32, #tpu.memory_space<vmem>>, vector<1x32x32xf32>,
    %c18_i32 = arith.constant 18 : i32
    %562 = arith.addi %266, %c18_i32 : i32
    %c31_i32_314 = arith.constant 31 : i32
    %563 = arith.minsi %562, %c31_i32_314 : i32
    %564 = arith.index_cast %563 : i32 to index
    %c0_315 = arith.constant 0 : index
    %c0_316 = arith.constant 0 : index
    %565 = vector.load %arg3[%564, %c0_315, %c0_316] : memref<32x32x32xf32, #tpu.memory_space<vmem>>, vector<1x32x32xf32>
    %566 = vector.shape_cast %565 : vector<1x32x32xf32> to vector<32x32xf32>
    %cst_317 = arith.constant dense<0.000000e+00> : vector<32x32xf32>
    %567 = tpu.matmul %281, %566, %cst_317 {dimension_numbers = #tpu.dot_dimension_numbers<[1], [0], [0], [1], [0, 0, 1, 1], [], []>} : vector<32x32xf32>, vector<32x32xf32>, vector<32x32xf32> -> vector<32x32xf32>
    %cst_318 = arith.constant dense<0.000000e+00> : vector<32x32xf32>
    %568 = tpu.matmul %567, %291, %cst_318 {dimension_numbers = #tpu.dot_dimension_numbers<[1], [0], [0], [1], [0, 0, 1, 1], [], []>} : vector<32x32xf32>, vector<32x32xf32>, vector<32x32xf32> -> vector<32x32xf32>
    %c18_i32_319 = arith.constant 18 : i32
    %569 = arith.cmpi sgt, %269, %c18_i32_319 : i32
    %570 = arith.extui %569 : i1 to i32
    %571 = arith.sitofp %570 : i32 to f32
    %572 = vector.broadcast %571 : f32 to vector<32x32xf32>
    %573 = arith.mulf %568, %572 : vector<32x32xf32>
    %c18 = arith.constant 18 : index
    %c0_320 = arith.constant 0 : index
    %c0_321 = arith.constant 0 : index
    %574 = vector.load %arg5[%c18, %c0_320, %c0_321] : memref<32x32x32xf32, #tpu.memory_space<vmem>>, vector<1x32x32xf32>
    %575 = vector.shape_cast %574 : vector<1x32x32xf32> to vector<32x32xf32>
    %576 = vector.shape_cast %573 : vector<32x32xf32> to vector<1x32x32xf32>
    tpu.vector_store %arg5[%c18, %c0_320, %c0_321], %576 {strides = array<i32>} : memref<32x32x32xf32, #tpu.memory_space<vmem>>, vector<1x32x32xf32>,
    %c19_i32 = arith.constant 19 : i32
    %577 = arith.addi %266, %c19_i32 : i32
    %c31_i32_322 = arith.constant 31 : i32
    %578 = arith.minsi %577, %c31_i32_322 : i32
    %579 = arith.index_cast %578 : i32 to index
    %c0_323 = arith.constant 0 : index
    %c0_324 = arith.constant 0 : index
    %580 = vector.load %arg3[%579, %c0_323, %c0_324] : memref<32x32x32xf32, #tpu.memory_space<vmem>>, vector<1x32x32xf32>
    %581 = vector.shape_cast %580 : vector<1x32x32xf32> to vector<32x32xf32>
    %cst_325 = arith.constant dense<0.000000e+00> : vector<32x32xf32>
    %582 = tpu.matmul %281, %581, %cst_325 {dimension_numbers = #tpu.dot_dimension_numbers<[1], [0], [0], [1], [0, 0, 1, 1], [], []>} : vector<32x32xf32>, vector<32x32xf32>, vector<32x32xf32> -> vector<32x32xf32>
    %cst_326 = arith.constant dense<0.000000e+00> : vector<32x32xf32>
    %583 = tpu.matmul %582, %291, %cst_326 {dimension_numbers = #tpu.dot_dimension_numbers<[1], [0], [0], [1], [0, 0, 1, 1], [], []>} : vector<32x32xf32>, vector<32x32xf32>, vector<32x32xf32> -> vector<32x32xf32>
    %c19_i32_327 = arith.constant 19 : i32
    %584 = arith.cmpi sgt, %269, %c19_i32_327 : i32
    %585 = arith.extui %584 : i1 to i32
    %586 = arith.sitofp %585 : i32 to f32
    %587 = vector.broadcast %586 : f32 to vector<32x32xf32>
    %588 = arith.mulf %583, %587 : vector<32x32xf32>
    %c19 = arith.constant 19 : index
    %c0_328 = arith.constant 0 : index
    %c0_329 = arith.constant 0 : index
    %589 = vector.load %arg5[%c19, %c0_328, %c0_329] : memref<32x32x32xf32, #tpu.memory_space<vmem>>, vector<1x32x32xf32>
    %590 = vector.shape_cast %589 : vector<1x32x32xf32> to vector<32x32xf32>
    %591 = vector.shape_cast %588 : vector<32x32xf32> to vector<1x32x32xf32>
    tpu.vector_store %arg5[%c19, %c0_328, %c0_329], %591 {strides = array<i32>} : memref<32x32x32xf32, #tpu.memory_space<vmem>>, vector<1x32x32xf32>,
    %c20_i32 = arith.constant 20 : i32
    %592 = arith.addi %266, %c20_i32 : i32
    %c31_i32_330 = arith.constant 31 : i32
    %593 = arith.minsi %592, %c31_i32_330 : i32
    %594 = arith.index_cast %593 : i32 to index
    %c0_331 = arith.constant 0 : index
    %c0_332 = arith.constant 0 : index
    %595 = vector.load %arg3[%594, %c0_331, %c0_332] : memref<32x32x32xf32, #tpu.memory_space<vmem>>, vector<1x32x32xf32>
    %596 = vector.shape_cast %595 : vector<1x32x32xf32> to vector<32x32xf32>
    %cst_333 = arith.constant dense<0.000000e+00> : vector<32x32xf32>
    %597 = tpu.matmul %281, %596, %cst_333 {dimension_numbers = #tpu.dot_dimension_numbers<[1], [0], [0], [1], [0, 0, 1, 1], [], []>} : vector<32x32xf32>, vector<32x32xf32>, vector<32x32xf32> -> vector<32x32xf32>
    %cst_334 = arith.constant dense<0.000000e+00> : vector<32x32xf32>
    %598 = tpu.matmul %597, %291, %cst_334 {dimension_numbers = #tpu.dot_dimension_numbers<[1], [0], [0], [1], [0, 0, 1, 1], [], []>} : vector<32x32xf32>, vector<32x32xf32>, vector<32x32xf32> -> vector<32x32xf32>
    %c20_i32_335 = arith.constant 20 : i32
    %599 = arith.cmpi sgt, %269, %c20_i32_335 : i32
    %600 = arith.extui %599 : i1 to i32
    %601 = arith.sitofp %600 : i32 to f32
    %602 = vector.broadcast %601 : f32 to vector<32x32xf32>
    %603 = arith.mulf %598, %602 : vector<32x32xf32>
    %c20 = arith.constant 20 : index
    %c0_336 = arith.constant 0 : index
    %c0_337 = arith.constant 0 : index
    %604 = vector.load %arg5[%c20, %c0_336, %c0_337] : memref<32x32x32xf32, #tpu.memory_space<vmem>>, vector<1x32x32xf32>
    %605 = vector.shape_cast %604 : vector<1x32x32xf32> to vector<32x32xf32>
    %606 = vector.shape_cast %603 : vector<32x32xf32> to vector<1x32x32xf32>
    tpu.vector_store %arg5[%c20, %c0_336, %c0_337], %606 {strides = array<i32>} : memref<32x32x32xf32, #tpu.memory_space<vmem>>, vector<1x32x32xf32>,
    %c21_i32 = arith.constant 21 : i32
    %607 = arith.addi %266, %c21_i32 : i32
    %c31_i32_338 = arith.constant 31 : i32
    %608 = arith.minsi %607, %c31_i32_338 : i32
    %609 = arith.index_cast %608 : i32 to index
    %c0_339 = arith.constant 0 : index
    %c0_340 = arith.constant 0 : index
    %610 = vector.load %arg3[%609, %c0_339, %c0_340] : memref<32x32x32xf32, #tpu.memory_space<vmem>>, vector<1x32x32xf32>
    %611 = vector.shape_cast %610 : vector<1x32x32xf32> to vector<32x32xf32>
    %cst_341 = arith.constant dense<0.000000e+00> : vector<32x32xf32>
    %612 = tpu.matmul %281, %611, %cst_341 {dimension_numbers = #tpu.dot_dimension_numbers<[1], [0], [0], [1], [0, 0, 1, 1], [], []>} : vector<32x32xf32>, vector<32x32xf32>, vector<32x32xf32> -> vector<32x32xf32>
    %cst_342 = arith.constant dense<0.000000e+00> : vector<32x32xf32>
    %613 = tpu.matmul %612, %291, %cst_342 {dimension_numbers = #tpu.dot_dimension_numbers<[1], [0], [0], [1], [0, 0, 1, 1], [], []>} : vector<32x32xf32>, vector<32x32xf32>, vector<32x32xf32> -> vector<32x32xf32>
    %c21_i32_343 = arith.constant 21 : i32
    %614 = arith.cmpi sgt, %269, %c21_i32_343 : i32
    %615 = arith.extui %614 : i1 to i32
    %616 = arith.sitofp %615 : i32 to f32
    %617 = vector.broadcast %616 : f32 to vector<32x32xf32>
    %618 = arith.mulf %613, %617 : vector<32x32xf32>
    %c21 = arith.constant 21 : index
    %c0_344 = arith.constant 0 : index
    %c0_345 = arith.constant 0 : index
    %619 = vector.load %arg5[%c21, %c0_344, %c0_345] : memref<32x32x32xf32, #tpu.memory_space<vmem>>, vector<1x32x32xf32>
    %620 = vector.shape_cast %619 : vector<1x32x32xf32> to vector<32x32xf32>
    %621 = vector.shape_cast %618 : vector<32x32xf32> to vector<1x32x32xf32>
    tpu.vector_store %arg5[%c21, %c0_344, %c0_345], %621 {strides = array<i32>} : memref<32x32x32xf32, #tpu.memory_space<vmem>>, vector<1x32x32xf32>,
    %c22_i32 = arith.constant 22 : i32
    %622 = arith.addi %266, %c22_i32 : i32
    %c31_i32_346 = arith.constant 31 : i32
    %623 = arith.minsi %622, %c31_i32_346 : i32
    %624 = arith.index_cast %623 : i32 to index
    %c0_347 = arith.constant 0 : index
    %c0_348 = arith.constant 0 : index
    %625 = vector.load %arg3[%624, %c0_347, %c0_348] : memref<32x32x32xf32, #tpu.memory_space<vmem>>, vector<1x32x32xf32>
    %626 = vector.shape_cast %625 : vector<1x32x32xf32> to vector<32x32xf32>
    %cst_349 = arith.constant dense<0.000000e+00> : vector<32x32xf32>
    %627 = tpu.matmul %281, %626, %cst_349 {dimension_numbers = #tpu.dot_dimension_numbers<[1], [0], [0], [1], [0, 0, 1, 1], [], []>} : vector<32x32xf32>, vector<32x32xf32>, vector<32x32xf32> -> vector<32x32xf32>
    %cst_350 = arith.constant dense<0.000000e+00> : vector<32x32xf32>
    %628 = tpu.matmul %627, %291, %cst_350 {dimension_numbers = #tpu.dot_dimension_numbers<[1], [0], [0], [1], [0, 0, 1, 1], [], []>} : vector<32x32xf32>, vector<32x32xf32>, vector<32x32xf32> -> vector<32x32xf32>
    %c22_i32_351 = arith.constant 22 : i32
    %629 = arith.cmpi sgt, %269, %c22_i32_351 : i32
    %630 = arith.extui %629 : i1 to i32
    %631 = arith.sitofp %630 : i32 to f32
    %632 = vector.broadcast %631 : f32 to vector<32x32xf32>
    %633 = arith.mulf %628, %632 : vector<32x32xf32>
    %c22 = arith.constant 22 : index
    %c0_352 = arith.constant 0 : index
    %c0_353 = arith.constant 0 : index
    %634 = vector.load %arg5[%c22, %c0_352, %c0_353] : memref<32x32x32xf32, #tpu.memory_space<vmem>>, vector<1x32x32xf32>
    %635 = vector.shape_cast %634 : vector<1x32x32xf32> to vector<32x32xf32>
    %636 = vector.shape_cast %633 : vector<32x32xf32> to vector<1x32x32xf32>
    tpu.vector_store %arg5[%c22, %c0_352, %c0_353], %636 {strides = array<i32>} : memref<32x32x32xf32, #tpu.memory_space<vmem>>, vector<1x32x32xf32>,
    %c23_i32 = arith.constant 23 : i32
    %637 = arith.addi %266, %c23_i32 : i32
    %c31_i32_354 = arith.constant 31 : i32
    %638 = arith.minsi %637, %c31_i32_354 : i32
    %639 = arith.index_cast %638 : i32 to index
    %c0_355 = arith.constant 0 : index
    %c0_356 = arith.constant 0 : index
    %640 = vector.load %arg3[%639, %c0_355, %c0_356] : memref<32x32x32xf32, #tpu.memory_space<vmem>>, vector<1x32x32xf32>
    %641 = vector.shape_cast %640 : vector<1x32x32xf32> to vector<32x32xf32>
    %cst_357 = arith.constant dense<0.000000e+00> : vector<32x32xf32>
    %642 = tpu.matmul %281, %641, %cst_357 {dimension_numbers = #tpu.dot_dimension_numbers<[1], [0], [0], [1], [0, 0, 1, 1], [], []>} : vector<32x32xf32>, vector<32x32xf32>, vector<32x32xf32> -> vector<32x32xf32>
    %cst_358 = arith.constant dense<0.000000e+00> : vector<32x32xf32>
    %643 = tpu.matmul %642, %291, %cst_358 {dimension_numbers = #tpu.dot_dimension_numbers<[1], [0], [0], [1], [0, 0, 1, 1], [], []>} : vector<32x32xf32>, vector<32x32xf32>, vector<32x32xf32> -> vector<32x32xf32>
    %c23_i32_359 = arith.constant 23 : i32
    %644 = arith.cmpi sgt, %269, %c23_i32_359 : i32
    %645 = arith.extui %644 : i1 to i32
    %646 = arith.sitofp %645 : i32 to f32
    %647 = vector.broadcast %646 : f32 to vector<32x32xf32>
    %648 = arith.mulf %643, %647 : vector<32x32xf32>
    %c23 = arith.constant 23 : index
    %c0_360 = arith.constant 0 : index
    %c0_361 = arith.constant 0 : index
    %649 = vector.load %arg5[%c23, %c0_360, %c0_361] : memref<32x32x32xf32, #tpu.memory_space<vmem>>, vector<1x32x32xf32>
    %650 = vector.shape_cast %649 : vector<1x32x32xf32> to vector<32x32xf32>
    %651 = vector.shape_cast %648 : vector<32x32xf32> to vector<1x32x32xf32>
    tpu.vector_store %arg5[%c23, %c0_360, %c0_361], %651 {strides = array<i32>} : memref<32x32x32xf32, #tpu.memory_space<vmem>>, vector<1x32x32xf32>,
    %c24_i32 = arith.constant 24 : i32
    %652 = arith.addi %266, %c24_i32 : i32
    %c31_i32_362 = arith.constant 31 : i32
    %653 = arith.minsi %652, %c31_i32_362 : i32
    %654 = arith.index_cast %653 : i32 to index
    %c0_363 = arith.constant 0 : index
    %c0_364 = arith.constant 0 : index
    %655 = vector.load %arg3[%654, %c0_363, %c0_364] : memref<32x32x32xf32, #tpu.memory_space<vmem>>, vector<1x32x32xf32>
    %656 = vector.shape_cast %655 : vector<1x32x32xf32> to vector<32x32xf32>
    %cst_365 = arith.constant dense<0.000000e+00> : vector<32x32xf32>
    %657 = tpu.matmul %281, %656, %cst_365 {dimension_numbers = #tpu.dot_dimension_numbers<[1], [0], [0], [1], [0, 0, 1, 1], [], []>} : vector<32x32xf32>, vector<32x32xf32>, vector<32x32xf32> -> vector<32x32xf32>
    %cst_366 = arith.constant dense<0.000000e+00> : vector<32x32xf32>
    %658 = tpu.matmul %657, %291, %cst_366 {dimension_numbers = #tpu.dot_dimension_numbers<[1], [0], [0], [1], [0, 0, 1, 1], [], []>} : vector<32x32xf32>, vector<32x32xf32>, vector<32x32xf32> -> vector<32x32xf32>
    %c24_i32_367 = arith.constant 24 : i32
    %659 = arith.cmpi sgt, %269, %c24_i32_367 : i32
    %660 = arith.extui %659 : i1 to i32
    %661 = arith.sitofp %660 : i32 to f32
    %662 = vector.broadcast %661 : f32 to vector<32x32xf32>
    %663 = arith.mulf %658, %662 : vector<32x32xf32>
    %c24 = arith.constant 24 : index
    %c0_368 = arith.constant 0 : index
    %c0_369 = arith.constant 0 : index
    %664 = vector.load %arg5[%c24, %c0_368, %c0_369] : memref<32x32x32xf32, #tpu.memory_space<vmem>>, vector<1x32x32xf32>
    %665 = vector.shape_cast %664 : vector<1x32x32xf32> to vector<32x32xf32>
    %666 = vector.shape_cast %663 : vector<32x32xf32> to vector<1x32x32xf32>
    tpu.vector_store %arg5[%c24, %c0_368, %c0_369], %666 {strides = array<i32>} : memref<32x32x32xf32, #tpu.memory_space<vmem>>, vector<1x32x32xf32>,
    %c25_i32 = arith.constant 25 : i32
    %667 = arith.addi %266, %c25_i32 : i32
    %c31_i32_370 = arith.constant 31 : i32
    %668 = arith.minsi %667, %c31_i32_370 : i32
    %669 = arith.index_cast %668 : i32 to index
    %c0_371 = arith.constant 0 : index
    %c0_372 = arith.constant 0 : index
    %670 = vector.load %arg3[%669, %c0_371, %c0_372] : memref<32x32x32xf32, #tpu.memory_space<vmem>>, vector<1x32x32xf32>
    %671 = vector.shape_cast %670 : vector<1x32x32xf32> to vector<32x32xf32>
    %cst_373 = arith.constant dense<0.000000e+00> : vector<32x32xf32>
    %672 = tpu.matmul %281, %671, %cst_373 {dimension_numbers = #tpu.dot_dimension_numbers<[1], [0], [0], [1], [0, 0, 1, 1], [], []>} : vector<32x32xf32>, vector<32x32xf32>, vector<32x32xf32> -> vector<32x32xf32>
    %cst_374 = arith.constant dense<0.000000e+00> : vector<32x32xf32>
    %673 = tpu.matmul %672, %291, %cst_374 {dimension_numbers = #tpu.dot_dimension_numbers<[1], [0], [0], [1], [0, 0, 1, 1], [], []>} : vector<32x32xf32>, vector<32x32xf32>, vector<32x32xf32> -> vector<32x32xf32>
    %c25_i32_375 = arith.constant 25 : i32
    %674 = arith.cmpi sgt, %269, %c25_i32_375 : i32
    %675 = arith.extui %674 : i1 to i32
    %676 = arith.sitofp %675 : i32 to f32
    %677 = vector.broadcast %676 : f32 to vector<32x32xf32>
    %678 = arith.mulf %673, %677 : vector<32x32xf32>
    %c25 = arith.constant 25 : index
    %c0_376 = arith.constant 0 : index
    %c0_377 = arith.constant 0 : index
    %679 = vector.load %arg5[%c25, %c0_376, %c0_377] : memref<32x32x32xf32, #tpu.memory_space<vmem>>, vector<1x32x32xf32>
    %680 = vector.shape_cast %679 : vector<1x32x32xf32> to vector<32x32xf32>
    %681 = vector.shape_cast %678 : vector<32x32xf32> to vector<1x32x32xf32>
    tpu.vector_store %arg5[%c25, %c0_376, %c0_377], %681 {strides = array<i32>} : memref<32x32x32xf32, #tpu.memory_space<vmem>>, vector<1x32x32xf32>,
    %c26_i32 = arith.constant 26 : i32
    %682 = arith.addi %266, %c26_i32 : i32
    %c31_i32_378 = arith.constant 31 : i32
    %683 = arith.minsi %682, %c31_i32_378 : i32
    %684 = arith.index_cast %683 : i32 to index
    %c0_379 = arith.constant 0 : index
    %c0_380 = arith.constant 0 : index
    %685 = vector.load %arg3[%684, %c0_379, %c0_380] : memref<32x32x32xf32, #tpu.memory_space<vmem>>, vector<1x32x32xf32>
    %686 = vector.shape_cast %685 : vector<1x32x32xf32> to vector<32x32xf32>
    %cst_381 = arith.constant dense<0.000000e+00> : vector<32x32xf32>
    %687 = tpu.matmul %281, %686, %cst_381 {dimension_numbers = #tpu.dot_dimension_numbers<[1], [0], [0], [1], [0, 0, 1, 1], [], []>} : vector<32x32xf32>, vector<32x32xf32>, vector<32x32xf32> -> vector<32x32xf32>
    %cst_382 = arith.constant dense<0.000000e+00> : vector<32x32xf32>
    %688 = tpu.matmul %687, %291, %cst_382 {dimension_numbers = #tpu.dot_dimension_numbers<[1], [0], [0], [1], [0, 0, 1, 1], [], []>} : vector<32x32xf32>, vector<32x32xf32>, vector<32x32xf32> -> vector<32x32xf32>
    %c26_i32_383 = arith.constant 26 : i32
    %689 = arith.cmpi sgt, %269, %c26_i32_383 : i32
    %690 = arith.extui %689 : i1 to i32
    %691 = arith.sitofp %690 : i32 to f32
    %692 = vector.broadcast %691 : f32 to vector<32x32xf32>
    %693 = arith.mulf %688, %692 : vector<32x32xf32>
    %c26 = arith.constant 26 : index
    %c0_384 = arith.constant 0 : index
    %c0_385 = arith.constant 0 : index
    %694 = vector.load %arg5[%c26, %c0_384, %c0_385] : memref<32x32x32xf32, #tpu.memory_space<vmem>>, vector<1x32x32xf32>
    %695 = vector.shape_cast %694 : vector<1x32x32xf32> to vector<32x32xf32>
    %696 = vector.shape_cast %693 : vector<32x32xf32> to vector<1x32x32xf32>
    tpu.vector_store %arg5[%c26, %c0_384, %c0_385], %696 {strides = array<i32>} : memref<32x32x32xf32, #tpu.memory_space<vmem>>, vector<1x32x32xf32>,
    %c27_i32 = arith.constant 27 : i32
    %697 = arith.addi %266, %c27_i32 : i32
    %c31_i32_386 = arith.constant 31 : i32
    %698 = arith.minsi %697, %c31_i32_386 : i32
    %699 = arith.index_cast %698 : i32 to index
    %c0_387 = arith.constant 0 : index
    %c0_388 = arith.constant 0 : index
    %700 = vector.load %arg3[%699, %c0_387, %c0_388] : memref<32x32x32xf32, #tpu.memory_space<vmem>>, vector<1x32x32xf32>
    %701 = vector.shape_cast %700 : vector<1x32x32xf32> to vector<32x32xf32>
    %cst_389 = arith.constant dense<0.000000e+00> : vector<32x32xf32>
    %702 = tpu.matmul %281, %701, %cst_389 {dimension_numbers = #tpu.dot_dimension_numbers<[1], [0], [0], [1], [0, 0, 1, 1], [], []>} : vector<32x32xf32>, vector<32x32xf32>, vector<32x32xf32> -> vector<32x32xf32>
    %cst_390 = arith.constant dense<0.000000e+00> : vector<32x32xf32>
    %703 = tpu.matmul %702, %291, %cst_390 {dimension_numbers = #tpu.dot_dimension_numbers<[1], [0], [0], [1], [0, 0, 1, 1], [], []>} : vector<32x32xf32>, vector<32x32xf32>, vector<32x32xf32> -> vector<32x32xf32>
    %c27_i32_391 = arith.constant 27 : i32
    %704 = arith.cmpi sgt, %269, %c27_i32_391 : i32
    %705 = arith.extui %704 : i1 to i32
    %706 = arith.sitofp %705 : i32 to f32
    %707 = vector.broadcast %706 : f32 to vector<32x32xf32>
    %708 = arith.mulf %703, %707 : vector<32x32xf32>
    %c27 = arith.constant 27 : index
    %c0_392 = arith.constant 0 : index
    %c0_393 = arith.constant 0 : index
    %709 = vector.load %arg5[%c27, %c0_392, %c0_393] : memref<32x32x32xf32, #tpu.memory_space<vmem>>, vector<1x32x32xf32>
    %710 = vector.shape_cast %709 : vector<1x32x32xf32> to vector<32x32xf32>
    %711 = vector.shape_cast %708 : vector<32x32xf32> to vector<1x32x32xf32>
    tpu.vector_store %arg5[%c27, %c0_392, %c0_393], %711 {strides = array<i32>} : memref<32x32x32xf32, #tpu.memory_space<vmem>>, vector<1x32x32xf32>,
    %c28_i32 = arith.constant 28 : i32
    %712 = arith.addi %266, %c28_i32 : i32
    %c31_i32_394 = arith.constant 31 : i32
    %713 = arith.minsi %712, %c31_i32_394 : i32
    %714 = arith.index_cast %713 : i32 to index
    %c0_395 = arith.constant 0 : index
    %c0_396 = arith.constant 0 : index
    %715 = vector.load %arg3[%714, %c0_395, %c0_396] : memref<32x32x32xf32, #tpu.memory_space<vmem>>, vector<1x32x32xf32>
    %716 = vector.shape_cast %715 : vector<1x32x32xf32> to vector<32x32xf32>
    %cst_397 = arith.constant dense<0.000000e+00> : vector<32x32xf32>
    %717 = tpu.matmul %281, %716, %cst_397 {dimension_numbers = #tpu.dot_dimension_numbers<[1], [0], [0], [1], [0, 0, 1, 1], [], []>} : vector<32x32xf32>, vector<32x32xf32>, vector<32x32xf32> -> vector<32x32xf32>
    %cst_398 = arith.constant dense<0.000000e+00> : vector<32x32xf32>
    %718 = tpu.matmul %717, %291, %cst_398 {dimension_numbers = #tpu.dot_dimension_numbers<[1], [0], [0], [1], [0, 0, 1, 1], [], []>} : vector<32x32xf32>, vector<32x32xf32>, vector<32x32xf32> -> vector<32x32xf32>
    %c28_i32_399 = arith.constant 28 : i32
    %719 = arith.cmpi sgt, %269, %c28_i32_399 : i32
    %720 = arith.extui %719 : i1 to i32
    %721 = arith.sitofp %720 : i32 to f32
    %722 = vector.broadcast %721 : f32 to vector<32x32xf32>
    %723 = arith.mulf %718, %722 : vector<32x32xf32>
    %c28 = arith.constant 28 : index
    %c0_400 = arith.constant 0 : index
    %c0_401 = arith.constant 0 : index
    %724 = vector.load %arg5[%c28, %c0_400, %c0_401] : memref<32x32x32xf32, #tpu.memory_space<vmem>>, vector<1x32x32xf32>
    %725 = vector.shape_cast %724 : vector<1x32x32xf32> to vector<32x32xf32>
    %726 = vector.shape_cast %723 : vector<32x32xf32> to vector<1x32x32xf32>
    tpu.vector_store %arg5[%c28, %c0_400, %c0_401], %726 {strides = array<i32>} : memref<32x32x32xf32, #tpu.memory_space<vmem>>, vector<1x32x32xf32>,
    %c29_i32 = arith.constant 29 : i32
    %727 = arith.addi %266, %c29_i32 : i32
    %c31_i32_402 = arith.constant 31 : i32
    %728 = arith.minsi %727, %c31_i32_402 : i32
    %729 = arith.index_cast %728 : i32 to index
    %c0_403 = arith.constant 0 : index
    %c0_404 = arith.constant 0 : index
    %730 = vector.load %arg3[%729, %c0_403, %c0_404] : memref<32x32x32xf32, #tpu.memory_space<vmem>>, vector<1x32x32xf32>
    %731 = vector.shape_cast %730 : vector<1x32x32xf32> to vector<32x32xf32>
    %cst_405 = arith.constant dense<0.000000e+00> : vector<32x32xf32>
    %732 = tpu.matmul %281, %731, %cst_405 {dimension_numbers = #tpu.dot_dimension_numbers<[1], [0], [0], [1], [0, 0, 1, 1], [], []>} : vector<32x32xf32>, vector<32x32xf32>, vector<32x32xf32> -> vector<32x32xf32>
    %cst_406 = arith.constant dense<0.000000e+00> : vector<32x32xf32>
    %733 = tpu.matmul %732, %291, %cst_406 {dimension_numbers = #tpu.dot_dimension_numbers<[1], [0], [0], [1], [0, 0, 1, 1], [], []>} : vector<32x32xf32>, vector<32x32xf32>, vector<32x32xf32> -> vector<32x32xf32>
    %c29_i32_407 = arith.constant 29 : i32
    %734 = arith.cmpi sgt, %269, %c29_i32_407 : i32
    %735 = arith.extui %734 : i1 to i32
    %736 = arith.sitofp %735 : i32 to f32
    %737 = vector.broadcast %736 : f32 to vector<32x32xf32>
    %738 = arith.mulf %733, %737 : vector<32x32xf32>
    %c29 = arith.constant 29 : index
    %c0_408 = arith.constant 0 : index
    %c0_409 = arith.constant 0 : index
    %739 = vector.load %arg5[%c29, %c0_408, %c0_409] : memref<32x32x32xf32, #tpu.memory_space<vmem>>, vector<1x32x32xf32>
    %740 = vector.shape_cast %739 : vector<1x32x32xf32> to vector<32x32xf32>
    %741 = vector.shape_cast %738 : vector<32x32xf32> to vector<1x32x32xf32>
    tpu.vector_store %arg5[%c29, %c0_408, %c0_409], %741 {strides = array<i32>} : memref<32x32x32xf32, #tpu.memory_space<vmem>>, vector<1x32x32xf32>,
    %c30_i32 = arith.constant 30 : i32
    %742 = arith.addi %266, %c30_i32 : i32
    %c31_i32_410 = arith.constant 31 : i32
    %743 = arith.minsi %742, %c31_i32_410 : i32
    %744 = arith.index_cast %743 : i32 to index
    %c0_411 = arith.constant 0 : index
    %c0_412 = arith.constant 0 : index
    %745 = vector.load %arg3[%744, %c0_411, %c0_412] : memref<32x32x32xf32, #tpu.memory_space<vmem>>, vector<1x32x32xf32>
    %746 = vector.shape_cast %745 : vector<1x32x32xf32> to vector<32x32xf32>
    %cst_413 = arith.constant dense<0.000000e+00> : vector<32x32xf32>
    %747 = tpu.matmul %281, %746, %cst_413 {dimension_numbers = #tpu.dot_dimension_numbers<[1], [0], [0], [1], [0, 0, 1, 1], [], []>} : vector<32x32xf32>, vector<32x32xf32>, vector<32x32xf32> -> vector<32x32xf32>
    %cst_414 = arith.constant dense<0.000000e+00> : vector<32x32xf32>
    %748 = tpu.matmul %747, %291, %cst_414 {dimension_numbers = #tpu.dot_dimension_numbers<[1], [0], [0], [1], [0, 0, 1, 1], [], []>} : vector<32x32xf32>, vector<32x32xf32>, vector<32x32xf32> -> vector<32x32xf32>
    %c30_i32_415 = arith.constant 30 : i32
    %749 = arith.cmpi sgt, %269, %c30_i32_415 : i32
    %750 = arith.extui %749 : i1 to i32
    %751 = arith.sitofp %750 : i32 to f32
    %752 = vector.broadcast %751 : f32 to vector<32x32xf32>
    %753 = arith.mulf %748, %752 : vector<32x32xf32>
    %c30 = arith.constant 30 : index
    %c0_416 = arith.constant 0 : index
    %c0_417 = arith.constant 0 : index
    %754 = vector.load %arg5[%c30, %c0_416, %c0_417] : memref<32x32x32xf32, #tpu.memory_space<vmem>>, vector<1x32x32xf32>
    %755 = vector.shape_cast %754 : vector<1x32x32xf32> to vector<32x32xf32>
    %756 = vector.shape_cast %753 : vector<32x32xf32> to vector<1x32x32xf32>
    tpu.vector_store %arg5[%c30, %c0_416, %c0_417], %756 {strides = array<i32>} : memref<32x32x32xf32, #tpu.memory_space<vmem>>, vector<1x32x32xf32>,
    %c31_i32_418 = arith.constant 31 : i32
    %757 = arith.addi %266, %c31_i32_418 : i32
    %c31_i32_419 = arith.constant 31 : i32
    %758 = arith.minsi %757, %c31_i32_419 : i32
    %759 = arith.index_cast %758 : i32 to index
    %c0_420 = arith.constant 0 : index
    %c0_421 = arith.constant 0 : index
    %760 = vector.load %arg3[%759, %c0_420, %c0_421] : memref<32x32x32xf32, #tpu.memory_space<vmem>>, vector<1x32x32xf32>
    %761 = vector.shape_cast %760 : vector<1x32x32xf32> to vector<32x32xf32>
    %cst_422 = arith.constant dense<0.000000e+00> : vector<32x32xf32>
    %762 = tpu.matmul %281, %761, %cst_422 {dimension_numbers = #tpu.dot_dimension_numbers<[1], [0], [0], [1], [0, 0, 1, 1], [], []>} : vector<32x32xf32>, vector<32x32xf32>, vector<32x32xf32> -> vector<32x32xf32>
    %cst_423 = arith.constant dense<0.000000e+00> : vector<32x32xf32>
    %763 = tpu.matmul %762, %291, %cst_423 {dimension_numbers = #tpu.dot_dimension_numbers<[1], [0], [0], [1], [0, 0, 1, 1], [], []>} : vector<32x32xf32>, vector<32x32xf32>, vector<32x32xf32> -> vector<32x32xf32>
    %c31_i32_424 = arith.constant 31 : i32
    %764 = arith.cmpi sgt, %269, %c31_i32_424 : i32
    %765 = arith.extui %764 : i1 to i32
    %766 = arith.sitofp %765 : i32 to f32
    %767 = vector.broadcast %766 : f32 to vector<32x32xf32>
    %768 = arith.mulf %763, %767 : vector<32x32xf32>
    %c31 = arith.constant 31 : index
    %c0_425 = arith.constant 0 : index
    %c0_426 = arith.constant 0 : index
    %769 = vector.load %arg5[%c31, %c0_425, %c0_426] : memref<32x32x32xf32, #tpu.memory_space<vmem>>, vector<1x32x32xf32>
    %770 = vector.shape_cast %769 : vector<1x32x32xf32> to vector<32x32xf32>
    %771 = vector.shape_cast %768 : vector<32x32xf32> to vector<1x32x32xf32>
    tpu.vector_store %arg5[%c31, %c0_425, %c0_426], %771 {strides = array<i32>} : memref<32x32x32xf32, #tpu.memory_space<vmem>>, vector<1x32x32xf32>,
    return
  }
  func.func @transform_0(%arg0: i32, %arg1: memref<16xi32, #tpu.memory_space<smem>>) -> (i32, i32, i32) {
    %c0_i32 = arith.constant 0 : i32
    %c0_i32_0 = arith.constant 0 : i32
    %c0_i32_1 = arith.constant 0 : i32
    %c0_i32_2 = arith.constant 0 : i32
    return %c0_i32, %c0_i32_0, %c0_i32_1 : i32, i32, i32
  }
  func.func @transform_1(%arg0: i32, %arg1: memref<16xi32, #tpu.memory_space<smem>>) -> (i32, i32, i32) {
    %c0_i32 = arith.constant 0 : i32
    %c0_i32_0 = arith.constant 0 : i32
    %c0_i32_1 = arith.constant 0 : i32
    %c0_i32_2 = arith.constant 0 : i32
    return %c0_i32, %c0_i32_0, %c0_i32_1 : i32, i32, i32
  }
  func.func @transform_2(%arg0: i32, %arg1: memref<16xi32, #tpu.memory_space<smem>>) -> (i32, i32, i32) {
    %c0_i32 = arith.constant 0 : i32
    %c0_i32_0 = arith.constant 0 : i32
    %c0_i32_1 = arith.constant 0 : i32
    %c0_i32_2 = arith.constant 0 : i32
    return %c0_i32, %c0_i32_0, %c0_i32_1 : i32, i32, i32
  }
  func.func @transform_3(%arg0: i32, %arg1: memref<16xi32, #tpu.memory_space<smem>>) -> (i32, i32, i32) {
    %c0_i32 = arith.constant 0 : i32
    %c0_i32_0 = arith.constant 0 : i32
    %c0_i32_1 = arith.constant 0 : i32
    %c0_i32_2 = arith.constant 0 : i32
    return %c0_i32, %c0_i32_0, %c0_i32_1 : i32, i32, i32
  }
}

</mosaic_0001>

<bundles_post_ra>
// kernel: tpu_custom_call.1
= control target key start
LH: loop header
LB: loop body
LE: loop exit
PB: predicated region body
PF: predicated region fallthrough
CT: control target
= control target key end

     0   :  { %s5007_s18 = smov [#allocation3]   ;;  %s6760_s0 = inlined_call_operand.hbm [shape: s32[16], index: 0, kind: input, shape index: {}]   ;;  %s6761_s1 = inlined_call_operand.hbm [shape: f32[16,16,16], index: 1, kind: input, shape index: {}]   ;;  %s6762_s2 = inlined_call_operand.hbm [shape: f32[32,32,32], index: 2, kind: input, shape index: {}]   ;;  %s6763_s3 = inlined_call_operand.hbm [shape: f32[16,16,16], index: 3, kind: output, shape index: {0}]   ;;  %s6764_s4 = inlined_call_operand.hbm [shape: f32[32,32,32], index: 4, kind: output, shape index: {1}]  }
   0x1   :  { %s11_s17 = sshll.u32 %s6760_s0, 4  ;;  %s12_s17 = int_to_ptr.hbm [resolvable:$true] %s11_s17 }
   0x2   :  { %14 = dma.hbm_to_smem %s12_s17, 16, %s5007_s18, [#allocation2] }
   0x3   :  { %4997 = dma.done.wait [#allocation2], 16 }
   0x4   :  { %4998 = vsyncadd [#allocation2], 4294967280 }
   0x5   :  { %17 = sfence }
   0x6   :  { %18 = vsyncpa [#allocation5], 0 }
   0x7   :  { %19 = vsyncpa [#allocation8], 0 }
   0x8   :  { %20 = vsyncpa [#allocation6], 0 }
   0x9   :  { %21 = vsyncpa [#allocation11], 0  ;;  %s26_s21 = sshll.u32 %s6761_s1, 4  ;;  %s5008_s22 = smov [#allocation4]   ;;  %s27_s21 = int_to_ptr.hbm [resolvable:$true] %s26_s21 }
   0xa   :  { %s28_s23 = sshll.u32 %s5008_s22, 4  ;;  %s39_s25 = sshll.u32 %s6762_s2, 4  ;;  %s29_s23 = int_to_ptr.vmem [resolvable:$true] %s28_s23  ;;  %s40_s25 = int_to_ptr.hbm [resolvable:$true] %s39_s25 }
   0xb   :  { %s5009_s26 = smov 128   ;;  %s5010_s27 = smov 8  }
   0xc   :  { %34 = dma.hbm_to_vmem [thread:$0]  %s27_s21, 4096, %s29_s23, [#allocation5], %s5009_s26, %s5009_s26, %s5010_s27  }
   0xd   :  { %s5011_s28 = smov [#allocation7]  }
   0xe   :  { %s41_s29 = sshll.u32 %s5011_s28, 4  ;;  %s42_s29 = int_to_ptr.vmem [resolvable:$true] %s41_s29 }
   0xf   :  { %47 = dma.hbm_to_vmem [thread:$0]  %s40_s25, 16384, %s42_s29, [#allocation8], %s5009_s26, %s5009_s26, %s5010_s27  }
  0x10   :  { %4999 = dma.done.wait [#allocation5], 4096  }
  0x11   :  { %5000 = vsyncadd [#allocation5], 4294963200 }
  0x12   :  { %5001 = dma.done.wait [#allocation8], 16384  }
  0x13   :  { %5002 = vsyncadd [#allocation8], 4294950912  ;;  %s5056_s1 = sld [smem:[#allocation3]]  ;;  %v62_v0 = vlaneseq  ;;  %v5012_v10 = vmov 0.0   ;;  %vm99_vm3 = vcmask 130048   ;;  %v5013_v49 = vmov 1.0  }
  0x14   :  { %s4329_s2 = sld [smem:[#allocation3 + $0x1]]  ;;  %vm1248_vm15 = vcmask 261120  }
  0x15   :  { %s5058_s30 = sld [smem:[#allocation3 + $0x4]]  ;;  %v5060_v1 = vshrl.u32 %v62_v0, 7  ;;  %v5063_v2 = vand.u32 127, %v62_v0 }
  0x17   :  { %v5067_v4 = vadd.s32 8, %v5060_v1 }
  0x19   :  { %s166_s5 = sadd.s32 1, %s5056_s1  ;;  %s302_s6 = sadd.s32 3, %s5056_s1 }
  0x1a   :  { %p167_p0 = scmp.lt.s32.totalorder %s166_s5, 15  ;;  %v67_v3 = vstv %s4329_s2  ;;  %p303_p1 = scmp.lt.s32.totalorder %s302_s6, 15 }
  0x1b   :  { %v68_v5 = vadd.s32 %v67_v3, %v5060_v1  ;;  %v72_v6 = vstv %s5058_s30  ;;  %p93_p2 = scmp.lt.s32.totalorder %s5056_s1, 15  ;;  %s234_s8 = sadd.s32 2, %s5056_s1  ;;  %v69_v7 = vadd.s32 %v67_v3, %v5067_v4 }
  0x1c   :  { %s6783_s5 = smov (!%p167_p0, %s166_s5), 15  ;;  %vm73_vm0 = vcmp.lt.s32.totalorder %v5060_v1, %v72_v6  ;;  %s6785_s6 = smov (!%p303_p1, %s302_s6), 15  ;;  %vm74_vm5 = vcmp.lt.s32.totalorder %v5067_v4, %v72_v6 }
  0x1d   :  { %vm70_vm1 = vcmp.eq.s32.totalorder %v5063_v2, %v68_v5  ;;  %s4345_s7 = sshll.u32 %s6783_s5, 4  ;;  %s4359_s9 = sshll.u32 %s6785_s6, 4  ;;  %vm71_vm4 = vcmp.eq.s32.totalorder %v5063_v2, %v69_v7 }
  0x1e   :  { %vm75_vm2 = vmand %vm70_vm1, %vm73_vm0  ;;  %s170_s10 = scalar_lea.vmem [#allocation4], %s4345_s7  ;;  %p235_p3 = scmp.lt.s32.totalorder %s234_s8, 15 }
  0x1f   :  { %v172_v8 = vld [vmem:[%s170_s10 + $0x8] sm:$0xff]  ;;  %v171_v9 = vld [vmem:[%s170_s10] sm:$0xff]  ;;  %v5077_v11 = vsel %vm75_vm2, 1.0, %v5012_v10  ;;  %s94_s11 = scalar_select %p93_p2, %s5056_s1, 15  ;;  %vm76_vm6 = vmand %vm71_vm4, %vm74_vm5 }
  0x20   :  { %187 = vmatpush.msra.mxu2 %v172_v8  ;;  %s306_s12 = scalar_lea.vmem [#allocation4], %s4359_s9  ;;  %s6787_s8 = smov (!%p235_p3, %s234_s8), 15  ;;  %v5094_v17 = vsel %vm76_vm6, 1.0, %v5012_v10  ;;  %v5246_v8 = vadd.s32 16, %v5060_v1 }
  0x21   :  { %v308_v12 = vld [vmem:[%s306_s12 + $0x8] sm:$0xff]  ;;  %s4338_s13 = sshll.u32 %s94_s11, 4  ;;  %s438_s14 = sadd.s32 5, %s5056_s1  ;;  %v307_v13 = vld [vmem:[%s306_s12] sm:$0xff] }
  0x22   :  { %188 = vmatpush.msra.mxu2 %v171_v9  ;;  %s4352_s15 = sshll.u32 %s6787_s8, 4  ;;  %s96_s16 = scalar_lea.vmem [#allocation4], %s4338_s13 }
  0x23   :  { %4346 = vmatmul.msk.f32.vlgmr.msra.gmra.mxu2 %vm99_vm3, %v5077_v11  ;;  %v98_v14 = vld [vmem:[%s96_s16 + $0x8] sm:$0xff]  ;;  %v97_v15 = vld [vmem:[%s96_s16] sm:$0xff]  ;;  %p439_p4 = scmp.lt.s32.totalorder %s438_s14, 15  ;;  %s370_s17 = sadd.s32 4, %s5056_s1 }
  0x24   :  { %323 = vmatpush.msrb.mxu2 %v308_v12  ;;  %120 = vmatpush.msra.mxu0 %v98_v14  ;;  %s574_s18 = sadd.s32 7, %s5056_s1  ;;  %s238_s19 = scalar_lea.vmem [#allocation4], %s4352_s15 }
  0x25   :  { %v240_v16 = vld [vmem:[%s238_s19 + $0x8] sm:$0xff]  ;;  %s6789_s14 = smov (!%p439_p4, %s438_s14), 15  ;;  %p371_p5 = scmp.lt.s32.totalorder %s370_s17, 15  ;;  %v239_v18 = vld [vmem:[%s238_s19] sm:$0xff] }
  0x26   :  { %324 = vmatpush.msrb.mxu2 %v307_v13  ;;  %121 = vmatpush.msra.mxu0 %v97_v15  ;;  %p5089_p6 = scmp.lt.s32.totalorder %s574_s18, 15  ;;  %s4373_s21 = sshll.u32 %s6789_s14, 4 }
  0x27   :  { %4339 = vmatmul.msk.f32.vlgmr.msra.gmra.mxu0 %vm99_vm3, %v5077_v11  ;;  %s506_s22 = sadd.s32 6, %s5056_s1  ;;  %s442_s24 = scalar_lea.vmem [#allocation4], %s4373_s21 }
  0x28   :  { %255 = vmatpush.msrb.mxu0 %v240_v16  ;;  %p5099_p7 = scmp.lt.s32.totalorder %s506_s22, 15  ;;  %v444_v19 = vld [vmem:[%s442_s24 + $0x8] sm:$0xff]  ;;  %s6791_s17 = smov (!%p371_p5, %s370_s17), 15  ;;  %v443_v20 = vld [vmem:[%s442_s24] sm:$0xff]  ;;  %v5276_v16 = vadd.s32 24, %v5060_v1 }
  0x29   :  { %s6793_s18 = smov (!%p5089_p6, %s574_s18), 15  ;;  %459 = vmatpush.msra.mxu2 %v444_v19  ;;  %s4366_s0 = sshll.u32 %s6791_s17, 4 }
  0x2a   :  { %256 = vmatpush.msrb.mxu0 %v239_v18  ;;  %s4387_s25 = sshll.u32 %s6793_s18, 4  ;;  %s374_s28 = scalar_lea.vmem [#allocation4], %s4366_s0 }
  0x2b   :  { %4347 = vmatmul.msk.f32.gmra.mxu2 %vm99_vm3, %v5094_v17  ;;  %v376_v21 = vld [vmem:[%s374_s28 + $0x8] sm:$0xff]  ;;  %v375_v22 = vld [vmem:[%s374_s28] sm:$0xff]  ;;  %s6795_s22 = smov (!%p5099_p7, %s506_s22), 15  ;;  %s710_s29 = sadd.s32 9, %s5056_s1 }
  0x2c   :  { %460 = vmatpush.msra.mxu2 %v443_v20  ;;  %391 = vmatpush.msra.mxu0 %v376_v21  ;;  %s578_s2 = scalar_lea.vmem [#allocation4], %s4387_s25  ;;  %s4380_s30 = sshll.u32 %s6795_s22, 4 }
  0x2d   :  { %v580_v23 = vld [vmem:[%s578_s2 + $0x8] sm:$0xff]  ;;  %v579_v24 = vld [vmem:[%s578_s2] sm:$0xff]  ;;  %p711_p8 = scmp.lt.s32.totalorder %s710_s29, 15  ;;  %s642_s5 = sadd.s32 8, %s5056_s1 }
  0x2e   :  { %392 = vmatpush.msra.mxu0 %v375_v22  ;;  %s510_s6 = scalar_lea.vmem [#allocation4], %s4380_s30  ;;  %p643_p9 = scmp.lt.s32.totalorder %s642_s5, 15 }
  0x2f   :  { %4340 = vmatmul.msk.f32.gmra.mxu0 %vm99_vm3, %v5094_v17  ;;  %v512_v25 = vld [vmem:[%s510_s6 + $0x8] sm:$0xff]  ;;  %s6797_s29 = smov (!%p711_p8, %s710_s29), 15  ;;  %v511_v26 = vld [vmem:[%s510_s6] sm:$0xff]  ;;  %s846_s9 = sadd.s32 11, %s5056_s1 }
  0x30   :  { %s4401_s7 = sshll.u32 %s6797_s29, 4  ;;  %s6799_s5 = smov (!%p643_p9, %s642_s5), 15 }
  0x31   :  { %s4394_s8 = sshll.u32 %s6799_s5, 4  ;;  %s714_s10 = scalar_lea.vmem [#allocation4], %s4401_s7 }
  0x32   :  { %v716_v27 = vld [vmem:[%s714_s10 + $0x8] sm:$0xff]  ;;  %v715_v28 = vld [vmem:[%s714_s10] sm:$0xff]  ;;  %p847_p10 = scmp.lt.s32.totalorder %s846_s9, 15  ;;  %s778_s11 = sadd.s32 10, %s5056_s1 }
  0x33   :  { %4360 = vmatmul.msk.f32.vlgmr.msrb.gmra.mxu2 %vm99_vm3, %v5077_v11  ;;  %s646_s12 = scalar_lea.vmem [#allocation4], %s4394_s8  ;;  %p779_p11 = scmp.lt.s32.totalorder %s778_s11, 15 }
  0x34   :  { %595 = vmatpush.msrb.mxu2 %v580_v23  ;;  %v648_v29 = vld [vmem:[%s646_s12 + $0x8] sm:$0xff]  ;;  %s6801_s9 = smov (!%p847_p10, %s846_s9), 15  ;;  %v647_v30 = vld [vmem:[%s646_s12] sm:$0xff]  ;;  %s982_s15 = sadd.s32 13, %s5056_s1 }
  0x35   :  { %s4415_s13 = sshll.u32 %s6801_s9, 4  ;;  %s6803_s11 = smov (!%p779_p11, %s778_s11), 15 }
  0x36   :  { %596 = vmatpush.msrb.mxu2 %v579_v24  ;;  %s4408_s14 = sshll.u32 %s6803_s11, 4  ;;  %s850_s16 = scalar_lea.vmem [#allocation4], %s4415_s13 }
  0x37   :  { %4353 = vmatmul.msk.f32.vlgmr.msrb.gmra.mxu0 %vm99_vm3, %v5077_v11  ;;  %v852_v31 = vld [vmem:[%s850_s16 + $0x8] sm:$0xff]  ;;  %v851_v32 = vld [vmem:[%s850_s16] sm:$0xff]  ;;  %p983_p12 = scmp.lt.s32.totalorder %s982_s15, 15  ;;  %s914_s17 = sadd.s32 12, %s5056_s1 }
  0x38   :  { %527 = vmatpush.msrb.mxu0 %v512_v25  ;;  %s782_s18 = scalar_lea.vmem [#allocation4], %s4408_s14  ;;  %p915_p13 = scmp.lt.s32.totalorder %s914_s17, 15 }
  0x39   :  { %v784_v33 = vld [vmem:[%s782_s18 + $0x8] sm:$0xff]  ;;  %s6805_s15 = smov (!%p983_p12, %s982_s15), 15  ;;  %v783_v34 = vld [vmem:[%s782_s18] sm:$0xff]  ;;  %s1118_s21 = sadd.s32 15, %s5056_s1 }
  0x3a   :  { %528 = vmatpush.msrb.mxu0 %v511_v26  ;;  %s4429_s19 = sshll.u32 %s6805_s15, 4  ;;  %s6807_s17 = smov (!%p915_p13, %s914_s17), 15 }
  0x3b   :  { %4361 = vmatmul.msk.f32.gmra.mxu2 %vm99_vm3, %v5094_v17  ;;  %s4422_s20 = sshll.u32 %s6807_s17, 4  ;;  %s986_s22 = scalar_lea.vmem [#allocation4], %s4429_s19 }
  0x3c   :  { %v988_v35 = vld [vmem:[%s986_s22 + $0x8] sm:$0xff]  ;;  %v987_v36 = vld [vmem:[%s986_s22] sm:$0xff]  ;;  %p1119_p0 = scmp.lt.s32.totalorder %s1118_s21, 15  ;;  %s1050_s23 = sadd.s32 14, %s5056_s1 }
  0x3d   :  { %s918_s24 = scalar_lea.vmem [#allocation4], %s4422_s20  ;;  %p1051_p1 = scmp.lt.s32.totalorder %s1050_s23, 15 }
  0x3e   :  { %v920_v37 = vld [vmem:[%s918_s24 + $0x8] sm:$0xff]  ;;  %s6809_s21 = smov (!%p1119_p0, %s1118_s21), 15  ;;  %v919_v38 = vld [vmem:[%s918_s24] sm:$0xff]  ;;  %s5147_s0 = sld [smem:[#allocation3 + $0x8]] }
  0x3f   :  { %4354 = vmatmul.msk.f32.gmra.mxu0 %vm99_vm3, %v5094_v17  ;;  %s4443_s25 = sshll.u32 %s6809_s21, 4  ;;  %s6811_s23 = smov (!%p1051_p1, %s1050_s23), 15 }
  0x40   :  { %s4436_s1 = sshll.u32 %s6811_s23, 4  ;;  %s1122_s29 = scalar_lea.vmem [#allocation4], %s4443_s25 }
  0x41   :  { %v1124_v39 = vld [vmem:[%s1122_s29 + $0x8] sm:$0xff]  ;;  %v1123_v40 = vld [vmem:[%s1122_s29] sm:$0xff]  ;;  %s1054_s2 = scalar_lea.vmem [#allocation4], %s4436_s1  ;;  %s4330_s30 = sld [smem:[#allocation3 + $0x2]] }
  0x42   :  { %v1056_v41 = vld [vmem:[%s1054_s2 + $0x8] sm:$0xff]  ;;  %v1055_v42 = vld [vmem:[%s1054_s2] sm:$0xff]  ;;  %s4333_s5 = sld [smem:[#allocation3 + $0x5]] }
  0x43   :  { %4374 = vmatmul.msk.f32.vlgmr.msra.gmra.mxu2 %vm99_vm3, %v5077_v11  ;;  %s4451_s14 = sld [smem:[#allocation3 + $0x9]] }
  0x44   :  { %731 = vmatpush.msra.mxu2 %v716_v27  ;;  %s1343_s28 = sadd.s32 1, %s5147_s0  ;;  %p1240_p3 = scmp.lt.s32.totalorder %s5147_s0, 31 }
  0x45   :  { %p1344_p2 = scmp.lt.s32.totalorder %s1343_s28, 31  ;;  %s1527_s9 = sadd.s32 3, %s5147_s0 }
  0x46   :  { %732 = vmatpush.msra.mxu2 %v715_v28  ;;  %s1241_s7 = scalar_select %p1240_p3, %s5147_s0, 31 }
  0x47   :  { %4367 = vmatmul.msk.f32.vlgmr.msra.gmra.mxu0 %vm99_vm3, %v5077_v11  ;;  %s6813_s28 = smov (!%p1344_p2, %s1343_s28), 31  ;;  %v81_v43 = vstv %s4330_s30  ;;  %p5170_p4 = scmp.lt.s32.totalorder %s1527_s9, 31 }
  0x48   :  { %663 = vmatpush.msra.mxu0 %v648_v29  ;;  %s4477_s6 = sshll.u32 %s6813_s28, 5  ;;  %s4464_s8 = sshll.u32 %s1241_s7, 5  ;;  %v82_v44 = vadd.s32 %v81_v43, %v5063_v2  ;;  %v85_v46 = vstv %s4333_s5 }
  0x49   :  { %s1347_s10 = scalar_lea.vmem [#allocation7], %s4477_s6  ;;  %vm86_vm8 = vcmp.lt.s32.totalorder %v5063_v2, %v85_v46  ;;  %s1435_s12 = sadd.s32 2, %s5147_s0  ;;  %v5217_v58 = vstv %s4451_s14 }
  0x4a   :  { %664 = vmatpush.msra.mxu0 %v647_v30  ;;  %v1351_v45 = vld [vmem:[%s1347_s10 + $0x18] sm:$0xff]  ;;  %vm84_vm7 = vcmp.eq.s32.totalorder %v5067_v4, %v82_v44  ;;  %v1350_v47 = vld [vmem:[%s1347_s10 + $0x10] sm:$0xff]  ;;  %vm83_vm10 = vcmp.eq.s32.totalorder %v5060_v1, %v82_v44  ;;  %v1349_v50 = vld [vmem:[%s1347_s10 + $0x8] sm:$0xff]  ;;  %s1243_s13 = scalar_lea.vmem [#allocation7], %s4464_s8  ;;  %s6815_s9 = smov (!%p5170_p4, %s1527_s9), 31  ;;  %v1195_v61 = vadd.s32 %v5217_v58, %v5060_v1  ;;  %v1196_v5 = vadd.s32 %v5217_v58, %v5067_v4 }
  0x4b   :  { %4375 = vmatmul.msk.f32.gmra.mxu2 %vm99_vm3, %v5094_v17  ;;  %vm5174_vm9 = vmand %vm84_vm7, %vm86_vm8  ;;  %v1247_v52 = vld [vmem:[%s1243_s13 + $0x18] sm:$0xff]  ;;  %v1348_v53 = vld [vmem:[%s1347_s10] sm:$0xff]  ;;  %p1436_p5 = scmp.lt.s32.totalorder %s1435_s12, 31  ;;  %s4503_s15 = sshll.u32 %s6815_s9, 5  ;;  %v1197_v12 = vadd.s32 %v5217_v58, %v5246_v8  ;;  %v1198_v19 = vadd.s32 %v5217_v58, %v5276_v16 }
  0x4c   :  { %4348 = vmatpush.msk.msra.mxu3 %vm5174_vm9, %v5013_v49  ;;  %vm5182_vm11 = vmand %vm83_vm10, %vm86_vm8  ;;  %4341 = vmatpush.msk.msra.mxu1 %vm5174_vm9, %v5013_v49  ;;  %v1246_v54 = vld [vmem:[%s1243_s13 + $0x10] sm:$0xff]  ;;  %v1245_v55 = vld [vmem:[%s1243_s13 + $0x8] sm:$0xff]  ;;  %s4454_s16 = sld [smem:[#allocation3 + $0xc]]  ;;  %s1531_s18 = scalar_lea.vmem [#allocation7], %s4503_s15  ;;  %vm1199_vm12 = vcmp.eq.s32.totalorder %v5063_v2, %v1195_v61  ;;  %vm1200_vm0 = vcmp.eq.s32.totalorder %v5063_v2, %v1196_v5 }
  0x4d   :  { %v1244_v56 = vld [vmem:[%s1243_s13] sm:$0xff]  ;;  %s6817_s12 = smov (!%p1436_p5, %s1435_s12), 31  ;;  %v1535_v57 = vld [vmem:[%s1531_s18 + $0x18] sm:$0xff]  ;;  %s1711_s19 = sadd.s32 5, %s5147_s0  ;;  %v1534_v59 = vld [vmem:[%s1531_s18 + $0x10] sm:$0xff]  ;;  %vm1201_vm4 = vcmp.eq.s32.totalorder %v5063_v2, %v1197_v12  ;;  %vm1202_vm7 = vcmp.eq.s32.totalorder %v5063_v2, %v1198_v19 }
  0x4e   :  { %4349 = vmatpush.msk.msra.mxu3 %vm5182_vm11, %v5013_v49  ;;  %4342 = vmatpush.msk.msra.mxu1 %vm5182_vm11, %v5013_v49  ;;  %s4490_s17 = sshll.u32 %s6817_s12, 5  ;;  %v1533_v60 = vld [vmem:[%s1531_s18 + $0x8] sm:$0xff]  ;;  %p1712_p6 = scmp.lt.s32.totalorder %s1711_s19, 31  ;;  %v1532_v3 = vld [vmem:[%s1531_s18] sm:$0xff] }
  0x4f   :  { %4368 = vmatmul.msk.f32.gmra.mxu0 %vm99_vm3, %v5094_v17  ;;  %s5223_s20 = scalar_lea.vmem [#allocation7], %s4490_s17  ;;  %s1619_s22 = sadd.s32 4, %s5147_s0 }
  0x50   :  { %4362 = vmatpush.msk.msrb.mxu3 %vm5174_vm9, %v5013_v49  ;;  %4355 = vmatpush.msk.msrb.mxu1 %vm5174_vm9, %v5013_v49  ;;  %v1443_v62 = vld [vmem:[%s5223_s20 + $0x18] sm:$0xff]  ;;  %v1442_v0 = vld [vmem:[%s5223_s20 + $0x10] sm:$0xff]  ;;  %s6819_s19 = smov (!%p1712_p6, %s1711_s19), 31  ;;  %v1441_v6 = vld [vmem:[%s5223_s20 + $0x8] sm:$0xff]  ;;  %p1620_p7 = scmp.lt.s32.totalorder %s1619_s22, 31 }
  0x51   :  { %s4529_s21 = sshll.u32 %s6819_s19, 5  ;;  %v1440_v14 = vld [vmem:[%s5223_s20] sm:$0xff]  ;;  %s1895_s1 = sadd.s32 7, %s5147_s0 }
  0x52   :  { %4363 = vmatpush.msk.msrb.mxu3 %vm5182_vm11, %v5013_v49  ;;  %4356 = vmatpush.msk.msrb.mxu1 %vm5182_vm11, %v5013_v49  ;;  %v5226_v63 = vstv %s4454_s16  ;;  %s5253_s23 = scalar_lea.vmem [#allocation7], %s4529_s21  ;;  %s6821_s22 = smov (!%p1620_p7, %s1619_s22), 31 }
  0x53   :  { %4388 = vmatmul.msk.f32.vlgmr.msrb.gmra.mxu2 %vm99_vm3, %v5077_v11  ;;  %vm1204_vm13 = vcmp.lt.s32.totalorder %v5060_v1, %v5226_v63  ;;  %vm1205_vm1 = vcmp.lt.s32.totalorder %v5067_v4, %v5226_v63  ;;  %v1719_v9 = vld [vmem:[%s5253_s23 + $0x18] sm:$0xff]  ;;  %s4516_s24 = sshll.u32 %s6821_s22, 5  ;;  %vm1206_vm5 = vcmp.lt.s32.totalorder %v5246_v8, %v5226_v63  ;;  %vm1207_vm8 = vcmp.lt.s32.totalorder %v5276_v16, %v5226_v63  ;;  %v1717_v23 = vld [vmem:[%s5253_s23 + $0x8] sm:$0xff]  ;;  %p1896_p8 = scmp.lt.s32.totalorder %s1895_s1, 31 }
  0x54   :  { %867 = vmatpush.msrb.mxu2 %v852_v31  ;;  %vm1208_vm14 = vmand %vm1199_vm12, %vm1204_vm13  ;;  %s5291_s25 = scalar_lea.vmem [#allocation7], %s4516_s24  ;;  %s1803_s29 = sadd.s32 6, %s5147_s0 }
  0x55   :  { %v5241_v7 = vsel %vm1208_vm14, 1.0, %v5012_v10  ;;  %vm1209_vm2 = vmand %vm1200_vm0, %vm1205_vm1  ;;  %v1627_v21 = vld [vmem:[%s5291_s25 + $0x18] sm:$0xff]  ;;  %v1626_v26 = vld [vmem:[%s5291_s25 + $0x10] sm:$0xff]  ;;  %s6823_s1 = smov (!%p1896_p8, %s1895_s1), 31  ;;  %p1804_p9 = scmp.lt.s32.totalorder %s1803_s29, 31 }
  0x56   :  { %868 = vmatpush.msrb.mxu2 %v851_v32  ;;  %v5265_v15 = vsel %vm1209_vm2, 1.0, %v5012_v10  ;;  %vm1210_vm6 = vmand %vm1201_vm4, %vm1206_vm5  ;;  %s4555_s28 = sshll.u32 %s6823_s1, 5  ;;  %v1625_v30 = vld [vmem:[%s5291_s25 + $0x8] sm:$0xff]  ;;  %s2079_s6 = sadd.s32 9, %s5147_s0 }
  0x57   :  { %4381 = vmatmul.msk.f32.vlgmr.msrb.gmra.mxu0 %vm99_vm3, %v5077_v11  ;;  %v5295_v22 = vsel %vm1210_vm6, 1.0, %v5012_v10  ;;  %vm1211_vm10 = vmand %vm1202_vm7, %vm1207_vm8  ;;  %s5337_s2 = scalar_lea.vmem [#allocation7], %s4555_s28  ;;  %s6825_s29 = smov (!%p1804_p9, %s1803_s29), 31 }
  0x58   :  { %799 = vmatpush.msrb.mxu0 %v784_v33  ;;  %v5313_v27 = vsel %vm1211_vm10, 1.0, %v5012_v10  ;;  %v1716_v10 = vld [vmem:[%s5253_s23] sm:$0xff]  ;;  %v1903_v31 = vld [vmem:[%s5337_s2 + $0x18] sm:$0xff]  ;;  %s4542_s30 = sshll.u32 %s6825_s29, 5  ;;  %p2080_p10 = scmp.lt.s32.totalorder %s2079_s6, 31 }
  0x59   :  { %s5362_s5 = scalar_lea.vmem [#allocation7], %s4542_s30  ;;  %v1900_v43 = vld [vmem:[%s5337_s2] sm:$0xff]  ;;  %s1987_s8 = sadd.s32 8, %s5147_s0 }
  0x5a   :  { %800 = vmatpush.msrb.mxu0 %v783_v34  ;;  %v1624_v34 = vld [vmem:[%s5291_s25] sm:$0xff]  ;;  %s6827_s6 = smov (!%p2080_p10, %s2079_s6), 31  ;;  %v1809_v46 = vld [vmem:[%s5362_s5 + $0x8] sm:$0xff]  ;;  %p1988_p11 = scmp.lt.s32.totalorder %s1987_s8, 31 }
  0x5b   :  { %4389 = vmatmul.msk.f32.gmra.mxu2 %vm99_vm3, %v5094_v17  ;;  %s4581_s7 = sshll.u32 %s6827_s6, 5  ;;  %s2263_s12 = sadd.s32 11, %s5147_s0 }
  0x5c   :  { %s5399_s9 = scalar_lea.vmem [#allocation7], %s4581_s7  ;;  %s6829_s8 = smov (!%p1988_p11, %s1987_s8), 31 }
  0x5d   :  { %s4568_s10 = sshll.u32 %s6829_s8, 5  ;;  %s4452_s13 = sld [smem:[#allocation3 + $0xa]]  ;;  %v2085_v58 = vld [vmem:[%s5399_s9 + $0x8] sm:$0xff]  ;;  %v2084_v63 = vld [vmem:[%s5399_s9] sm:$0xff] }
  0x5e   :  { %s5424_s11 = scalar_lea.vmem [#allocation7], %s4568_s10  ;;  %p2264_p12 = scmp.lt.s32.totalorder %s2263_s12, 31 }
  0x5f   :  { %4382 = vmatmul.msk.f32.gmra.mxu0 %vm99_vm3, %v5094_v17  ;;  %s4455_s14 = sld [smem:[#allocation3 + $0xd]]  ;;  %v1994_v61 = vld [vmem:[%s5424_s11 + $0x10] sm:$0xff]  ;;  %s2171_s16 = sadd.s32 10, %s5147_s0 }
  0x60   :  { %s6831_s12 = smov (!%p2264_p12, %s2263_s12), 31  ;;  %p2172_p13 = scmp.lt.s32.totalorder %s2171_s16, 31 }
  0x61   :  { %s4607_s15 = sshll.u32 %s6831_s12, 5  ;;  %s5529_s19 = sld [smem:[#allocation3 + $0x3]] }
  0x62   :  { %s5468_s17 = scalar_lea.vmem [#allocation7], %s4607_s15  ;;  %s6833_s16 = smov (!%p2172_p13, %s2171_s16), 31 }
  0x63   :  { %4402 = vmatmul.msk.f32.vlgmr.msra.gmra.mxu2 %vm99_vm3, %v5077_v11  ;;  %s4594_s18 = sshll.u32 %s6833_s16, 5  ;;  %s2447_s21 = sadd.s32 13, %s5147_s0 }
  0x64   :  { %1003 = vmatpush.msra.mxu2 %v988_v35  ;;  %v1902_v35 = vld [vmem:[%s5337_s2 + $0x10] sm:$0xff]  ;;  %s5537_s20 = scalar_lea.vmem [#allocation7], %s4594_s18  ;;  %p2448_p1 = scmp.lt.s32.totalorder %s2447_s21, 31 }
  0x65   :  { %v1226_v5 = vstv %s4455_s14  ;;  %s2355_s24 = sadd.s32 12, %s5147_s0  ;;  %s2539_s12 = sadd.s32 14, %s5147_s0 }
  0x66   :  { %1004 = vmatpush.msra.mxu2 %v987_v36  ;;  %s6835_s21 = smov (!%p2448_p1, %s2447_s21), 31  ;;  %p2356_p3 = scmp.lt.s32.totalorder %s2355_s24, 31 }
  0x67   :  { %4395 = vmatmul.msk.f32.vlgmr.msra.gmra.mxu0 %vm99_vm3, %v5077_v11  ;;  %p158_p0 = scmp.gt.s32.totalorder %s5529_s19, 0  ;;  %p225_p2 = scmp.gt.s32.totalorder %s5529_s19, 1 }
  0x68   :  { %935 = vmatpush.msra.mxu0 %v920_v37  ;;  %s4633_s25 = sshll.u32 %s6835_s21, 5  ;;  %p293_p4 = scmp.gt.s32.totalorder %s5529_s19, 2 }
  0x69   :  { %s159_s22 = scalar_select %p158_p0, 1, 0 }
  0x6a   :  { %936 = vmatpush.msra.mxu0 %v919_v38  ;;  %v1811_v38 = vld [vmem:[%s5362_s5 + $0x18] sm:$0xff]  ;;  %s226_s1 = scalar_select %p225_p2, 1, 0 }
  0x6b   :  { %4403 = vmatmul.msk.f32.gmra.mxu2 %vm99_vm3, %v5094_v17  ;;  %s5591_s29 = scalar_lea.vmem [#allocation7], %s4633_s25  ;;  %s6837_s24 = smov (!%p2356_p3, %s2355_s24), 31 }
  0x6c   :  { %s227_s28 = scvt.s32.f32 %s226_s1  ;;  %s4620_s30 = sshll.u32 %s6837_s24, 5 }
  0x6d   :  { %p361_p5 = scmp.gt.s32.totalorder %s5529_s19, 3  ;;  %s5637_s6 = scalar_lea.vmem [#allocation7], %s4620_s30 }
  0x6e   :  { %p429_p6 = scmp.gt.s32.totalorder %s5529_s19, 4  ;;  %p497_p8 = scmp.gt.s32.totalorder %s5529_s19, 5 }
  0x6f   :  { %4396 = vmatmul.msk.f32.gmra.mxu0 %vm99_vm3, %v5094_v17  ;;  %s362_s7 = scalar_select %p361_p5, 1, 0 }
  0x70   :  { %s430_s10 = scalar_select %p429_p6, 1, 0 }
  0x71   :  { %s363_s8 = scvt.s32.f32 %s362_s7  ;;  %p2540_p9 = scmp.lt.s32.totalorder %s2539_s12, 31 }
  0x72   :  { %s498_s14 = scalar_select %p497_p8, 1, 0 }
  0x73   :  { %4416 = vmatmul.msk.f32.vlgmr.msrb.gmra.mxu2 %vm99_vm3, %v5077_v11  ;;  %p565_p10 = scmp.gt.s32.totalorder %s5529_s19, 6  ;;  %s6841_s12 = smov (!%p2540_p9, %s2539_s12), 31 }
  0x74   :  { %1139 = vmatpush.msrb.mxu2 %v1124_v39  ;;  %v1901_v39 = vld [vmem:[%s5337_s2 + $0x8] sm:$0xff]  ;;  %s5607_s2 = scalar_select %p293_p4, 1, 0 }
  0x75   :  { %s499_s15 = scvt.s32.f32 %s498_s14  ;;  %s4646_s18 = sshll.u32 %s6841_s12, 5 }
  0x76   :  { %1140 = vmatpush.msrb.mxu2 %v1123_v40  ;;  %p633_p11 = scmp.gt.s32.totalorder %s5529_s19, 7  ;;  %s5726_s21 = scalar_lea.vmem [#allocation7], %s4646_s18 }
  0x77   :  { %4409 = vmatmul.msk.f32.vlgmr.msrb.gmra.mxu0 %vm99_vm3, %v5077_v11  ;;  %s2815_s24 = sadd.s32 17, %s5147_s0  ;;  %p701_p12 = scmp.gt.s32.totalorder %s5529_s19, 8 }
  0x78   :  { %1071 = vmatpush.msrb.mxu0 %v1056_v41  ;;  %p2816_p13 = scmp.lt.s32.totalorder %s2815_s24, 31  ;;  %p769_p0 = scmp.gt.s32.totalorder %s5529_s19, 9 }
  0x79   :  { %s702_s25 = scalar_select %p701_p12, 1, 0 }
  0x7a   :  { %1072 = vmatpush.msrb.mxu0 %v1055_v42  ;;  %v1810_v42 = vld [vmem:[%s5362_s5 + $0x10] sm:$0xff]  ;;  %s6843_s24 = smov (!%p2816_p13, %s2815_s24), 31  ;;  %p837_p2 = scmp.gt.s32.totalorder %s5529_s19, 10 }
  0x7b   :  { %4417 = vmatmul.msk.f32.gmra.mxu2 %vm99_vm3, %v5094_v17  ;;  %s703_s1 = scvt.s32.f32 %s702_s25  ;;  %p905_p3 = scmp.gt.s32.totalorder %s5529_s19, 11 }
  0x7c   :  { %s2999_s12 = sadd.s32 19, %s5147_s0  ;;  %p973_p4 = scmp.gt.s32.totalorder %s5529_s19, 12 }
  0x7d   :  { %p3000_p5 = scmp.lt.s32.totalorder %s2999_s12, 31  ;;  %p1041_p6 = scmp.gt.s32.totalorder %s5529_s19, 13 }
  0x7e   :  { %p1109_p8 = scmp.gt.s32.totalorder %s5529_s19, 14  ;;  %p1177_p9 = scmp.gt.s32.totalorder %s5529_s19, 15 }
  0x7f   :  { %4410 = vmatmul.msk.f32.gmra.mxu0 %vm99_vm3, %v5094_v17  ;;  %s6847_s12 = smov (!%p3000_p5, %s2999_s12), 31 }
  0x83   :  { %4430 = vmatmul.msk.f32.vlgmr.msra.gmra.mxu2 %vm99_vm3, %v5077_v11 }
  0x84   :  { %1364 = vmatpush.msra.mxu2 %v1351_v45 }
  0x86   :  { %1365 = vmatpush.msra.mxu2 %v1350_v47  ;;  %v2087_v47 = vld [vmem:[%s5399_s9 + $0x18] sm:$0xff] }
  0x87   :  { %4423 = vmatmul.msk.f32.vlgmr.msra.gmra.mxu0 %vm99_vm3, %v5077_v11 }
  0x88   :  { %1366 = vmatpush.msra.mxu2 %v1349_v50  ;;  %1273 = vmatpush.msra.mxu0 %v1247_v52 }
  0x8a   :  { %1367 = vmatpush.msra.mxu2 %v1348_v53  ;;  %1274 = vmatpush.msra.mxu0 %v1246_v54  ;;  %v1808_v53 = vld [vmem:[%s5362_s5] sm:$0xff]  ;;  %v2086_v54 = vld [vmem:[%s5399_s9 + $0x10] sm:$0xff]  ;;  %s295_s5 = scvt.s32.f32 %s5607_s2  ;;  %s2631_s9 = sadd.s32 15, %s5147_s0 }
  0x8b   :  { %4431 = vmatmul.msk.f32.gmra.mxu2 %vm99_vm3, %v5094_v17  ;;  %p2632_p7 = scmp.lt.s32.totalorder %s2631_s9, 31 }
  0x8c   :  { %1275 = vmatpush.msra.mxu0 %v1245_v55  ;;  %s770_s2 = scalar_select %p769_p0, 1, 0 }
  0x8d   :  { %s6839_s9 = smov (!%p2632_p7, %s2631_s9), 31 }
  0x8e   :  { %1276 = vmatpush.msra.mxu0 %v1244_v56  ;;  %s771_s30 = scvt.s32.f32 %s770_s2 }
  0x8f   :  { %4424 = vmatmul.msk.f32.gmra.mxu0 %vm99_vm3, %v5094_v17 }
  0x93   :  { %4444 = vmatmul.msk.f32.vlgmr.msrb.gmra.mxu2 %vm99_vm3, %v5077_v11 }
  0x94   :  { %1548 = vmatpush.msrb.mxu2 %v1535_v57  ;;  %v1995_v57 = vld [vmem:[%s5424_s11 + $0x18] sm:$0xff] }
  0x96   :  { %1549 = vmatpush.msrb.mxu2 %v1534_v59 }
  0x97   :  { %4437 = vmatmul.msk.f32.vlgmr.msrb.gmra.mxu0 %vm99_vm3, %v5077_v11 }
  0x98   :  { %1550 = vmatpush.msrb.mxu2 %v1533_v60  ;;  %1456 = vmatpush.msrb.mxu0 %v1443_v62  ;;  %v1220_v62 = vstv %s4452_s13  ;;  %s4659_s13 = sshll.u32 %s6839_s9, 5 }
  0x99   :  { %v1221_v48 = vadd.s32 %v1220_v62, %v5063_v2  ;;  %v2452_v62 = vld [vmem:[%s5591_s29] sm:$0xff]  ;;  %s5680_s16 = scalar_lea.vmem [#allocation7], %s4659_s13 }
  0x9a   :  { %1457 = vmatpush.msrb.mxu0 %v1442_v0  ;;  %1551 = vmatpush.msrb.mxu2 %v1532_v3  ;;  %s974_s13 = scalar_select %p973_p4, 1, 0 }
  0x9b   :  { %4445 = vmatmul.msk.f32.gmra.mxu2 %vm99_vm3, %v5094_v17  ;;  %vm1224_vm12 = vcmp.eq.s32.totalorder %v5246_v8, %v1221_v48  ;;  %vm1223_vm14 = vcmp.eq.s32.totalorder %v5067_v4, %v1221_v48  ;;  %vm1222_vm1 = vcmp.eq.s32.totalorder %v5060_v1, %v1221_v48 }
  0x9c   :  { %1458 = vmatpush.msrb.mxu0 %v1441_v6  ;;  %v1993_v6 = vld [vmem:[%s5424_s11 + $0x8] sm:$0xff]  ;;  %s975_s14 = scvt.s32.f32 %s974_s13 }
  0x9e   :  { %1459 = vmatpush.msrb.mxu0 %v1440_v14 }
  0x9f   :  { %4438 = vmatmul.msk.f32.gmra.mxu0 %vm99_vm3, %v5094_v17  ;;  %v1718_v17 = vld [vmem:[%s5253_s23 + $0x10] sm:$0xff]  ;;  %s160_s23 = scvt.s32.f32 %s159_s22 }
  0xa0   :  { %s634_s22 = scalar_select %p633_p11, 1, 0 }
  0xa3   :  { %4478 = vmatmul.msk.f32.vlgmr.msra.gmra.mxu2 %vm1248_vm15, %v5241_v7 }
  0xa4   :  { %1732 = vmatpush.msra.mxu2 %v1719_v9  ;;  %v123_v11 = vpop.f32.mrf.mxu0  ;;  %v2271_v9 = vld [vmem:[%s5468_s17 + $0x18] sm:$0xff] }
  0xa5   :  { %4343 = vmatmul.msk.f32.vlgmr.msra.gmra.mxu1 %vm99_vm3, %v123_v11 }
  0xa6   :  { %v190_v13 = vpop.f32.mrf.mxu2  ;;  %4369 = vmatpush.msk.msra.mxu1 %vm5174_vm9, %v5013_v49  ;;  %1733 = vmatpush.msra.mxu2 %v1718_v17 }
  0xa7   :  { %4350 = vmatmul.msk.f32.vlgmr.msra.gmra.mxu3 %vm99_vm3, %v190_v13  ;;  %4465 = vmatmul.msk.f32.vlgmr.msra.gmra.mxu0 %vm1248_vm15, %v5241_v7  ;;  %v1992_v13 = vld [vmem:[%s5424_s11] sm:$0xff]  ;;  %s431_s11 = scvt.s32.f32 %s430_s10 }
  0xa8   :  { %4376 = vmatpush.msk.msra.mxu3 %vm5174_vm9, %v5013_v49  ;;  %4370 = vmatpush.msk.msra.mxu1 %vm5182_vm11, %v5013_v49  ;;  %s906_s10 = scalar_select %p905_p3, 1, 0 }
  0xa9   :  { %1640 = vmatpush.msra.mxu0 %v1627_v21  ;;  %1734 = vmatpush.msra.mxu2 %v1717_v23  ;;  %v2178_v23 = vld [vmem:[%s5537_s20 + $0x10] sm:$0xff] }
  0xaa   :  { %4377 = vmatpush.msk.msra.mxu3 %vm5182_vm11, %v5013_v49 }
  0xab   :  { %4479 = vmatmul.msk.f32.gmra.mxu2 %vm1248_vm15, %v5265_v15  ;;  %1641 = vmatpush.msra.mxu0 %v1626_v26 }
  0xac   :  { %v126_v18 = vpop.f32.mrf.mxu0  ;;  %1735 = vmatpush.msra.mxu2 %v1716_v10  ;;  %v2177_v10 = vld [vmem:[%s5537_s20 + $0x8] sm:$0xff] }
  0xad   :  { %4344 = vmatmul.msk.f32.gmra.mxu1 %vm99_vm3, %v126_v18  ;;  %1642 = vmatpush.msra.mxu0 %v1625_v30  ;;  %v2179_v18 = vld [vmem:[%s5537_s20 + $0x18] sm:$0xff] }
  0xae   :  { %v193_v20 = vpop.f32.mrf.mxu2 }
  0xaf   :  { %4351 = vmatmul.msk.f32.gmra.mxu3 %vm99_vm3, %v193_v20  ;;  %4466 = vmatmul.msk.f32.gmra.mxu0 %vm1248_vm15, %v5265_v15  ;;  %v2269_v20 = vld [vmem:[%s5468_s17 + $0x8] sm:$0xff] }
  0xb0   :  { %1643 = vmatpush.msra.mxu0 %v1624_v34  ;;  %v2176_v34 = vld [vmem:[%s5537_s20] sm:$0xff] }
  0xb3   :  { %4480 = vmatmul.msk.f32.gmra.mxu2 %vm1248_vm15, %v5295_v22 }
  0xb4   :  { %v258_v24 = vpop.f32.mrf.mxu0 }
  0xb5   :  { %4357 = vmatmul.msk.f32.vlgmr.msrb.gmra.mxu1 %vm99_vm3, %v258_v24 }
  0xb6   :  { %v326_v25 = vpop.f32.mrf.mxu2  ;;  %4383 = vmatpush.msk.msrb.mxu1 %vm5174_vm9, %v5013_v49 }
  0xb7   :  { %4364 = vmatmul.msk.f32.vlgmr.msrb.gmra.mxu3 %vm99_vm3, %v326_v25  ;;  %4467 = vmatmul.msk.f32.gmra.mxu0 %vm1248_vm15, %v5295_v22  ;;  %v2268_v25 = vld [vmem:[%s5468_s17] sm:$0xff] }
  0xb8   :  { %4390 = vmatpush.msk.msrb.mxu3 %vm5174_vm9, %v5013_v49  ;;  %4384 = vmatpush.msk.msrb.mxu1 %vm5182_vm11, %v5013_v49 }
  0xba   :  { %4391 = vmatpush.msk.msrb.mxu3 %vm5182_vm11, %v5013_v49 }
  0xbb   :  { %4481 = vmatmul.msk.f32.gmra.mxu2 %vm1248_vm15, %v5313_v27 }
  0xbc   :  { %v261_v28 = vpop.f32.mrf.mxu0 }
  0xbd   :  { %4358 = vmatmul.msk.f32.gmra.mxu1 %vm99_vm3, %v261_v28  ;;  %v161_v28 = vstv %s160_s23  ;;  %s635_s23 = scvt.s32.f32 %s634_s22 }
  0xbe   :  { %v329_v29 = vpop.f32.mrf.mxu2 }
  0xbf   :  { %4365 = vmatmul.msk.f32.gmra.mxu3 %vm99_vm3, %v329_v29  ;;  %4468 = vmatmul.msk.f32.gmra.mxu0 %vm1248_vm15, %v5313_v27 }
  0xc3   :  { %4504 = vmatmul.msk.f32.vlgmr.msrb.gmra.mxu2 %vm1248_vm15, %v5241_v7 }
  0xc4   :  { %1916 = vmatpush.msrb.mxu2 %v1903_v31  ;;  %v394_v32 = vpop.f32.mrf.mxu0 }
  0xc5   :  { %4371 = vmatmul.msk.f32.vlgmr.msra.gmra.mxu1 %vm99_vm3, %v394_v32  ;;  %v2455_v32 = vld [vmem:[%s5591_s29 + $0x18] sm:$0xff] }
  0xc6   :  { %v462_v33 = vpop.f32.mrf.mxu2  ;;  %4397 = vmatpush.msk.msra.mxu1 %vm5174_vm9, %v5013_v49  ;;  %1917 = vmatpush.msrb.mxu2 %v1902_v35  ;;  %v228_v35 = vstv %s227_s28  ;;  %s2723_s28 = sadd.s32 16, %s5147_s0 }
  0xc7   :  { %4378 = vmatmul.msk.f32.vlgmr.msra.gmra.mxu3 %vm99_vm3, %v462_v33  ;;  %4491 = vmatmul.msk.f32.vlgmr.msrb.gmra.mxu0 %vm1248_vm15, %v5241_v7  ;;  %p2724_p1 = scmp.lt.s32.totalorder %s2723_s28, 31 }
  0xc8   :  { %4404 = vmatpush.msk.msra.mxu3 %vm5174_vm9, %v5013_v49  ;;  %4398 = vmatpush.msk.msra.mxu1 %vm5182_vm11, %v5013_v49 }
  0xc9   :  { %1824 = vmatpush.msrb.mxu0 %v1811_v38  ;;  %1918 = vmatpush.msrb.mxu2 %v1901_v39  ;;  %s6845_s28 = smov (!%p2724_p1, %s2723_s28), 31 }
  0xca   :  { %4405 = vmatpush.msk.msra.mxu3 %vm5182_vm11, %v5013_v49  ;;  %s4672_s7 = sshll.u32 %s6845_s28, 5 }
  0xcb   :  { %4505 = vmatmul.msk.f32.gmra.mxu2 %vm1248_vm15, %v5265_v15  ;;  %1825 = vmatpush.msrb.mxu0 %v1810_v42  ;;  %s5815_s9 = scalar_lea.vmem [#allocation7], %s4672_s7 }
  0xcc   :  { %v397_v36 = vpop.f32.mrf.mxu0  ;;  %1919 = vmatpush.msrb.mxu2 %v1900_v43  ;;  %v2363_v43 = vld [vmem:[%s5637_s6 + $0x18] sm:$0xff] }
  0xcd   :  { %4372 = vmatmul.msk.f32.gmra.mxu1 %vm99_vm3, %v397_v36  ;;  %1826 = vmatpush.msrb.mxu0 %v1809_v46 }
  0xce   :  { %v465_v37 = vpop.f32.mrf.mxu2 }
  0xcf   :  { %4379 = vmatmul.msk.f32.gmra.mxu3 %vm99_vm3, %v465_v37  ;;  %4492 = vmatmul.msk.f32.gmra.mxu0 %vm1248_vm15, %v5265_v15 }
  0xd0   :  { %1827 = vmatpush.msrb.mxu0 %v1808_v53  ;;  %v2453_v53 = vld [vmem:[%s5591_s29 + $0x8] sm:$0xff] }
  0xd3   :  { %4506 = vmatmul.msk.f32.gmra.mxu2 %vm1248_vm15, %v5295_v22 }
  0xd4   :  { %v530_v40 = vpop.f32.mrf.mxu0 }
  0xd5   :  { %4385 = vmatmul.msk.f32.vlgmr.msrb.gmra.mxu1 %vm99_vm3, %v530_v40 }
  0xd6   :  { %v598_v41 = vpop.f32.mrf.mxu2  ;;  %4411 = vmatpush.msk.msrb.mxu1 %vm5174_vm9, %v5013_v49 }
  0xd7   :  { %4392 = vmatmul.msk.f32.vlgmr.msrb.gmra.mxu3 %vm99_vm3, %v598_v41  ;;  %4493 = vmatmul.msk.f32.gmra.mxu0 %vm1248_vm15, %v5295_v22  ;;  %v2454_v41 = vld [vmem:[%s5591_s29 + $0x10] sm:$0xff]  ;;  %s4685_s29 = sshll.u32 %s6843_s24, 5  ;;  %s5897_s24 = sld [smem:[#allocation3 + $0xb]] }
  0xd8   :  { %4418 = vmatpush.msk.msrb.mxu3 %vm5174_vm9, %v5013_v49  ;;  %4412 = vmatpush.msk.msrb.mxu1 %vm5182_vm11, %v5013_v49 }
  0xda   :  { %4419 = vmatpush.msk.msrb.mxu3 %vm5182_vm11, %v5013_v49 }
  0xdb   :  { %4507 = vmatmul.msk.f32.gmra.mxu2 %vm1248_vm15, %v5313_v27 }
  0xdc   :  { %v533_v44 = vpop.f32.mrf.mxu0 }
  0xdd   :  { %4386 = vmatmul.msk.f32.gmra.mxu1 %vm99_vm3, %v533_v44  ;;  %v296_v44 = vstv %s295_s5  ;;  %s5769_s5 = scalar_lea.vmem [#allocation7], %s4685_s29  ;;  %s3183_s29 = sadd.s32 21, %s5147_s0 }
  0xde   :  { %v601_v45 = vpop.f32.mrf.mxu2  ;;  %p3184_p11 = scmp.lt.s32.totalorder %s3183_s29, 31  ;;  %p1422_p12 = scmp.gt.s32.totalorder %s5897_s24, 1 }
  0xdf   :  { %4393 = vmatmul.msk.f32.gmra.mxu3 %vm99_vm3, %v601_v45  ;;  %4494 = vmatmul.msk.f32.gmra.mxu0 %vm1248_vm15, %v5313_v27  ;;  %p1514_p0 = scmp.gt.s32.totalorder %s5897_s24, 2  ;;  %p1698_p4 = scmp.gt.s32.totalorder %s5897_s24, 4 }
  0xe0   :  { %s6851_s29 = smov (!%p3184_p11, %s3183_s29), 31 }
  0xe3   :  { %4530 = vmatmul.msk.f32.vlgmr.msra.gmra.mxu2 %vm1248_vm15, %v5241_v7 }
  0xe4   :  { %2100 = vmatpush.msra.mxu2 %v2087_v47  ;;  %v666_v50 = vpop.f32.mrf.mxu0 }
  0xe5   :  { %4399 = vmatmul.msk.f32.vlgmr.msra.gmra.mxu1 %vm99_vm3, %v666_v50 }
  0xe6   :  { %v734_v52 = vpop.f32.mrf.mxu2  ;;  %4425 = vmatpush.msk.msra.mxu1 %vm5174_vm9, %v5013_v49  ;;  %2101 = vmatpush.msra.mxu2 %v2086_v54 }
  0xe7   :  { %4406 = vmatmul.msk.f32.vlgmr.msra.gmra.mxu3 %vm99_vm3, %v734_v52  ;;  %4517 = vmatmul.msk.f32.vlgmr.msra.gmra.mxu0 %vm1248_vm15, %v5241_v7 }
  0xe8   :  { %4432 = vmatpush.msk.msra.mxu3 %vm5174_vm9, %v5013_v49  ;;  %4426 = vmatpush.msk.msra.mxu1 %vm5182_vm11, %v5013_v49 }
  0xe9   :  { %2008 = vmatpush.msra.mxu0 %v1995_v57  ;;  %2102 = vmatpush.msra.mxu2 %v2085_v58 }
  0xea   :  { %4433 = vmatpush.msk.msra.mxu3 %vm5182_vm11, %v5013_v49 }
  0xeb   :  { %4531 = vmatmul.msk.f32.gmra.mxu2 %vm1248_vm15, %v5265_v15  ;;  %2009 = vmatpush.msra.mxu0 %v1994_v61 }
  0xec   :  { %v669_v55 = vpop.f32.mrf.mxu0  ;;  %2103 = vmatpush.msra.mxu2 %v2084_v63 }
  0xed   :  { %4400 = vmatmul.msk.f32.gmra.mxu1 %vm99_vm3, %v669_v55  ;;  %2010 = vmatpush.msra.mxu0 %v1993_v6  ;;  %v2362_v55 = vld [vmem:[%s5637_s6 + $0x10] sm:$0xff] }
  0xee   :  { %v737_v56 = vpop.f32.mrf.mxu2 }
  0xef   :  { %4407 = vmatmul.msk.f32.gmra.mxu3 %vm99_vm3, %v737_v56  ;;  %4518 = vmatmul.msk.f32.gmra.mxu0 %vm1248_vm15, %v5265_v15  ;;  %v364_v56 = vstv %s363_s8 }
  0xf0   :  { %2011 = vmatpush.msra.mxu0 %v1992_v13  ;;  %v2360_v13 = vld [vmem:[%s5637_s6] sm:$0xff] }
  0xf3   :  { %4532 = vmatmul.msk.f32.gmra.mxu2 %vm1248_vm15, %v5295_v22 }
  0xf4   :  { %v802_v59 = vpop.f32.mrf.mxu0 }
  0xf5   :  { %4413 = vmatmul.msk.f32.vlgmr.msrb.gmra.mxu1 %vm99_vm3, %v802_v59 }
  0xf6   :  { %v870_v60 = vpop.f32.mrf.mxu2  ;;  %4439 = vmatpush.msk.msrb.mxu1 %vm5174_vm9, %v5013_v49 }
  0xf7   :  { %4420 = vmatmul.msk.f32.vlgmr.msrb.gmra.mxu3 %vm99_vm3, %v870_v60  ;;  %4519 = vmatmul.msk.f32.gmra.mxu0 %vm1248_vm15, %v5295_v22 }
  0xf8   :  { %4446 = vmatpush.msk.msrb.mxu3 %vm5174_vm9, %v5013_v49  ;;  %4440 = vmatpush.msk.msrb.mxu1 %vm5182_vm11, %v5013_v49  ;;  %vm5461_vm9 = vcmp.lt.s32.totalorder %v5063_v2, %v1226_v5 }
  0xf9   :  { %vm5484_vm0 = vmand %vm1224_vm12, %vm5461_vm9 }
  0xfa   :  { %4447 = vmatpush.msk.msrb.mxu3 %vm5182_vm11, %v5013_v49  ;;  %vm1225_vm11 = vcmp.eq.s32.totalorder %v5276_v16, %v1221_v48  ;;  %vm5501_vm2 = vmand %vm1223_vm14, %vm5461_vm9  ;;  %v2270_v16 = vld [vmem:[%s5468_s17 + $0x10] sm:$0xff]  ;;  %v432_v48 = vstv %s431_s11  ;;  %s5696_s17 = scalar_select %p565_p10, 1, 0 }
  0xfb   :  { %4533 = vmatmul.msk.f32.gmra.mxu2 %vm1248_vm15, %v5313_v27  ;;  %vm5474_vm13 = vmand %vm1225_vm11, %vm5461_vm9  ;;  %s907_s11 = scvt.s32.f32 %s906_s10  ;;  %p1331_p10 = scmp.gt.s32.totalorder %s5897_s24, 0 }
  0xfc   :  { %v805_v0 = vpop.f32.mrf.mxu0  ;;  %vm5514_vm4 = vmand %vm1222_vm1, %vm5461_vm9  ;;  %s567_s20 = scvt.s32.f32 %s5696_s17 }
  0xfd   :  { %4414 = vmatmul.msk.f32.gmra.mxu1 %vm99_vm3, %v805_v0  ;;  %v2361_v0 = vld [vmem:[%s5637_s6 + $0x8] sm:$0xff]  ;;  %s5785_s6 = scalar_select %p837_p2, 1, 0 }
  0xfe   :  { %v873_v3 = vpop.f32.mrf.mxu2  ;;  %s1042_s17 = scalar_select %p1041_p6, 1, 0 }
  0xff   :  { %4421 = vmatmul.msk.f32.gmra.mxu3 %vm99_vm3, %v873_v3  ;;  %4520 = vmatmul.msk.f32.gmra.mxu0 %vm1248_vm15, %v5313_v27  ;;  %s839_s8 = scvt.s32.f32 %s5785_s6  ;;  %p1606_p2 = scmp.gt.s32.totalorder %s5897_s24, 3 }
 0x100   :  { %s1043_s18 = scvt.s32.f32 %s1042_s17  ;;  %p1790_p6 = scmp.gt.s32.totalorder %s5897_s24, 5 }
 0x101   :  { %s1332_s19 = scalar_select %p1331_p10, 1, 0 }
 0x102   :  { %s1423_s6 = scalar_select %p1422_p12, 1, 0 }
 0x103   :  { %4556 = vmatmul.msk.f32.vlgmr.msrb.gmra.mxu2 %vm1248_vm15, %v5241_v7  ;;  %s1333_s2 = scvt.s32.f32 %s1332_s19  ;;  %p1974_p10 = scmp.gt.s32.totalorder %s5897_s24, 7 }
 0x104   :  { %2284 = vmatpush.msrb.mxu2 %v2271_v9  ;;  %v938_v11 = vpop.f32.mrf.mxu0  ;;  %s1424_s7 = scvt.s32.f32 %s1423_s6  ;;  %s3735_s6 = sadd.s32 27, %s5147_s0 }
 0x105   :  { %4427 = vmatmul.msk.f32.vlgmr.msra.gmra.mxu1 %vm99_vm3, %v938_v11  ;;  %v2639_v11 = vld [vmem:[%s5680_s16 + $0x18] sm:$0xff]  ;;  %p2066_p12 = scmp.gt.s32.totalorder %s5897_s24, 8 }
 0x106   :  { %v1006_v12 = vpop.f32.mrf.mxu2  ;;  %4469 = vmatpush.msk.msra.mxu1 %vm5474_vm13, %v5013_v49  ;;  %2285 = vmatpush.msrb.mxu2 %v2270_v16 }
 0x107   :  { %4434 = vmatmul.msk.f32.vlgmr.msra.gmra.mxu3 %vm99_vm3, %v1006_v12  ;;  %4543 = vmatmul.msk.f32.vlgmr.msrb.gmra.mxu0 %vm1248_vm15, %v5241_v7 }
 0x108   :  { %4482 = vmatpush.msk.msra.mxu3 %vm5474_vm13, %v5013_v49  ;;  %4470 = vmatpush.msk.msra.mxu1 %vm5484_vm0, %v5013_v49 }
 0x109   :  { %2192 = vmatpush.msrb.mxu0 %v2179_v18  ;;  %2286 = vmatpush.msrb.mxu2 %v2269_v20 }
 0x10a   :  { %4483 = vmatpush.msk.msra.mxu3 %vm5484_vm0, %v5013_v49  ;;  %4471 = vmatpush.msk.msra.mxu1 %vm5501_vm2, %v5013_v49 }
 0x10b   :  { %4557 = vmatmul.msk.f32.gmra.mxu2 %vm1248_vm15, %v5265_v15  ;;  %2193 = vmatpush.msrb.mxu0 %v2178_v23 }
 0x10c   :  { %4484 = vmatpush.msk.msra.mxu3 %vm5501_vm2, %v5013_v49  ;;  %v941_v14 = vpop.f32.mrf.mxu0  ;;  %4472 = vmatpush.msk.msra.mxu1 %vm5514_vm4, %v5013_v49 }
 0x10d   :  { %4428 = vmatmul.msk.f32.gmra.mxu1 %vm99_vm3, %v941_v14  ;;  %2287 = vmatpush.msrb.mxu2 %v2268_v25  ;;  %v500_v14 = vstv %s499_s15  ;;  %v568_v25 = vstv %s567_s20  ;;  %s2907_s15 = sadd.s32 18, %s5147_s0 }
 0x10e   :  { %v1009_v17 = vpop.f32.mrf.mxu2  ;;  %4485 = vmatpush.msk.msra.mxu3 %vm5514_vm4, %v5013_v49  ;;  %2194 = vmatpush.msrb.mxu0 %v2177_v10  ;;  %p2908_p7 = scmp.lt.s32.totalorder %s2907_s15, 31 }
 0x10f   :  { %4435 = vmatmul.msk.f32.gmra.mxu3 %vm99_vm3, %v1009_v17  ;;  %4544 = vmatmul.msk.f32.gmra.mxu0 %vm1248_vm15, %v5265_v15 }
 0x110   :  { %2195 = vmatpush.msrb.mxu0 %v2176_v34  ;;  %v636_v34 = vstv %s635_s23  ;;  %s6849_s15 = smov (!%p2908_p7, %s2907_s15), 31 }
 0x111   :  { %s4698_s22 = sshll.u32 %s6849_s15, 5 }
 0x112   :  { %s5906_s25 = scalar_lea.vmem [#allocation7], %s4698_s22  ;;  %s3551_s22 = sadd.s32 25, %s5147_s0 }
 0x113   :  { %4558 = vmatmul.msk.f32.gmra.mxu2 %vm1248_vm15, %v5295_v22  ;;  %p3552_p5 = scmp.lt.s32.totalorder %s3551_s22, 31 }
 0x114   :  { %v1074_v19 = vpop.f32.mrf.mxu0 }
 0x115   :  { %4441 = vmatmul.msk.f32.vlgmr.msrb.gmra.mxu1 %vm99_vm3, %v1074_v19  ;;  %s6859_s22 = smov (!%p3552_p5, %s3551_s22), 31 }
 0x116   :  { %v1142_v21 = vpop.f32.mrf.mxu2  ;;  %4495 = vmatpush.msk.msrb.mxu1 %vm5474_vm13, %v5013_v49 }
 0x117   :  { %4448 = vmatmul.msk.f32.vlgmr.msrb.gmra.mxu3 %vm99_vm3, %v1142_v21  ;;  %4545 = vmatmul.msk.f32.gmra.mxu0 %vm1248_vm15, %v5295_v22  ;;  %v2638_v21 = vld [vmem:[%s5680_s16 + $0x10] sm:$0xff] }
 0x118   :  { %4508 = vmatpush.msk.msrb.mxu3 %vm5474_vm13, %v5013_v49  ;;  %4496 = vmatpush.msk.msrb.mxu1 %vm5484_vm0, %v5013_v49 }
 0x11a   :  { %4509 = vmatpush.msk.msrb.mxu3 %vm5484_vm0, %v5013_v49  ;;  %4497 = vmatpush.msk.msrb.mxu1 %vm5501_vm2, %v5013_v49 }
 0x11b   :  { %4559 = vmatmul.msk.f32.gmra.mxu2 %vm1248_vm15, %v5313_v27 }
 0x11c   :  { %4510 = vmatpush.msk.msrb.mxu3 %vm5501_vm2, %v5013_v49  ;;  %v1077_v24 = vpop.f32.mrf.mxu0  ;;  %4498 = vmatpush.msk.msrb.mxu1 %vm5514_vm4, %v5013_v49 }
 0x11d   :  { %4442 = vmatmul.msk.f32.gmra.mxu1 %vm99_vm3, %v1077_v24  ;;  %v2547_v24 = vld [vmem:[%s5726_s21 + $0x18] sm:$0xff] }
 0x11e   :  { %v1145_v26 = vpop.f32.mrf.mxu2  ;;  %4511 = vmatpush.msk.msrb.mxu3 %vm5514_vm4, %v5013_v49 }
 0x11f   :  { %4449 = vmatmul.msk.f32.gmra.mxu3 %vm99_vm3, %v1145_v26  ;;  %4546 = vmatmul.msk.f32.gmra.mxu0 %vm1248_vm15, %v5313_v27 }
 0x122   :  { %v152_v29 = vpop.f32.mrf.mxu1 }
 0x123   :  { %4582 = vmatmul.msk.f32.vlgmr.msra.gmra.mxu2 %vm1248_vm15, %v5241_v7  ;;  %v162_v30 = vmul.f32 %v161_v28, %v152_v29 }
 0x124   :  { %v1278_v31 = vpop.f32.mrf.mxu0  ;;  %2468 = vmatpush.msra.mxu2 %v2455_v32 }
 0x125   :  { %164 = vst.msk [vmem:[#allocation9] sm:$0xff] %vm99_vm3, %v162_v30  ;;  %4473 = vmatmul.msk.f32.vlgmr.msra.gmra.mxu1 %vm1248_vm15, %v1278_v31  ;;  %v2637_v31 = vld [vmem:[%s5680_s16 + $0x8] sm:$0xff] }
 0x126   :  { %v1369_v33 = vpop.f32.mrf.mxu2  ;;  %4521 = vmatpush.msk.msra.mxu1 %vm5474_vm13, %v5013_v49  ;;  %2469 = vmatpush.msra.mxu2 %v2454_v41 }
 0x127   :  { %4486 = vmatmul.msk.f32.vlgmr.msra.gmra.mxu3 %vm1248_vm15, %v1369_v33  ;;  %4569 = vmatmul.msk.f32.vlgmr.msra.gmra.mxu0 %vm1248_vm15, %v5241_v7  ;;  %v2546_v33 = vld [vmem:[%s5726_s21 + $0x10] sm:$0xff] }
 0x128   :  { %4534 = vmatpush.msk.msra.mxu3 %vm5474_vm13, %v5013_v49  ;;  %4522 = vmatpush.msk.msra.mxu1 %vm5484_vm0, %v5013_v49 }
 0x129   :  { %2376 = vmatpush.msra.mxu0 %v2363_v43  ;;  %2470 = vmatpush.msra.mxu2 %v2453_v53  ;;  %v704_v43 = vstv %s703_s1  ;;  %s1178_s1 = scalar_select %p1177_p9, 1, 0 }
 0x12a   :  { %v219_v36 = vpop.f32.mrf.mxu3  ;;  %4535 = vmatpush.msk.msra.mxu3 %vm5484_vm0, %v5013_v49  ;;  %v155_v38 = vpop.f32.mrf.mxu1  ;;  %4523 = vmatpush.msk.msra.mxu1 %vm5501_vm2, %v5013_v49  ;;  %p3736_p9 = scmp.lt.s32.totalorder %s3735_s6, 31 }
 0x12b   :  { %v229_v37 = vmul.f32 %v228_v35, %v219_v36  ;;  %4583 = vmatmul.msk.f32.gmra.mxu2 %vm1248_vm15, %v5265_v15  ;;  %v163_v39 = vmul.f32 %v161_v28, %v155_v38  ;;  %2377 = vmatpush.msra.mxu0 %v2362_v55  ;;  %v772_v55 = vstv %s771_s30  ;;  %s1179_s28 = scvt.s32.f32 %s1178_s1  ;;  %s3091_s30 = sadd.s32 20, %s5147_s0 }
 0x12c   :  { %4536 = vmatpush.msk.msra.mxu3 %vm5501_vm2, %v5013_v49  ;;  %v1281_v40 = vpop.f32.mrf.mxu0  ;;  %4524 = vmatpush.msk.msra.mxu1 %vm5514_vm4, %v5013_v49  ;;  %p3092_p13 = scmp.lt.s32.totalorder %s3091_s30, 31  ;;  %s3459_s1 = sadd.s32 24, %s5147_s0 }
 0x12d   :  { %232 = vst.msk [vmem:[#allocation9 + $0x10] sm:$0xff] %vm99_vm3, %v229_v37  ;;  %4474 = vmatmul.msk.f32.gmra.mxu1 %vm1248_vm15, %v1281_v40  ;;  %2471 = vmatpush.msra.mxu2 %v2452_v62  ;;  %v2636_v40 = vld [vmem:[%s5680_s16] sm:$0xff]  ;;  %s4711_s16 = sshll.u32 %s6847_s12, 5  ;;  %p3460_p7 = scmp.lt.s32.totalorder %s3459_s1, 31 }
 0x12e   :  { %v1372_v42 = vpop.f32.mrf.mxu2  ;;  %165 = vst.msk [vmem:[#allocation9 + $0x8] sm:$0xff] %vm99_vm3, %v163_v39  ;;  %4537 = vmatpush.msk.msra.mxu3 %vm5514_vm4, %v5013_v49  ;;  %2378 = vmatpush.msra.mxu0 %v2361_v0  ;;  %v840_v0 = vstv %s839_s8  ;;  %s5858_s20 = scalar_lea.vmem [#allocation7], %s4711_s16  ;;  %s6853_s30 = smov (!%p3092_p13, %s3091_s30), 31 }
 0x12f   :  { %4487 = vmatmul.msk.f32.gmra.mxu3 %vm1248_vm15, %v1372_v42  ;;  %4570 = vmatmul.msk.f32.gmra.mxu0 %vm1248_vm15, %v5265_v15  ;;  %v2545_v42 = vld [vmem:[%s5726_s21 + $0x8] sm:$0xff]  ;;  %s1515_s12 = scalar_select %p1514_p0, 1, 0 }
 0x130   :  { %2379 = vmatpush.msra.mxu0 %v2360_v13  ;;  %v908_v13 = vstv %s907_s11  ;;  %s3367_s11 = sadd.s32 23, %s5147_s0  ;;  %s6861_s1 = smov (!%p3460_p7, %s3459_s1), 31 }
 0x131   :  { %p3368_p1 = scmp.lt.s32.totalorder %s3367_s11, 31  ;;  %s1516_s13 = scvt.s32.f32 %s1515_s12 }
 0x132   :  { %v222_v45 = vpop.f32.mrf.mxu3  ;;  %v287_v47 = vpop.f32.mrf.mxu1  ;;  %s1607_s16 = scalar_select %p1606_p2, 1, 0 }
 0x133   :  { %v230_v46 = vmul.f32 %v228_v35, %v222_v45  ;;  %4584 = vmatmul.msk.f32.gmra.mxu2 %vm1248_vm15, %v5295_v22  ;;  %v297_v50 = vmul.f32 %v296_v44, %v287_v47  ;;  %s6855_s11 = smov (!%p3368_p1, %s3367_s11), 31  ;;  %s6863_s6 = smov (!%p3736_p9, %s3735_s6), 31 }
 0x134   :  { %v1284_v52 = vpop.f32.mrf.mxu0  ;;  %s4763_s15 = sshll.u32 %s6855_s11, 5  ;;  %s1608_s17 = scvt.s32.f32 %s1607_s16 }
 0x135   :  { %233 = vst.msk [vmem:[#allocation9 + $0x18] sm:$0xff] %vm99_vm3, %v230_v46  ;;  %4475 = vmatmul.msk.f32.gmra.mxu1 %vm1248_vm15, %v1284_v52  ;;  %v2823_v52 = vld [vmem:[%s5769_s5 + $0x18] sm:$0xff]  ;;  %s1975_s11 = scalar_select %p1974_p10, 1, 0 }
 0x136   :  { %v1375_v54 = vpop.f32.mrf.mxu2  ;;  %300 = vst.msk [vmem:[#allocation9 + $0x20] sm:$0xff] %vm99_vm3, %v297_v50  ;;  %s3919_s16 = sadd.s32 29, %s5147_s0  ;;  %p2158_p0 = scmp.gt.s32.totalorder %s5897_s24, 9 }
 0x137   :  { %4488 = vmatmul.msk.f32.gmra.mxu3 %vm1248_vm15, %v1375_v54  ;;  %4571 = vmatmul.msk.f32.gmra.mxu0 %vm1248_vm15, %v5295_v22  ;;  %v2544_v54 = vld [vmem:[%s5726_s21] sm:$0xff]  ;;  %s5874_s21 = scalar_select %p1109_p8, 1, 0 }
 0x138   :  { %p1882_p8 = scmp.gt.s32.totalorder %s5897_s24, 6  ;;  %s1976_s12 = scvt.s32.f32 %s1975_s11 }
 0x139   :  { %s1111_s23 = scvt.s32.f32 %s5874_s21  ;;  %p3920_p13 = scmp.lt.s32.totalorder %s3919_s16, 31 }
 0x13a   :  { %v355_v57 = vpop.f32.mrf.mxu3  ;;  %v290_v59 = vpop.f32.mrf.mxu1  ;;  %p2250_p2 = scmp.gt.s32.totalorder %s5897_s24, 10  ;;  %p2526_p7 = scmp.gt.s32.totalorder %s5897_s24, 13 }
 0x13b   :  { %v365_v58 = vmul.f32 %v364_v56, %v355_v57  ;;  %4585 = vmatmul.msk.f32.gmra.mxu2 %vm1248_vm15, %v5313_v27  ;;  %v298_v60 = vmul.f32 %v296_v44, %v290_v59  ;;  %s6867_s16 = smov (!%p3920_p13, %s3919_s16), 31  ;;  %p2710_p9 = scmp.gt.s32.totalorder %s5897_s24, 15 }
 0x13c   :  { %v1287_v61 = vpop.f32.mrf.mxu0  ;;  %p2802_p10 = scmp.gt.s32.totalorder %s5897_s24, 16  ;;  %p3078_p13 = scmp.gt.s32.totalorder %s5897_s24, 19 }
 0x13d   :  { %368 = vst.msk [vmem:[#allocation9 + $0x30] sm:$0xff] %vm99_vm3, %v365_v58  ;;  %4476 = vmatmul.msk.f32.gmra.mxu1 %vm1248_vm15, %v1287_v61  ;;  %v2822_v61 = vld [vmem:[%s5769_s5 + $0x10] sm:$0xff] }
 0x13e   :  { %v1378_v63 = vpop.f32.mrf.mxu2  ;;  %301 = vst.msk [vmem:[#allocation9 + $0x28] sm:$0xff] %vm99_vm3, %v298_v60 }
 0x13f   :  { %4489 = vmatmul.msk.f32.gmra.mxu3 %vm1248_vm15, %v1378_v63  ;;  %4572 = vmatmul.msk.f32.gmra.mxu0 %vm1248_vm15, %v5313_v27  ;;  %v2731_v63 = vld [vmem:[%s5815_s9 + $0x18] sm:$0xff] }
 0x142   :  { %v358_v3 = vpop.f32.mrf.mxu3  ;;  %v423_v6 = vpop.f32.mrf.mxu1 }
 0x143   :  { %v366_v5 = vmul.f32 %v364_v56, %v358_v3  ;;  %4608 = vmatmul.msk.f32.vlgmr.msrb.gmra.mxu2 %vm1248_vm15, %v5241_v7  ;;  %v433_v51 = vmul.f32 %v432_v48, %v423_v6 }
 0x144   :  { %v1461_v9 = vpop.f32.mrf.mxu0  ;;  %2652 = vmatpush.msrb.mxu2 %v2639_v11 }
 0x145   :  { %369 = vst.msk [vmem:[#allocation9 + $0x38] sm:$0xff] %vm99_vm3, %v366_v5  ;;  %4499 = vmatmul.msk.f32.vlgmr.msrb.gmra.mxu1 %vm1248_vm15, %v1461_v9  ;;  %v2821_v9 = vld [vmem:[%s5769_s5 + $0x8] sm:$0xff] }
 0x146   :  { %v1553_v12 = vpop.f32.mrf.mxu2  ;;  %436 = vst.msk [vmem:[#allocation9 + $0x40] sm:$0xff] %vm99_vm3, %v433_v51  ;;  %4547 = vmatpush.msk.msrb.mxu1 %vm5474_vm13, %v5013_v49  ;;  %2653 = vmatpush.msrb.mxu2 %v2638_v21 }
 0x147   :  { %4512 = vmatmul.msk.f32.vlgmr.msrb.gmra.mxu3 %vm1248_vm15, %v1553_v12  ;;  %4595 = vmatmul.msk.f32.vlgmr.msrb.gmra.mxu0 %vm1248_vm15, %v5241_v7  ;;  %v2730_v12 = vld [vmem:[%s5815_s9 + $0x10] sm:$0xff] }
 0x148   :  { %4560 = vmatpush.msk.msrb.mxu3 %vm5474_vm13, %v5013_v49  ;;  %4548 = vmatpush.msk.msrb.mxu1 %vm5484_vm0, %v5013_v49 }
 0x149   :  { %2560 = vmatpush.msrb.mxu0 %v2547_v24  ;;  %2654 = vmatpush.msrb.mxu2 %v2637_v31  ;;  %v976_v24 = vstv %s975_s14  ;;  %s3275_s14 = sadd.s32 22, %s5147_s0 }
 0x14a   :  { %v491_v16 = vpop.f32.mrf.mxu3  ;;  %4561 = vmatpush.msk.msrb.mxu3 %vm5484_vm0, %v5013_v49  ;;  %v426_v18 = vpop.f32.mrf.mxu1  ;;  %4549 = vmatpush.msk.msrb.mxu1 %vm5501_vm2, %v5013_v49  ;;  %p3276_p3 = scmp.lt.s32.totalorder %s3275_s14, 31 }
 0x14b   :  { %v501_v17 = vmul.f32 %v500_v14, %v491_v16  ;;  %4609 = vmatmul.msk.f32.gmra.mxu2 %vm1248_vm15, %v5265_v15  ;;  %v434_v19 = vmul.f32 %v432_v48, %v426_v18  ;;  %2561 = vmatpush.msrb.mxu0 %v2546_v33  ;;  %v1044_v33 = vstv %s1043_s18  ;;  %s6037_s18 = scalar_lea.vmem [#allocation7], %s4763_s15 }
 0x14c   :  { %4562 = vmatpush.msk.msrb.mxu3 %vm5501_vm2, %v5013_v49  ;;  %v1464_v20 = vpop.f32.mrf.mxu0  ;;  %4550 = vmatpush.msk.msrb.mxu1 %vm5514_vm4, %v5013_v49  ;;  %s6857_s14 = smov (!%p3276_p3, %s3275_s14), 31 }
 0x14d   :  { %504 = vst.msk [vmem:[#allocation9 + $0x50] sm:$0xff] %vm99_vm3, %v501_v17  ;;  %4500 = vmatmul.msk.f32.gmra.mxu1 %vm1248_vm15, %v1464_v20  ;;  %2655 = vmatpush.msrb.mxu2 %v2636_v40  ;;  %v2820_v20 = vld [vmem:[%s5769_s5] sm:$0xff]  ;;  %s4737_s5 = sshll.u32 %s6851_s29, 5 }
 0x14e   :  { %v1556_v23 = vpop.f32.mrf.mxu2  ;;  %437 = vst.msk [vmem:[#allocation9 + $0x48] sm:$0xff] %vm99_vm3, %v434_v19  ;;  %4563 = vmatpush.msk.msrb.mxu3 %vm5514_vm4, %v5013_v49  ;;  %2562 = vmatpush.msrb.mxu0 %v2545_v42  ;;  %v1112_v42 = vstv %s1111_s23  ;;  %s5948_s8 = scalar_lea.vmem [#allocation7], %s4737_s5 }
 0x14f   :  { %4513 = vmatmul.msk.f32.gmra.mxu3 %vm1248_vm15, %v1556_v23  ;;  %4596 = vmatmul.msk.f32.gmra.mxu0 %vm1248_vm15, %v5265_v15  ;;  %v2729_v23 = vld [vmem:[%s5815_s9 + $0x8] sm:$0xff]  ;;  %s1699_s23 = scalar_select %p1698_p4, 1, 0 }
 0x150   :  { %2563 = vmatpush.msrb.mxu0 %v2544_v54  ;;  %v1180_v54 = vstv %s1179_s28  ;;  %s4789_s28 = sshll.u32 %s6859_s22, 5  ;;  %p2342_p4 = scmp.gt.s32.totalorder %s5897_s24, 11 }
 0x151   :  { %s1791_s29 = scalar_select %p1790_p6, 1, 0 }
 0x152   :  { %v494_v26 = vpop.f32.mrf.mxu3  ;;  %v559_v28 = vpop.f32.mrf.mxu1  ;;  %s2159_s22 = scalar_select %p2158_p0, 1, 0 }
 0x153   :  { %v502_v10 = vmul.f32 %v500_v14, %v494_v26  ;;  %4610 = vmatmul.msk.f32.gmra.mxu2 %vm1248_vm15, %v5295_v22  ;;  %v569_v29 = vmul.f32 %v568_v25, %v559_v28  ;;  %s1792_s19 = scvt.s32.f32 %s1791_s29  ;;  %s4103_s29 = sadd.s32 31, %s5147_s0 }
 0x154   :  { %v1467_v30 = vpop.f32.mrf.mxu0  ;;  %p4104_p3 = scmp.lt.s32.totalorder %s4103_s29, 31  ;;  %p2434_p6 = scmp.gt.s32.totalorder %s5897_s24, 12 }
 0x155   :  { %505 = vst.msk [vmem:[#allocation9 + $0x58] sm:$0xff] %vm99_vm3, %v502_v10  ;;  %4501 = vmatmul.msk.f32.gmra.mxu1 %vm1248_vm15, %v1467_v30  ;;  %v3007_v30 = vld [vmem:[%s5858_s20 + $0x18] sm:$0xff]  ;;  %p3170_p0 = scmp.gt.s32.totalorder %s5897_s24, 20 }
 0x156   :  { %v1559_v32 = vpop.f32.mrf.mxu2  ;;  %572 = vst.msk [vmem:[#allocation9 + $0x60] sm:$0xff] %vm99_vm3, %v569_v29  ;;  %s6871_s29 = smov (!%p4104_p3, %s4103_s29), 31  ;;  %p3446_p3 = scmp.gt.s32.totalorder %s5897_s24, 23 }
 0x157   :  { %4514 = vmatmul.msk.f32.gmra.mxu3 %vm1248_vm15, %v1559_v32  ;;  %4597 = vmatmul.msk.f32.gmra.mxu0 %vm1248_vm15, %v5295_v22  ;;  %v2728_v32 = vld [vmem:[%s5815_s9] sm:$0xff]  ;;  %s4724_s9 = sshll.u32 %s6853_s30, 5  ;;  %s4776_s30 = sshll.u32 %s6861_s1, 5 }
 0x158   :  { %s5992_s10 = scalar_lea.vmem [#allocation7], %s4724_s9  ;;  %s6170_s5 = scalar_lea.vmem [#allocation7], %s4776_s30 }
 0x159   :  { %s3643_s9 = sadd.s32 26, %s5147_s0  ;;  %s4011_s30 = sadd.s32 30, %s5147_s0 }
 0x15a   :  { %v627_v35 = vpop.f32.mrf.mxu3  ;;  %v562_v37 = vpop.f32.mrf.mxu1  ;;  %p3644_p11 = scmp.lt.s32.totalorder %s3643_s9, 31  ;;  %p4012_p5 = scmp.lt.s32.totalorder %s4011_s30, 31 }
 0x15b   :  { %v637_v36 = vmul.f32 %v636_v34, %v627_v35  ;;  %4611 = vmatmul.msk.f32.gmra.mxu2 %vm1248_vm15, %v5313_v27  ;;  %v570_v38 = vmul.f32 %v568_v25, %v562_v37 }
 0x15c   :  { %v1470_v39 = vpop.f32.mrf.mxu0  ;;  %s6865_s9 = smov (!%p3644_p11, %s3643_s9), 31  ;;  %s6873_s30 = smov (!%p4012_p5, %s4011_s30), 31 }
 0x15d   :  { %640 = vst.msk [vmem:[#allocation9 + $0x70] sm:$0xff] %vm99_vm3, %v637_v36  ;;  %4502 = vmatmul.msk.f32.gmra.mxu1 %vm1248_vm15, %v1470_v39  ;;  %v3006_v39 = vld [vmem:[%s5858_s20 + $0x10] sm:$0xff]  ;;  %p2894_p11 = scmp.gt.s32.totalorder %s5897_s24, 17  ;;  %p3630_p5 = scmp.gt.s32.totalorder %s5897_s24, 25 }
 0x15e   :  { %v1562_v41 = vpop.f32.mrf.mxu2  ;;  %573 = vst.msk [vmem:[#allocation9 + $0x68] sm:$0xff] %vm99_vm3, %v570_v38 }
 0x15f   :  { %4515 = vmatmul.msk.f32.gmra.mxu3 %vm1248_vm15, %v1562_v41  ;;  %4598 = vmatmul.msk.f32.gmra.mxu0 %vm1248_vm15, %v5313_v27  ;;  %v2915_v41 = vld [vmem:[%s5906_s25 + $0x18] sm:$0xff] }
 0x162   :  { %v630_v44 = vpop.f32.mrf.mxu3  ;;  %v695_v46 = vpop.f32.mrf.mxu1 }
 0x163   :  { %v638_v45 = vmul.f32 %v636_v34, %v630_v44  ;;  %4634 = vmatmul.msk.f32.vlgmr.msra.gmra.mxu2 %vm1248_vm15, %v5241_v7  ;;  %v705_v47 = vmul.f32 %v704_v43, %v695_v46 }
 0x164   :  { %v1645_v50 = vpop.f32.mrf.mxu0  ;;  %2836 = vmatpush.msra.mxu2 %v2823_v52 }
 0x165   :  { %641 = vst.msk [vmem:[#allocation9 + $0x78] sm:$0xff] %vm99_vm3, %v638_v45  ;;  %4525 = vmatmul.msk.f32.vlgmr.msra.gmra.mxu1 %vm1248_vm15, %v1645_v50  ;;  %v3005_v50 = vld [vmem:[%s5858_s20 + $0x8] sm:$0xff] }
 0x166   :  { %v1737_v53 = vpop.f32.mrf.mxu2  ;;  %708 = vst.msk [vmem:[#allocation9 + $0x80] sm:$0xff] %vm99_vm3, %v705_v47  ;;  %4573 = vmatpush.msk.msra.mxu1 %vm5474_vm13, %v5013_v49  ;;  %2837 = vmatpush.msra.mxu2 %v2822_v61 }
 0x167   :  { %4538 = vmatmul.msk.f32.vlgmr.msra.gmra.mxu3 %vm1248_vm15, %v1737_v53  ;;  %4621 = vmatmul.msk.f32.vlgmr.msra.gmra.mxu0 %vm1248_vm15, %v5241_v7  ;;  %v2914_v53 = vld [vmem:[%s5906_s25 + $0x10] sm:$0xff] }
 0x168   :  { %4586 = vmatpush.msk.msra.mxu3 %vm5474_vm13, %v5013_v49  ;;  %4574 = vmatpush.msk.msra.mxu1 %vm5484_vm0, %v5013_v49 }
 0x169   :  { %2744 = vmatpush.msra.mxu0 %v2731_v63  ;;  %2838 = vmatpush.msra.mxu2 %v2821_v9  ;;  %v5942_v63 = vstv %s1333_s2  ;;  %s6126_s2 = scalar_lea.vmem [#allocation7], %s4789_s28 }
 0x16a   :  { %v763_v56 = vpop.f32.mrf.mxu3  ;;  %4587 = vmatpush.msk.msra.mxu3 %vm5484_vm0, %v5013_v49  ;;  %v698_v58 = vpop.f32.mrf.mxu1  ;;  %4575 = vmatpush.msk.msra.mxu1 %vm5501_vm2, %v5013_v49 }
 0x16b   :  { %v773_v57 = vmul.f32 %v772_v55, %v763_v56  ;;  %4635 = vmatmul.msk.f32.gmra.mxu2 %vm1248_vm15, %v5265_v15  ;;  %v706_v59 = vmul.f32 %v704_v43, %v698_v58  ;;  %2745 = vmatpush.msra.mxu0 %v2730_v12  ;;  %v5960_v12 = vstv %s1424_s7  ;;  %s1883_s7 = scalar_select %p1882_p8, 1, 0 }
 0x16c   :  { %4588 = vmatpush.msk.msra.mxu3 %vm5501_vm2, %v5013_v49  ;;  %v1648_v60 = vpop.f32.mrf.mxu0  ;;  %4576 = vmatpush.msk.msra.mxu1 %vm5514_vm4, %v5013_v49  ;;  %p2618_p8 = scmp.gt.s32.totalorder %s5897_s24, 14 }
 0x16d   :  { %776 = vst.msk [vmem:[#allocation9 + $0x90] sm:$0xff] %vm99_vm3, %v773_v57  ;;  %4526 = vmatmul.msk.f32.gmra.mxu1 %vm1248_vm15, %v1648_v60  ;;  %2839 = vmatpush.msra.mxu2 %v2820_v20  ;;  %v3004_v60 = vld [vmem:[%s5858_s20] sm:$0xff]  ;;  %s4750_s20 = sshll.u32 %s6857_s14, 5  ;;  %s4802_s14 = sshll.u32 %s6865_s9, 5 }
 0x16e   :  { %v1740_v62 = vpop.f32.mrf.mxu2  ;;  %709 = vst.msk [vmem:[#allocation9 + $0x88] sm:$0xff] %vm99_vm3, %v706_v59  ;;  %4589 = vmatpush.msk.msra.mxu3 %vm5514_vm4, %v5013_v49  ;;  %2746 = vmatpush.msra.mxu0 %v2729_v23  ;;  %s6081_s21 = scalar_lea.vmem [#allocation7], %s4750_s20  ;;  %s6259_s15 = scalar_lea.vmem [#allocation7], %s4802_s14 }
 0x16f   :  { %4539 = vmatmul.msk.f32.gmra.mxu3 %vm1248_vm15, %v1740_v62  ;;  %4622 = vmatmul.msk.f32.gmra.mxu0 %vm1248_vm15, %v5265_v15  ;;  %v2913_v62 = vld [vmem:[%s5906_s25 + $0x8] sm:$0xff]  ;;  %s3827_s20 = sadd.s32 28, %s5147_s0 }
 0x170   :  { %2747 = vmatpush.msra.mxu0 %v2728_v32  ;;  %p3828_p1 = scmp.lt.s32.totalorder %s3827_s20, 31 }
 0x171   :  { %s2619_s14 = scalar_select %p2618_p8, 1, 0 }
 0x172   :  { %v766_v48 = vpop.f32.mrf.mxu3  ;;  %v831_v5 = vpop.f32.mrf.mxu1  ;;  %s6869_s20 = smov (!%p3828_p1, %s3827_s20), 31  ;;  %p3262_p1 = scmp.gt.s32.totalorder %s5897_s24, 21 }
 0x173   :  { %v774_v3 = vmul.f32 %v772_v55, %v766_v48  ;;  %4636 = vmatmul.msk.f32.gmra.mxu2 %vm1248_vm15, %v5295_v22  ;;  %v841_v6 = vmul.f32 %v840_v0, %v831_v5  ;;  %s4828_s1 = sshll.u32 %s6869_s20, 5  ;;  %p3906_p8 = scmp.gt.s32.totalorder %s5897_s24, 28 }
 0x174   :  { %v1651_v51 = vpop.f32.mrf.mxu0  ;;  %s6348_s28 = scalar_lea.vmem [#allocation7], %s4828_s1 }
 0x175   :  { %777 = vst.msk [vmem:[#allocation9 + $0x98] sm:$0xff] %vm99_vm3, %v774_v3  ;;  %4527 = vmatmul.msk.f32.gmra.mxu1 %vm1248_vm15, %v1651_v51  ;;  %v3191_v51 = vld [vmem:[%s5948_s8 + $0x18] sm:$0xff]  ;;  %s3079_s1 = scalar_select %p3078_p13, 1, 0 }
 0x176   :  { %v1743_v11 = vpop.f32.mrf.mxu2  ;;  %844 = vst.msk [vmem:[#allocation9 + $0xa0] sm:$0xff] %vm99_vm3, %v841_v6 }
 0x177   :  { %4540 = vmatmul.msk.f32.gmra.mxu3 %vm1248_vm15, %v1743_v11  ;;  %4623 = vmatmul.msk.f32.gmra.mxu0 %vm1248_vm15, %v5295_v22  ;;  %v2912_v11 = vld [vmem:[%s5906_s25] sm:$0xff]  ;;  %s1700_s25 = scvt.s32.f32 %s1699_s23  ;;  %s2160_s23 = scvt.s32.f32 %s2159_s22 }
 0x17a   :  { %v899_v14 = vpop.f32.mrf.mxu3  ;;  %v834_v17 = vpop.f32.mrf.mxu1 }
 0x17b   :  { %v909_v16 = vmul.f32 %v908_v13, %v899_v14  ;;  %4637 = vmatmul.msk.f32.gmra.mxu2 %vm1248_vm15, %v5313_v27  ;;  %v842_v18 = vmul.f32 %v840_v0, %v834_v17 }
 0x17c   :  { %v1654_v19 = vpop.f32.mrf.mxu0 }
 0x17d   :  { %912 = vst.msk [vmem:[#allocation9 + $0xb0] sm:$0xff] %vm99_vm3, %v909_v16  ;;  %4528 = vmatmul.msk.f32.gmra.mxu1 %vm1248_vm15, %v1654_v19  ;;  %v3190_v19 = vld [vmem:[%s5948_s8 + $0x10] sm:$0xff] }
 0x17e   :  { %v1746_v21 = vpop.f32.mrf.mxu2  ;;  %845 = vst.msk [vmem:[#allocation9 + $0xa8] sm:$0xff] %vm99_vm3, %v842_v18 }
 0x17f   :  { %4541 = vmatmul.msk.f32.gmra.mxu3 %vm1248_vm15, %v1746_v21  ;;  %4624 = vmatmul.msk.f32.gmra.mxu0 %vm1248_vm15, %v5313_v27  ;;  %v3099_v21 = vld [vmem:[%s5992_s10 + $0x18] sm:$0xff] }
 0x182   :  { %v902_v25 = vpop.f32.mrf.mxu3  ;;  %v967_v10 = vpop.f32.mrf.mxu1 }
 0x183   :  { %v910_v26 = vmul.f32 %v908_v13, %v902_v25  ;;  %4660 = vmatmul.msk.f32.vlgmr.msrb.gmra.mxu2 %vm1248_vm15, %v5241_v7  ;;  %v977_v28 = vmul.f32 %v976_v24, %v967_v10 }
 0x184   :  { %v1829_v29 = vpop.f32.mrf.mxu0  ;;  %3020 = vmatpush.msrb.mxu2 %v3007_v30  ;;  %v3098_v30 = vld [vmem:[%s5992_s10 + $0x10] sm:$0xff] }
 0x185   :  { %913 = vst.msk [vmem:[#allocation9 + $0xb8] sm:$0xff] %vm99_vm3, %v910_v26  ;;  %4551 = vmatmul.msk.f32.vlgmr.msrb.gmra.mxu1 %vm1248_vm15, %v1829_v29 }
 0x186   :  { %v1921_v31 = vpop.f32.mrf.mxu2  ;;  %980 = vst.msk [vmem:[#allocation9 + $0xc0] sm:$0xff] %vm99_vm3, %v977_v28  ;;  %4599 = vmatpush.msk.msrb.mxu1 %vm5474_vm13, %v5013_v49  ;;  %3021 = vmatpush.msrb.mxu2 %v3006_v39  ;;  %v3189_v28 = vld [vmem:[%s5948_s8 + $0x8] sm:$0xff]  ;;  %v6030_v39 = vstv %s1516_s13 }
 0x187   :  { %4564 = vmatmul.msk.f32.vlgmr.msrb.gmra.mxu3 %vm1248_vm15, %v1921_v31  ;;  %4647 = vmatmul.msk.f32.vlgmr.msrb.gmra.mxu0 %vm1248_vm15, %v5241_v7 }
 0x188   :  { %4612 = vmatpush.msk.msrb.mxu3 %vm5474_vm13, %v5013_v49  ;;  %4600 = vmatpush.msk.msrb.mxu1 %vm5484_vm0, %v5013_v49 }
 0x189   :  { %2928 = vmatpush.msrb.mxu0 %v2915_v41  ;;  %3022 = vmatpush.msrb.mxu2 %v3005_v50  ;;  %v6049_v50 = vstv %s1608_s17  ;;  %s2067_s17 = scalar_select %p2066_p12, 1, 0 }
 0x18a   :  { %v1035_v34 = vpop.f32.mrf.mxu3  ;;  %4613 = vmatpush.msk.msrb.mxu3 %vm5484_vm0, %v5013_v49  ;;  %v970_v36 = vpop.f32.mrf.mxu1  ;;  %4601 = vmatpush.msk.msrb.mxu1 %vm5501_vm2, %v5013_v49  ;;  %p2986_p12 = scmp.gt.s32.totalorder %s5897_s24, 18 }
 0x18b   :  { %v1045_v35 = vmul.f32 %v1044_v33, %v1035_v34  ;;  %4661 = vmatmul.msk.f32.gmra.mxu2 %vm1248_vm15, %v5265_v15  ;;  %v978_v37 = vmul.f32 %v976_v24, %v970_v36  ;;  %2929 = vmatpush.msrb.mxu0 %v2914_v53  ;;  %v3188_v36 = vld [vmem:[%s5948_s8] sm:$0xff]  ;;  %s1884_s8 = scvt.s32.f32 %s1883_s7 }
 0x18c   :  { %4614 = vmatpush.msk.msrb.mxu3 %vm5501_vm2, %v5013_v49  ;;  %v1832_v38 = vpop.f32.mrf.mxu0  ;;  %4602 = vmatpush.msk.msrb.mxu1 %vm5514_vm4, %v5013_v49 }
 0x18d   :  { %1048 = vst.msk [vmem:[#allocation9 + $0xd0] sm:$0xff] %vm99_vm3, %v1045_v35  ;;  %4552 = vmatmul.msk.f32.gmra.mxu1 %vm1248_vm15, %v1832_v38  ;;  %3023 = vmatpush.msrb.mxu2 %v3004_v60  ;;  %v3097_v38 = vld [vmem:[%s5992_s10 + $0x8] sm:$0xff] }
 0x18e   :  { %v1924_v40 = vpop.f32.mrf.mxu2  ;;  %981 = vst.msk [vmem:[#allocation9 + $0xc8] sm:$0xff] %vm99_vm3, %v978_v37  ;;  %4615 = vmatpush.msk.msrb.mxu3 %vm5514_vm4, %v5013_v49  ;;  %2930 = vmatpush.msrb.mxu0 %v2913_v62 }
 0x18f   :  { %4565 = vmatmul.msk.f32.gmra.mxu3 %vm1248_vm15, %v1924_v40  ;;  %4648 = vmatmul.msk.f32.gmra.mxu0 %vm1248_vm15, %v5265_v15 }
 0x190   :  { %2931 = vmatpush.msrb.mxu0 %v2912_v11 }
 0x192   :  { %v1038_v43 = vpop.f32.mrf.mxu3  ;;  %v1103_v45 = vpop.f32.mrf.mxu1 }
 0x193   :  { %v1046_v44 = vmul.f32 %v1044_v33, %v1038_v43  ;;  %4662 = vmatmul.msk.f32.gmra.mxu2 %vm1248_vm15, %v5295_v22  ;;  %v1113_v46 = vmul.f32 %v1112_v42, %v1103_v45  ;;  %v3375_v45 = vld [vmem:[%s6037_s18 + $0x18] sm:$0xff] }
 0x194   :  { %v1835_v47 = vpop.f32.mrf.mxu0 }
 0x195   :  { %1049 = vst.msk [vmem:[#allocation9 + $0xd8] sm:$0xff] %vm99_vm3, %v1046_v44  ;;  %4553 = vmatmul.msk.f32.gmra.mxu1 %vm1248_vm15, %v1835_v47  ;;  %v3096_v47 = vld [vmem:[%s5992_s10] sm:$0xff]  ;;  %s4815_s10 = sshll.u32 %s6863_s6, 5 }
 0x196   :  { %v1927_v52 = vpop.f32.mrf.mxu2  ;;  %1116 = vst.msk [vmem:[#allocation9 + $0xe0] sm:$0xff] %vm99_vm3, %v1113_v46  ;;  %s6215_s13 = scalar_lea.vmem [#allocation7], %s4815_s10 }
 0x197   :  { %4566 = vmatmul.msk.f32.gmra.mxu3 %vm1248_vm15, %v1927_v52  ;;  %4649 = vmatmul.msk.f32.gmra.mxu0 %vm1248_vm15, %v5295_v22  ;;  %s2343_s6 = scalar_select %p2342_p4, 1, 0 }
 0x198   :  { %s2435_s10 = scalar_select %p2434_p6, 1, 0 }
 0x199   :  { %s2344_s0 = scvt.s32.f32 %s2343_s6  ;;  %p3538_p4 = scmp.gt.s32.totalorder %s5897_s24, 24 }
 0x19a   :  { %v1171_v55 = vpop.f32.mrf.mxu3  ;;  %v1106_v57 = vpop.f32.mrf.mxu1  ;;  %s2436_s11 = scvt.s32.f32 %s2435_s10  ;;  %p3722_p6 = scmp.gt.s32.totalorder %s5897_s24, 26 }
 0x19b   :  { %v1181_v56 = vmul.f32 %v1180_v54, %v1171_v55  ;;  %4663 = vmatmul.msk.f32.gmra.mxu2 %vm1248_vm15, %v5313_v27  ;;  %v1114_v58 = vmul.f32 %v1112_v42, %v1106_v57  ;;  %v3374_v57 = vld [vmem:[%s6037_s18 + $0x10] sm:$0xff]  ;;  %s3631_s10 = scalar_select %p3630_p5, 1, 0 }
 0x19c   :  { %v1838_v59 = vpop.f32.mrf.mxu0 }
 0x19d   :  { %1184 = vst.msk [vmem:[#allocation9 + $0xf0] sm:$0xff] %vm99_vm3, %v1181_v56  ;;  %4554 = vmatmul.msk.f32.gmra.mxu1 %vm1248_vm15, %v1838_v59  ;;  %v3283_v59 = vld [vmem:[%s6081_s21 + $0x18] sm:$0xff] }
 0x19e   :  { %v1930_v61 = vpop.f32.mrf.mxu2  ;;  %1117 = vst.msk [vmem:[#allocation9 + $0xe8] sm:$0xff] %vm99_vm3, %v1114_v58 }
 0x19f   :  { %4567 = vmatmul.msk.f32.gmra.mxu3 %vm1248_vm15, %v1930_v61  ;;  %4650 = vmatmul.msk.f32.gmra.mxu0 %vm1248_vm15, %v5313_v27 }
 0x1a2   :  { %v1174_v0 = vpop.f32.mrf.mxu3  ;;  %v1319_v3 = vpop.f32.mrf.mxu1 }
 0x1a3   :  { %v1182_v48 = vmul.f32 %v1180_v54, %v1174_v0  ;;  %4686 = vmatmul.msk.f32.vlgmr.msra.gmra.mxu2 %vm1248_vm15, %v5241_v7  ;;  %v1335_v5 = vmul.f32 %v5942_v63, %v1319_v3 }
 0x1a4   :  { %v2013_v6 = vpop.f32.mrf.mxu0  ;;  %3204 = vmatpush.msra.mxu2 %v3191_v51 }
 0x1a5   :  { %1185 = vst.msk [vmem:[#allocation9 + $0xf8] sm:$0xff] %vm99_vm3, %v1182_v48  ;;  %4577 = vmatmul.msk.f32.vlgmr.msra.gmra.mxu1 %vm1248_vm15, %v2013_v6  ;;  %v3373_v48 = vld [vmem:[%s6037_s18 + $0x8] sm:$0xff] }
 0x1a6   :  { %v2105_v9 = vpop.f32.mrf.mxu2  ;;  %1339 = vst.msk [vmem:[#allocation10] sm:$0xff] %vm1248_vm15, %v1335_v5  ;;  %4625 = vmatpush.msk.msra.mxu1 %vm5474_vm13, %v5013_v49  ;;  %3205 = vmatpush.msra.mxu2 %v3190_v19  ;;  %v3282_v5 = vld [vmem:[%s6081_s21 + $0x10] sm:$0xff] }
 0x1a7   :  { %4590 = vmatmul.msk.f32.vlgmr.msra.gmra.mxu3 %vm1248_vm15, %v2105_v9  ;;  %4673 = vmatmul.msk.f32.vlgmr.msra.gmra.mxu0 %vm1248_vm15, %v5241_v7 }
 0x1a8   :  { %4638 = vmatpush.msk.msra.mxu3 %vm5474_vm13, %v5013_v49  ;;  %4626 = vmatpush.msk.msra.mxu1 %vm5484_vm0, %v5013_v49 }
 0x1a9   :  { %3112 = vmatpush.msra.mxu0 %v3099_v21  ;;  %3206 = vmatpush.msra.mxu2 %v3189_v28 }
 0x1aa   :  { %v1410_v13 = vpop.f32.mrf.mxu3  ;;  %4639 = vmatpush.msk.msra.mxu3 %vm5484_vm0, %v5013_v49  ;;  %v1322_v16 = vpop.f32.mrf.mxu1  ;;  %4627 = vmatpush.msk.msra.mxu1 %vm5501_vm2, %v5013_v49 }
 0x1ab   :  { %v1426_v14 = vmul.f32 %v5960_v12, %v1410_v13  ;;  %4687 = vmatmul.msk.f32.gmra.mxu2 %vm1248_vm15, %v5265_v15  ;;  %v1336_v17 = vmul.f32 %v5942_v63, %v1322_v16  ;;  %3113 = vmatpush.msra.mxu0 %v3098_v30  ;;  %v3372_v13 = vld [vmem:[%s6037_s18] sm:$0xff]  ;;  %v3281_v16 = vld [vmem:[%s6081_s21 + $0x8] sm:$0xff]  ;;  %s2068_s18 = scvt.s32.f32 %s2067_s17 }
 0x1ac   :  { %4640 = vmatpush.msk.msra.mxu3 %vm5501_vm2, %v5013_v49  ;;  %v2016_v18 = vpop.f32.mrf.mxu0  ;;  %4628 = vmatpush.msk.msra.mxu1 %vm5514_vm4, %v5013_v49 }
 0x1ad   :  { %1431 = vst.msk [vmem:[#allocation10 + $0x20] sm:$0xff] %vm1248_vm15, %v1426_v14  ;;  %4578 = vmatmul.msk.f32.gmra.mxu1 %vm1248_vm15, %v2016_v18  ;;  %3207 = vmatpush.msra.mxu2 %v3188_v36 }
 0x1ae   :  { %v2108_v20 = vpop.f32.mrf.mxu2  ;;  %1340 = vst.msk [vmem:[#allocation10 + $0x8] sm:$0xff] %vm1248_vm15, %v1336_v17  ;;  %4641 = vmatpush.msk.msra.mxu3 %vm5514_vm4, %v5013_v49  ;;  %3114 = vmatpush.msra.mxu0 %v3097_v38  ;;  %v6119_v17 = vstv %s1700_s25 }
 0x1af   :  { %4591 = vmatmul.msk.f32.gmra.mxu3 %vm1248_vm15, %v2108_v20  ;;  %4674 = vmatmul.msk.f32.gmra.mxu0 %vm1248_vm15, %v5265_v15 }
 0x1b0   :  { %3115 = vmatpush.msra.mxu0 %v3096_v47 }
 0x1b2   :  { %v1413_v23 = vpop.f32.mrf.mxu3  ;;  %v1325_v25 = vpop.f32.mrf.mxu1 }
 0x1b3   :  { %v1427_v24 = vmul.f32 %v5960_v12, %v1413_v23  ;;  %4688 = vmatmul.msk.f32.gmra.mxu2 %vm1248_vm15, %v5295_v22  ;;  %v1337_v26 = vmul.f32 %v5942_v63, %v1325_v25 }
 0x1b4   :  { %v2019_v10 = vpop.f32.mrf.mxu0 }
 0x1b5   :  { %1432 = vst.msk [vmem:[#allocation10 + $0x28] sm:$0xff] %vm1248_vm15, %v1427_v24  ;;  %4579 = vmatmul.msk.f32.gmra.mxu1 %vm1248_vm15, %v2019_v10  ;;  %v3559_v24 = vld [vmem:[%s6126_s2 + $0x18] sm:$0xff]  ;;  %v6138_v10 = vstv %s1792_s19  ;;  %s2251_s19 = scalar_select %p2250_p2, 1, 0 }
 0x1b6   :  { %v2111_v29 = vpop.f32.mrf.mxu2  ;;  %1341 = vst.msk [vmem:[#allocation10 + $0x10] sm:$0xff] %vm1248_vm15, %v1337_v26  ;;  %v3280_v26 = vld [vmem:[%s6081_s21] sm:$0xff]  ;;  %s4841_s21 = sshll.u32 %s6867_s16, 5  ;;  %p3354_p2 = scmp.gt.s32.totalorder %s5897_s24, 22 }
 0x1b7   :  { %4592 = vmatmul.msk.f32.gmra.mxu3 %vm1248_vm15, %v2111_v29  ;;  %4675 = vmatmul.msk.f32.gmra.mxu0 %vm1248_vm15, %v5295_v22  ;;  %s6304_s25 = scalar_lea.vmem [#allocation7], %s4841_s21 }
 0x1b8   :  { %s2711_s16 = scalar_select %p2710_p9, 1, 0 }
 0x1b9   :  { %s2895_s21 = scalar_select %p2894_p11, 1, 0 }
 0x1ba   :  { %v1416_v31 = vpop.f32.mrf.mxu3  ;;  %v1328_v33 = vpop.f32.mrf.mxu1  ;;  %s2712_s17 = scvt.s32.f32 %s2711_s16  ;;  %s4201_s16 = sshll.u32 %s6763_s3, 4  ;;  %s4202_s16 = int_to_ptr.hbm [resolvable:$true] %s4201_s16 }
 0x1bb   :  { %v1428_v32 = vmul.f32 %v5960_v12, %v1416_v31  ;;  %4689 = vmatmul.msk.f32.gmra.mxu2 %vm1248_vm15, %v5313_v27  ;;  %v1338_v34 = vmul.f32 %v5942_v63, %v1328_v33  ;;  %v3558_v33 = vld [vmem:[%s6126_s2 + $0x10] sm:$0xff]  ;;  %s2896_s22 = scvt.s32.f32 %s2895_s21  ;;  %p3998_p9 = scmp.gt.s32.totalorder %s5897_s24, 29 }
 0x1bc   :  { %v2022_v35 = vpop.f32.mrf.mxu0  ;;  %s3723_s3 = scalar_select %p3722_p6, 1, 0 }
 0x1bd   :  { %1433 = vst.msk [vmem:[#allocation10 + $0x30] sm:$0xff] %vm1248_vm15, %v1428_v32  ;;  %4580 = vmatmul.msk.f32.gmra.mxu1 %vm1248_vm15, %v2022_v35  ;;  %v3467_v35 = vld [vmem:[%s6170_s5 + $0x18] sm:$0xff]  ;;  %s3907_s21 = scalar_select %p3906_p8, 1, 0 }
 0x1be   :  { %v2114_v37 = vpop.f32.mrf.mxu2  ;;  %1342 = vst.msk [vmem:[#allocation10 + $0x18] sm:$0xff] %vm1248_vm15, %v1338_v34  ;;  %p4182_p11 = scmp.gt.s32.totalorder %s5897_s24, 31 }
 0x1bf   :  { %4593 = vmatmul.msk.f32.gmra.mxu3 %vm1248_vm15, %v2114_v37  ;;  %4676 = vmatmul.msk.f32.gmra.mxu0 %vm1248_vm15, %v5313_v27 }
 0x1c2   :  { %v1419_v40 = vpop.f32.mrf.mxu3  ;;  %v1502_v42 = vpop.f32.mrf.mxu1 }
 0x1c3   :  { %v1429_v41 = vmul.f32 %v5960_v12, %v1419_v40  ;;  %4712 = vmatmul.msk.f32.vlgmr.msrb.gmra.mxu2 %vm1248_vm15, %v5241_v7  ;;  %v1518_v43 = vmul.f32 %v6030_v39, %v1502_v42 }
 0x1c4   :  { %v2197_v44 = vpop.f32.mrf.mxu0  ;;  %3388 = vmatpush.msrb.mxu2 %v3375_v45 }
 0x1c5   :  { %1434 = vst.msk [vmem:[#allocation10 + $0x38] sm:$0xff] %vm1248_vm15, %v1429_v41  ;;  %4603 = vmatmul.msk.f32.vlgmr.msrb.gmra.mxu1 %vm1248_vm15, %v2197_v44  ;;  %v3557_v41 = vld [vmem:[%s6126_s2 + $0x8] sm:$0xff] }
 0x1c6   :  { %v2289_v46 = vpop.f32.mrf.mxu2  ;;  %1523 = vst.msk [vmem:[#allocation10 + $0x40] sm:$0xff] %vm1248_vm15, %v1518_v43  ;;  %4651 = vmatpush.msk.msrb.mxu1 %vm5474_vm13, %v5013_v49  ;;  %3389 = vmatpush.msrb.mxu2 %v3374_v57  ;;  %v3466_v43 = vld [vmem:[%s6170_s5 + $0x10] sm:$0xff] }
 0x1c7   :  { %4616 = vmatmul.msk.f32.vlgmr.msrb.gmra.mxu3 %vm1248_vm15, %v2289_v46  ;;  %4699 = vmatmul.msk.f32.vlgmr.msrb.gmra.mxu0 %vm1248_vm15, %v5241_v7 }
 0x1c8   :  { %4664 = vmatpush.msk.msrb.mxu3 %vm5474_vm13, %v5013_v49  ;;  %4652 = vmatpush.msk.msrb.mxu1 %vm5484_vm0, %v5013_v49 }
 0x1c9   :  { %3296 = vmatpush.msrb.mxu0 %v3283_v59  ;;  %3390 = vmatpush.msrb.mxu2 %v3373_v48 }
 0x1ca   :  { %v1594_v52 = vpop.f32.mrf.mxu3  ;;  %4665 = vmatpush.msk.msrb.mxu3 %vm5484_vm0, %v5013_v49  ;;  %v1505_v54 = vpop.f32.mrf.mxu1  ;;  %4653 = vmatpush.msk.msrb.mxu1 %vm5501_vm2, %v5013_v49 }
 0x1cb   :  { %v1610_v53 = vmul.f32 %v6049_v50, %v1594_v52  ;;  %4713 = vmatmul.msk.f32.gmra.mxu2 %vm1248_vm15, %v5265_v15  ;;  %v1519_v55 = vmul.f32 %v6030_v39, %v1505_v54  ;;  %3297 = vmatpush.msrb.mxu0 %v3282_v5  ;;  %v3556_v52 = vld [vmem:[%s6126_s2] sm:$0xff]  ;;  %v3465_v54 = vld [vmem:[%s6170_s5 + $0x8] sm:$0xff]  ;;  %s2252_s2 = scvt.s32.f32 %s2251_s19 }
 0x1cc   :  { %4666 = vmatpush.msk.msrb.mxu3 %vm5501_vm2, %v5013_v49  ;;  %v2200_v56 = vpop.f32.mrf.mxu0  ;;  %4654 = vmatpush.msk.msrb.mxu1 %vm5514_vm4, %v5013_v49 }
 0x1cd   :  { %1615 = vst.msk [vmem:[#allocation10 + $0x60] sm:$0xff] %vm1248_vm15, %v1610_v53  ;;  %4604 = vmatmul.msk.f32.gmra.mxu1 %vm1248_vm15, %v2200_v56  ;;  %3391 = vmatpush.msrb.mxu2 %v3372_v13 }
 0x1ce   :  { %v2292_v58 = vpop.f32.mrf.mxu2  ;;  %1524 = vst.msk [vmem:[#allocation10 + $0x48] sm:$0xff] %vm1248_vm15, %v1519_v55  ;;  %4667 = vmatpush.msk.msrb.mxu3 %vm5514_vm4, %v5013_v49  ;;  %3298 = vmatpush.msrb.mxu0 %v3281_v16  ;;  %v6208_v55 = vstv %s1884_s8  ;;  %s4854_s8 = sshll.u32 %s6873_s30, 5 }
 0x1cf   :  { %4617 = vmatmul.msk.f32.gmra.mxu3 %vm1248_vm15, %v2292_v58  ;;  %4700 = vmatmul.msk.f32.gmra.mxu0 %vm1248_vm15, %v5265_v15  ;;  %s6437_s9 = scalar_lea.vmem [#allocation7], %s4854_s8 }
 0x1d0   :  { %3299 = vmatpush.msrb.mxu0 %v3280_v26  ;;  %s3539_s8 = scalar_select %p3538_p4, 1, 0 }
 0x1d2   :  { %v1597_v60 = vpop.f32.mrf.mxu3  ;;  %v1508_v62 = vpop.f32.mrf.mxu1 }
 0x1d3   :  { %v1611_v61 = vmul.f32 %v6049_v50, %v1597_v60  ;;  %4714 = vmatmul.msk.f32.gmra.mxu2 %vm1248_vm15, %v5295_v22  ;;  %v1520_v63 = vmul.f32 %v6030_v39, %v1508_v62 }
 0x1d4   :  { %v2203_v0 = vpop.f32.mrf.mxu0 }
 0x1d5   :  { %1616 = vst.msk [vmem:[#allocation10 + $0x68] sm:$0xff] %vm1248_vm15, %v1611_v61  ;;  %4605 = vmatmul.msk.f32.gmra.mxu1 %vm1248_vm15, %v2203_v0  ;;  %v3743_v61 = vld [vmem:[%s6215_s13 + $0x18] sm:$0xff]  ;;  %v6227_v0 = vstv %s1976_s12  ;;  %s2527_s12 = scalar_select %p2526_p7, 1, 0 }
 0x1d6   :  { %v2295_v3 = vpop.f32.mrf.mxu2  ;;  %1525 = vst.msk [vmem:[#allocation10 + $0x50] sm:$0xff] %vm1248_vm15, %v1520_v63  ;;  %v3464_v63 = vld [vmem:[%s6170_s5] sm:$0xff]  ;;  %s4867_s5 = sshll.u32 %s6871_s29, 5  ;;  %p3814_p7 = scmp.gt.s32.totalorder %s5897_s24, 27 }
 0x1d7   :  { %4618 = vmatmul.msk.f32.gmra.mxu3 %vm1248_vm15, %v2295_v3  ;;  %4701 = vmatmul.msk.f32.gmra.mxu0 %vm1248_vm15, %v5295_v22  ;;  %s6393_s7 = scalar_lea.vmem [#allocation7], %s4867_s5 }
 0x1d8   :  { %s3171_s29 = scalar_select %p3170_p0, 1, 0 }
 0x1d9   :  { %s3355_s5 = scalar_select %p3354_p2, 1, 0 }
 0x1da   :  { %v1600_v6 = vpop.f32.mrf.mxu3  ;;  %v1511_v9 = vpop.f32.mrf.mxu1  ;;  %s3172_s19 = scvt.s32.f32 %s3171_s29 }
 0x1db   :  { %v1612_v51 = vmul.f32 %v6049_v50, %v1600_v6  ;;  %4715 = vmatmul.msk.f32.gmra.mxu2 %vm1248_vm15, %v5313_v27  ;;  %v1521_v11 = vmul.f32 %v6030_v39, %v1511_v9  ;;  %v3742_v9 = vld [vmem:[%s6215_s13 + $0x10] sm:$0xff]  ;;  %s3356_s6 = scvt.s32.f32 %s3355_s5 }
 0x1dc   :  { %v2206_v12 = vpop.f32.mrf.mxu0  ;;  %s4183_s29 = scalar_select %p4182_p11, 1, 0 }
 0x1dd   :  { %1617 = vst.msk [vmem:[#allocation10 + $0x70] sm:$0xff] %vm1248_vm15, %v1612_v51  ;;  %4606 = vmatmul.msk.f32.gmra.mxu1 %vm1248_vm15, %v2206_v12  ;;  %v3651_v12 = vld [vmem:[%s6259_s15 + $0x18] sm:$0xff] }
 0x1de   :  { %v2298_v14 = vpop.f32.mrf.mxu2  ;;  %1526 = vst.msk [vmem:[#allocation10 + $0x58] sm:$0xff] %vm1248_vm15, %v1521_v11 }
 0x1df   :  { %4619 = vmatmul.msk.f32.gmra.mxu3 %vm1248_vm15, %v2298_v14  ;;  %4702 = vmatmul.msk.f32.gmra.mxu0 %vm1248_vm15, %v5313_v27 }
 0x1e2   :  { %v1603_v18 = vpop.f32.mrf.mxu3  ;;  %v1686_v20 = vpop.f32.mrf.mxu1 }
 0x1e3   :  { %v1613_v19 = vmul.f32 %v6049_v50, %v1603_v18  ;;  %4738 = vmatmul.msk.f32.vlgmr.msra.gmra.mxu2 %vm1248_vm15, %v5241_v7  ;;  %v1702_v21 = vmul.f32 %v6119_v17, %v1686_v20 }
 0x1e4   :  { %v2381_v23 = vpop.f32.mrf.mxu0  ;;  %3572 = vmatpush.msra.mxu2 %v3559_v24 }
 0x1e5   :  { %1618 = vst.msk [vmem:[#allocation10 + $0x78] sm:$0xff] %vm1248_vm15, %v1613_v19  ;;  %4629 = vmatmul.msk.f32.vlgmr.msra.gmra.mxu1 %vm1248_vm15, %v2381_v23  ;;  %v3741_v19 = vld [vmem:[%s6215_s13 + $0x8] sm:$0xff] }
 0x1e6   :  { %v2473_v25 = vpop.f32.mrf.mxu2  ;;  %1707 = vst.msk [vmem:[#allocation10 + $0x80] sm:$0xff] %vm1248_vm15, %v1702_v21  ;;  %4677 = vmatpush.msk.msra.mxu1 %vm5474_vm13, %v5013_v49  ;;  %3573 = vmatpush.msra.mxu2 %v3558_v33  ;;  %v3650_v21 = vld [vmem:[%s6259_s15 + $0x10] sm:$0xff] }
 0x1e7   :  { %4642 = vmatmul.msk.f32.vlgmr.msra.gmra.mxu3 %vm1248_vm15, %v2473_v25  ;;  %4725 = vmatmul.msk.f32.vlgmr.msra.gmra.mxu0 %vm1248_vm15, %v5241_v7 }
 0x1e8   :  { %4690 = vmatpush.msk.msra.mxu3 %vm5474_vm13, %v5013_v49  ;;  %4678 = vmatpush.msk.msra.mxu1 %vm5484_vm0, %v5013_v49 }
 0x1e9   :  { %3480 = vmatpush.msra.mxu0 %v3467_v35  ;;  %3574 = vmatpush.msra.mxu2 %v3557_v41 }
 0x1ea   :  { %v1778_v28 = vpop.f32.mrf.mxu3  ;;  %4691 = vmatpush.msk.msra.mxu3 %vm5484_vm0, %v5013_v49  ;;  %v1689_v30 = vpop.f32.mrf.mxu1  ;;  %4679 = vmatpush.msk.msra.mxu1 %vm5501_vm2, %v5013_v49 }
 0x1eb   :  { %v1794_v29 = vmul.f32 %v6138_v10, %v1778_v28  ;;  %4739 = vmatmul.msk.f32.gmra.mxu2 %vm1248_vm15, %v5265_v15  ;;  %v1703_v31 = vmul.f32 %v6119_v17, %v1689_v30  ;;  %3481 = vmatpush.msra.mxu0 %v3466_v43  ;;  %v3740_v28 = vld [vmem:[%s6215_s13] sm:$0xff]  ;;  %v3649_v30 = vld [vmem:[%s6259_s15 + $0x8] sm:$0xff]  ;;  %s2528_s13 = scvt.s32.f32 %s2527_s12  ;;  %s5014_s12 = smov [#allocation9]  }
 0x1ec   :  { %4692 = vmatpush.msk.msra.mxu3 %vm5501_vm2, %v5013_v49  ;;  %v2384_v32 = vpop.f32.mrf.mxu0  ;;  %4680 = vmatpush.msk.msra.mxu1 %vm5514_vm4, %v5013_v49 }
 0x1ed   :  { %1799 = vst.msk [vmem:[#allocation10 + $0xa0] sm:$0xff] %vm1248_vm15, %v1794_v29  ;;  %4630 = vmatmul.msk.f32.gmra.mxu1 %vm1248_vm15, %v2384_v32  ;;  %3575 = vmatpush.msra.mxu2 %v3556_v52 }
 0x1ee   :  { %v2476_v34 = vpop.f32.mrf.mxu2  ;;  %1708 = vst.msk [vmem:[#allocation10 + $0x88] sm:$0xff] %vm1248_vm15, %v1703_v31  ;;  %4693 = vmatpush.msk.msra.mxu3 %vm5514_vm4, %v5013_v49  ;;  %3482 = vmatpush.msra.mxu0 %v3465_v54  ;;  %v6297_v31 = vstv %s2068_s18  ;;  %s2803_s18 = scalar_select %p2802_p10, 1, 0 }
 0x1ef   :  { %4643 = vmatmul.msk.f32.gmra.mxu3 %vm1248_vm15, %v2476_v34  ;;  %4726 = vmatmul.msk.f32.gmra.mxu0 %vm1248_vm15, %v5265_v15  ;;  %p4090_p10 = scmp.gt.s32.totalorder %s5897_s24, 30  ;;  %s5015_s24 = smov [#allocation10]  }
 0x1f0   :  { %3483 = vmatpush.msra.mxu0 %v3464_v63  ;;  %s2804_s20 = scvt.s32.f32 %s2803_s18 }
 0x1f1   :  { %s3815_s18 = scalar_select %p3814_p7, 1, 0 }
 0x1f2   :  { %v1781_v36 = vpop.f32.mrf.mxu3  ;;  %v1692_v38 = vpop.f32.mrf.mxu1 }
 0x1f3   :  { %v1795_v37 = vmul.f32 %v6138_v10, %v1781_v36  ;;  %4740 = vmatmul.msk.f32.gmra.mxu2 %vm1248_vm15, %v5295_v22  ;;  %v1704_v39 = vmul.f32 %v6119_v17, %v1692_v38 }
 0x1f4   :  { %v2387_v40 = vpop.f32.mrf.mxu0 }
 0x1f5   :  { %1800 = vst.msk [vmem:[#allocation10 + $0xa8] sm:$0xff] %vm1248_vm15, %v1795_v37  ;;  %4631 = vmatmul.msk.f32.gmra.mxu1 %vm1248_vm15, %v2387_v40  ;;  %v3927_v37 = vld [vmem:[%s6304_s25 + $0x18] sm:$0xff]  ;;  %v6316_v40 = vstv %s2160_s23  ;;  %s2987_s23 = scalar_select %p2986_p12, 1, 0 }
 0x1f6   :  { %v2479_v42 = vpop.f32.mrf.mxu2  ;;  %1709 = vst.msk [vmem:[#allocation10 + $0x90] sm:$0xff] %vm1248_vm15, %v1704_v39  ;;  %v3648_v39 = vld [vmem:[%s6259_s15] sm:$0xff]  ;;  %s2620_s15 = scvt.s32.f32 %s2619_s14 }
 0x1f7   :  { %4644 = vmatmul.msk.f32.gmra.mxu3 %vm1248_vm15, %v2479_v42  ;;  %4727 = vmatmul.msk.f32.gmra.mxu0 %vm1248_vm15, %v5295_v22 }
 0x1fa   :  { %v1784_v44 = vpop.f32.mrf.mxu3  ;;  %v1695_v46 = vpop.f32.mrf.mxu1 }
 0x1fb   :  { %v1796_v45 = vmul.f32 %v6138_v10, %v1784_v44  ;;  %4741 = vmatmul.msk.f32.gmra.mxu2 %vm1248_vm15, %v5313_v27  ;;  %v1705_v47 = vmul.f32 %v6119_v17, %v1695_v46  ;;  %v3926_v46 = vld [vmem:[%s6304_s25 + $0x10] sm:$0xff] }
 0x1fc   :  { %v2390_v50 = vpop.f32.mrf.mxu0 }
 0x1fd   :  { %1801 = vst.msk [vmem:[#allocation10 + $0xb0] sm:$0xff] %vm1248_vm15, %v1796_v45  ;;  %4632 = vmatmul.msk.f32.gmra.mxu1 %vm1248_vm15, %v2390_v50  ;;  %v3835_v50 = vld [vmem:[%s6348_s28 + $0x18] sm:$0xff] }
 0x1fe   :  { %v2482_v53 = vpop.f32.mrf.mxu2  ;;  %1710 = vst.msk [vmem:[#allocation10 + $0x98] sm:$0xff] %vm1248_vm15, %v1705_v47 }
 0x1ff   :  { %4645 = vmatmul.msk.f32.gmra.mxu3 %vm1248_vm15, %v2482_v53  ;;  %4728 = vmatmul.msk.f32.gmra.mxu0 %vm1248_vm15, %v5313_v27 }
 0x202   :  { %v1787_v56 = vpop.f32.mrf.mxu3  ;;  %v1870_v58 = vpop.f32.mrf.mxu1 }
 0x203   :  { %v1797_v57 = vmul.f32 %v6138_v10, %v1787_v56  ;;  %4764 = vmatmul.msk.f32.vlgmr.msrb.gmra.mxu2 %vm1248_vm15, %v5241_v7  ;;  %v1886_v59 = vmul.f32 %v6208_v55, %v1870_v58 }
 0x204   :  { %v2565_v60 = vpop.f32.mrf.mxu0  ;;  %3756 = vmatpush.msrb.mxu2 %v3743_v61 }
 0x205   :  { %1802 = vst.msk [vmem:[#allocation10 + $0xb8] sm:$0xff] %vm1248_vm15, %v1797_v57  ;;  %4655 = vmatmul.msk.f32.vlgmr.msrb.gmra.mxu1 %vm1248_vm15, %v2565_v60  ;;  %v3925_v57 = vld [vmem:[%s6304_s25 + $0x8] sm:$0xff] }
 0x206   :  { %v2657_v62 = vpop.f32.mrf.mxu2  ;;  %1891 = vst.msk [vmem:[#allocation10 + $0xc0] sm:$0xff] %vm1248_vm15, %v1886_v59  ;;  %4703 = vmatpush.msk.msrb.mxu1 %vm5474_vm13, %v5013_v49  ;;  %3757 = vmatpush.msrb.mxu2 %v3742_v9  ;;  %v3834_v59 = vld [vmem:[%s6348_s28 + $0x10] sm:$0xff] }
 0x207   :  { %4668 = vmatmul.msk.f32.vlgmr.msrb.gmra.mxu3 %vm1248_vm15, %v2657_v62  ;;  %4751 = vmatmul.msk.f32.vlgmr.msrb.gmra.mxu0 %vm1248_vm15, %v5241_v7 }
 0x208   :  { %4716 = vmatpush.msk.msrb.mxu3 %vm5474_vm13, %v5013_v49  ;;  %4704 = vmatpush.msk.msrb.mxu1 %vm5484_vm0, %v5013_v49 }
 0x209   :  { %3664 = vmatpush.msrb.mxu0 %v3651_v12  ;;  %3758 = vmatpush.msrb.mxu2 %v3741_v19 }
 0x20a   :  { %v1962_v48 = vpop.f32.mrf.mxu3  ;;  %4717 = vmatpush.msk.msrb.mxu3 %vm5484_vm0, %v5013_v49  ;;  %v1873_v5 = vpop.f32.mrf.mxu1  ;;  %4705 = vmatpush.msk.msrb.mxu1 %vm5501_vm2, %v5013_v49 }
 0x20b   :  { %v1978_v3 = vmul.f32 %v6227_v0, %v1962_v48  ;;  %4765 = vmatmul.msk.f32.gmra.mxu2 %vm1248_vm15, %v5265_v15  ;;  %v1887_v6 = vmul.f32 %v6208_v55, %v1873_v5  ;;  %3665 = vmatpush.msrb.mxu0 %v3650_v21  ;;  %v3924_v48 = vld [vmem:[%s6304_s25] sm:$0xff]  ;;  %v3833_v5 = vld [vmem:[%s6348_s28 + $0x8] sm:$0xff]  ;;  %s2988_s25 = scvt.s32.f32 %s2987_s23 }
 0x20c   :  { %4718 = vmatpush.msk.msrb.mxu3 %vm5501_vm2, %v5013_v49  ;;  %v2568_v51 = vpop.f32.mrf.mxu0  ;;  %4706 = vmatpush.msk.msrb.mxu1 %vm5514_vm4, %v5013_v49  ;;  %s3999_s23 = scalar_select %p3998_p9, 1, 0 }
 0x20d   :  { %1983 = vst.msk [vmem:[#allocation10 + $0xe0] sm:$0xff] %vm1248_vm15, %v1978_v3  ;;  %4656 = vmatmul.msk.f32.gmra.mxu1 %vm1248_vm15, %v2568_v51  ;;  %3759 = vmatpush.msrb.mxu2 %v3740_v28 }
 0x20e   :  { %v2660_v11 = vpop.f32.mrf.mxu2  ;;  %1892 = vst.msk [vmem:[#allocation10 + $0xc8] sm:$0xff] %vm1248_vm15, %v1887_v6  ;;  %4719 = vmatpush.msk.msrb.mxu3 %vm5514_vm4, %v5013_v49  ;;  %3666 = vmatpush.msrb.mxu0 %v3649_v30  ;;  %v6386_v6 = vstv %s2252_s2  ;;  %s3263_s2 = scalar_select %p3262_p1, 1, 0 }
 0x20f   :  { %4669 = vmatmul.msk.f32.gmra.mxu3 %vm1248_vm15, %v2660_v11  ;;  %4752 = vmatmul.msk.f32.gmra.mxu0 %vm1248_vm15, %v5265_v15 }
 0x210   :  { %3667 = vmatpush.msrb.mxu0 %v3648_v39  ;;  %s3264_s30 = scvt.s32.f32 %s3263_s2  ;;  %s4212_s2 = sshll.u32 %s5015_s24, 4  ;;  %s4213_s2 = int_to_ptr.vmem [resolvable:$true] %s4212_s2 }
 0x212   :  { %v1965_v13 = vpop.f32.mrf.mxu3  ;;  %v1876_v16 = vpop.f32.mrf.mxu1 }
 0x213   :  { %v1979_v14 = vmul.f32 %v6227_v0, %v1965_v13  ;;  %4766 = vmatmul.msk.f32.gmra.mxu2 %vm1248_vm15, %v5295_v22  ;;  %v1888_v17 = vmul.f32 %v6208_v55, %v1876_v16 }
 0x214   :  { %v2571_v18 = vpop.f32.mrf.mxu0 }
 0x215   :  { %1984 = vst.msk [vmem:[#allocation10 + $0xe8] sm:$0xff] %vm1248_vm15, %v1979_v14  ;;  %4657 = vmatmul.msk.f32.gmra.mxu1 %vm1248_vm15, %v2571_v18  ;;  %v4111_v14 = vld [vmem:[%s6393_s7 + $0x18] sm:$0xff]  ;;  %v6405_v18 = vstv %s2344_s0  ;;  %s3447_s0 = scalar_select %p3446_p3, 1, 0 }
 0x216   :  { %v2663_v20 = vpop.f32.mrf.mxu2  ;;  %1893 = vst.msk [vmem:[#allocation10 + $0xd0] sm:$0xff] %vm1248_vm15, %v1888_v17  ;;  %v3832_v17 = vld [vmem:[%s6348_s28] sm:$0xff]  ;;  %s3080_s28 = scvt.s32.f32 %s3079_s1 }
 0x217   :  { %4670 = vmatmul.msk.f32.gmra.mxu3 %vm1248_vm15, %v2663_v20  ;;  %4753 = vmatmul.msk.f32.gmra.mxu0 %vm1248_vm15, %v5295_v22  ;;  %s4091_s1 = scalar_select %p4090_p10, 1, 0 }
 0x21a   :  { %v1968_v23 = vpop.f32.mrf.mxu3  ;;  %v1879_v25 = vpop.f32.mrf.mxu1 }
 0x21b   :  { %v1980_v24 = vmul.f32 %v6227_v0, %v1968_v23  ;;  %4767 = vmatmul.msk.f32.gmra.mxu2 %vm1248_vm15, %v5313_v27  ;;  %v1889_v26 = vmul.f32 %v6208_v55, %v1879_v25  ;;  %v4110_v25 = vld [vmem:[%s6393_s7 + $0x10] sm:$0xff] }
 0x21c   :  { %v2574_v10 = vpop.f32.mrf.mxu0 }
 0x21d   :  { %1985 = vst.msk [vmem:[#allocation10 + $0xf0] sm:$0xff] %vm1248_vm15, %v1980_v24  ;;  %4658 = vmatmul.msk.f32.gmra.mxu1 %vm1248_vm15, %v2574_v10  ;;  %v4019_v10 = vld [vmem:[%s6437_s9 + $0x18] sm:$0xff] }
 0x21e   :  { %v2666_v29 = vpop.f32.mrf.mxu2  ;;  %1894 = vst.msk [vmem:[#allocation10 + $0xd8] sm:$0xff] %vm1248_vm15, %v1889_v26 }
 0x21f   :  { %4671 = vmatmul.msk.f32.gmra.mxu3 %vm1248_vm15, %v2666_v29  ;;  %4754 = vmatmul.msk.f32.gmra.mxu0 %vm1248_vm15, %v5313_v27 }
 0x222   :  { %v1971_v32 = vpop.f32.mrf.mxu3  ;;  %v2054_v34 = vpop.f32.mrf.mxu1 }
 0x223   :  { %v1981_v33 = vmul.f32 %v6227_v0, %v1971_v32  ;;  %4790 = vmatmul.msk.f32.vlgmr.msra.gmra.mxu2 %vm1248_vm15, %v5241_v7  ;;  %v2070_v35 = vmul.f32 %v6297_v31, %v2054_v34 }
 0x224   :  { %v2749_v36 = vpop.f32.mrf.mxu0  ;;  %3940 = vmatpush.msra.mxu2 %v3927_v37 }
 0x225   :  { %1986 = vst.msk [vmem:[#allocation10 + $0xf8] sm:$0xff] %vm1248_vm15, %v1981_v33  ;;  %4681 = vmatmul.msk.f32.vlgmr.msra.gmra.mxu1 %vm1248_vm15, %v2749_v36  ;;  %v4109_v33 = vld [vmem:[%s6393_s7 + $0x8] sm:$0xff] }
 0x226   :  { %v2841_v38 = vpop.f32.mrf.mxu2  ;;  %2075 = vst.msk [vmem:[#allocation10 + $0x100] sm:$0xff] %vm1248_vm15, %v2070_v35  ;;  %4729 = vmatpush.msk.msra.mxu1 %vm5474_vm13, %v5013_v49  ;;  %3941 = vmatpush.msra.mxu2 %v3926_v46  ;;  %v4018_v35 = vld [vmem:[%s6437_s9 + $0x10] sm:$0xff] }
 0x227   :  { %4694 = vmatmul.msk.f32.vlgmr.msra.gmra.mxu3 %vm1248_vm15, %v2841_v38  ;;  %4777 = vmatmul.msk.f32.vlgmr.msra.gmra.mxu0 %vm1248_vm15, %v5241_v7 }
 0x228   :  { %4742 = vmatpush.msk.msra.mxu3 %vm5474_vm13, %v5013_v49  ;;  %4730 = vmatpush.msk.msra.mxu1 %vm5484_vm0, %v5013_v49 }
 0x229   :  { %3848 = vmatpush.msra.mxu0 %v3835_v50  ;;  %3942 = vmatpush.msra.mxu2 %v3925_v57 }
 0x22a   :  { %v2146_v41 = vpop.f32.mrf.mxu3  ;;  %4743 = vmatpush.msk.msra.mxu3 %vm5484_vm0, %v5013_v49  ;;  %v2057_v43 = vpop.f32.mrf.mxu1  ;;  %4731 = vmatpush.msk.msra.mxu1 %vm5501_vm2, %v5013_v49 }
 0x22b   :  { %v2162_v42 = vmul.f32 %v6316_v40, %v2146_v41  ;;  %4791 = vmatmul.msk.f32.gmra.mxu2 %vm1248_vm15, %v5265_v15  ;;  %v2071_v44 = vmul.f32 %v6297_v31, %v2057_v43  ;;  %3849 = vmatpush.msra.mxu0 %v3834_v59  ;;  %v4108_v41 = vld [vmem:[%s6393_s7] sm:$0xff]  ;;  %v4017_v43 = vld [vmem:[%s6437_s9 + $0x8] sm:$0xff]  ;;  %s3448_s7 = scvt.s32.f32 %s3447_s0 }
 0x22c   :  { %4744 = vmatpush.msk.msra.mxu3 %vm5501_vm2, %v5013_v49  ;;  %v2752_v45 = vpop.f32.mrf.mxu0  ;;  %4732 = vmatpush.msk.msra.mxu1 %vm5514_vm4, %v5013_v49 }
 0x22d   :  { %2167 = vst.msk [vmem:[#allocation10 + $0x120] sm:$0xff] %vm1248_vm15, %v2162_v42  ;;  %4682 = vmatmul.msk.f32.gmra.mxu1 %vm1248_vm15, %v2752_v45  ;;  %3943 = vmatpush.msra.mxu2 %v3924_v48 }
 0x22e   :  { %v2844_v47 = vpop.f32.mrf.mxu2  ;;  %2076 = vst.msk [vmem:[#allocation10 + $0x108] sm:$0xff] %vm1248_vm15, %v2071_v44  ;;  %4745 = vmatpush.msk.msra.mxu3 %vm5514_vm4, %v5013_v49  ;;  %3850 = vmatpush.msra.mxu0 %v3833_v5  ;;  %v2437_v44 = vstv %s2436_s11  ;;  %s3632_s11 = scvt.s32.f32 %s3631_s10 }
 0x22f   :  { %4695 = vmatmul.msk.f32.gmra.mxu3 %vm1248_vm15, %v2844_v47  ;;  %4778 = vmatmul.msk.f32.gmra.mxu0 %vm1248_vm15, %v5265_v15 }
 0x230   :  { %3851 = vmatpush.msra.mxu0 %v3832_v17 }
 0x232   :  { %v2149_v52 = vpop.f32.mrf.mxu3  ;;  %v2060_v54 = vpop.f32.mrf.mxu1 }
 0x233   :  { %v2163_v53 = vmul.f32 %v6316_v40, %v2149_v52  ;;  %4792 = vmatmul.msk.f32.gmra.mxu2 %vm1248_vm15, %v5295_v22  ;;  %v2072_v55 = vmul.f32 %v6297_v31, %v2060_v54  ;;  %v4016_v54 = vld [vmem:[%s6437_s9] sm:$0xff]  ;;  %s3540_s9 = scvt.s32.f32 %s3539_s8 }
 0x234   :  { %v2755_v56 = vpop.f32.mrf.mxu0 }
 0x235   :  { %2168 = vst.msk [vmem:[#allocation10 + $0x128] sm:$0xff] %vm1248_vm15, %v2163_v53  ;;  %4683 = vmatmul.msk.f32.gmra.mxu1 %vm1248_vm15, %v2755_v56 }
 0x236   :  { %v2847_v58 = vpop.f32.mrf.mxu2  ;;  %2077 = vst.msk [vmem:[#allocation10 + $0x110] sm:$0xff] %vm1248_vm15, %v2072_v55  ;;  %v2529_v55 = vstv %s2528_s13  ;;  %s4199_s13 = sshll.u32 %s5014_s12, 4  ;;  %s4200_s13 = int_to_ptr.vmem [resolvable:$true] %s4199_s13 }
 0x237   :  { %4696 = vmatmul.msk.f32.gmra.mxu3 %vm1248_vm15, %v2847_v58  ;;  %4779 = vmatmul.msk.f32.gmra.mxu0 %vm1248_vm15, %v5295_v22  ;;  %4207 = dma.vmem_to_hbm [thread:$0]  %s4200_s13, 4096, %s4202_s16, [#allocation6], %s5009_s26, %s5009_s26, %s5010_s27  }
 0x23a   :  { %v2152_v60 = vpop.f32.mrf.mxu3  ;;  %v2063_v62 = vpop.f32.mrf.mxu1 }
 0x23b   :  { %v2164_v61 = vmul.f32 %v6316_v40, %v2152_v60  ;;  %4793 = vmatmul.msk.f32.gmra.mxu2 %vm1248_vm15, %v5313_v27  ;;  %v2073_v63 = vmul.f32 %v6297_v31, %v2063_v62 }
 0x23c   :  { %v2758_v0 = vpop.f32.mrf.mxu0 }
 0x23d   :  { %2169 = vst.msk [vmem:[#allocation10 + $0x130] sm:$0xff] %vm1248_vm15, %v2164_v61  ;;  %4684 = vmatmul.msk.f32.gmra.mxu1 %vm1248_vm15, %v2758_v0 }
 0x23e   :  { %v2850_v3 = vpop.f32.mrf.mxu2  ;;  %2078 = vst.msk [vmem:[#allocation10 + $0x118] sm:$0xff] %vm1248_vm15, %v2073_v63 }
 0x23f   :  { %4697 = vmatmul.msk.f32.gmra.mxu3 %vm1248_vm15, %v2850_v3  ;;  %4780 = vmatmul.msk.f32.gmra.mxu0 %vm1248_vm15, %v5313_v27 }
 0x242   :  { %v2155_v51 = vpop.f32.mrf.mxu3  ;;  %v2238_v11 = vpop.f32.mrf.mxu1 }
 0x243   :  { %v2165_v9 = vmul.f32 %v6316_v40, %v2155_v51  ;;  %4816 = vmatmul.msk.f32.vlgmr.msrb.gmra.mxu2 %vm1248_vm15, %v5241_v7  ;;  %v2254_v12 = vmul.f32 %v6386_v6, %v2238_v11 }
 0x244   :  { %v2933_v13 = vpop.f32.mrf.mxu0  ;;  %4124 = vmatpush.msrb.mxu2 %v4111_v14  ;;  %v2621_v14 = vstv %s2620_s15 }
 0x245   :  { %2170 = vst.msk [vmem:[#allocation10 + $0x138] sm:$0xff] %vm1248_vm15, %v2165_v9  ;;  %4707 = vmatmul.msk.f32.vlgmr.msrb.gmra.mxu1 %vm1248_vm15, %v2933_v13 }
 0x246   :  { %v3025_v16 = vpop.f32.mrf.mxu2  ;;  %2259 = vst.msk [vmem:[#allocation10 + $0x140] sm:$0xff] %vm1248_vm15, %v2254_v12  ;;  %4755 = vmatpush.msk.msrb.mxu1 %vm5474_vm13, %v5013_v49  ;;  %4125 = vmatpush.msrb.mxu2 %v4110_v25 }
 0x247   :  { %4720 = vmatmul.msk.f32.vlgmr.msrb.gmra.mxu3 %vm1248_vm15, %v3025_v16  ;;  %4803 = vmatmul.msk.f32.vlgmr.msrb.gmra.mxu0 %vm1248_vm15, %v5241_v7 }
 0x248   :  { %4768 = vmatpush.msk.msrb.mxu3 %vm5474_vm13, %v5013_v49  ;;  %4756 = vmatpush.msk.msrb.mxu1 %vm5484_vm0, %v5013_v49 }
 0x249   :  { %4032 = vmatpush.msrb.mxu0 %v4019_v10  ;;  %4126 = vmatpush.msrb.mxu2 %v4109_v33 }
 0x24a   :  { %v2330_v19 = vpop.f32.mrf.mxu3  ;;  %4769 = vmatpush.msk.msrb.mxu3 %vm5484_vm0, %v5013_v49  ;;  %v2241_v21 = vpop.f32.mrf.mxu1  ;;  %4757 = vmatpush.msk.msrb.mxu1 %vm5501_vm2, %v5013_v49 }
 0x24b   :  { %v2346_v20 = vmul.f32 %v6405_v18, %v2330_v19  ;;  %4817 = vmatmul.msk.f32.gmra.mxu2 %vm1248_vm15, %v5265_v15  ;;  %v2255_v23 = vmul.f32 %v6386_v6, %v2241_v21  ;;  %4033 = vmatpush.msrb.mxu0 %v4018_v35 }
 0x24c   :  { %4770 = vmatpush.msk.msrb.mxu3 %vm5501_vm2, %v5013_v49  ;;  %v2936_v24 = vpop.f32.mrf.mxu0  ;;  %4758 = vmatpush.msk.msrb.mxu1 %vm5514_vm4, %v5013_v49 }
 0x24d   :  { %2351 = vst.msk [vmem:[#allocation10 + $0x160] sm:$0xff] %vm1248_vm15, %v2346_v20  ;;  %4708 = vmatmul.msk.f32.gmra.mxu1 %vm1248_vm15, %v2936_v24  ;;  %4127 = vmatpush.msrb.mxu2 %v4108_v41 }
 0x24e   :  { %v3028_v26 = vpop.f32.mrf.mxu2  ;;  %2260 = vst.msk [vmem:[#allocation10 + $0x148] sm:$0xff] %vm1248_vm15, %v2255_v23  ;;  %4771 = vmatpush.msk.msrb.mxu3 %vm5514_vm4, %v5013_v49  ;;  %4034 = vmatpush.msrb.mxu0 %v4017_v43  ;;  %v2713_v23 = vstv %s2712_s17  ;;  %s3724_s17 = scvt.s32.f32 %s3723_s3 }
 0x24f   :  { %4721 = vmatmul.msk.f32.gmra.mxu3 %vm1248_vm15, %v3028_v26  ;;  %4804 = vmatmul.msk.f32.gmra.mxu0 %vm1248_vm15, %v5265_v15 }
 0x250   :  { %4035 = vmatpush.msrb.mxu0 %v4016_v54 }
 0x252   :  { %v2333_v28 = vpop.f32.mrf.mxu3  ;;  %v2244_v30 = vpop.f32.mrf.mxu1 }
 0x253   :  { %v2347_v29 = vmul.f32 %v6405_v18, %v2333_v28  ;;  %4818 = vmatmul.msk.f32.gmra.mxu2 %vm1248_vm15, %v5295_v22  ;;  %v2256_v31 = vmul.f32 %v6386_v6, %v2244_v30 }
 0x254   :  { %v2939_v32 = vpop.f32.mrf.mxu0 }
 0x255   :  { %2352 = vst.msk [vmem:[#allocation10 + $0x168] sm:$0xff] %vm1248_vm15, %v2347_v29  ;;  %4709 = vmatmul.msk.f32.gmra.mxu1 %vm1248_vm15, %v2939_v32 }
 0x256   :  { %v3031_v34 = vpop.f32.mrf.mxu2  ;;  %2261 = vst.msk [vmem:[#allocation10 + $0x150] sm:$0xff] %vm1248_vm15, %v2256_v31 }
 0x257   :  { %4722 = vmatmul.msk.f32.gmra.mxu3 %vm1248_vm15, %v3031_v34  ;;  %4805 = vmatmul.msk.f32.gmra.mxu0 %vm1248_vm15, %v5295_v22 }
 0x25a   :  { %v2336_v36 = vpop.f32.mrf.mxu3  ;;  %v2247_v38 = vpop.f32.mrf.mxu1 }
 0x25b   :  { %v2348_v37 = vmul.f32 %v6405_v18, %v2336_v36  ;;  %4819 = vmatmul.msk.f32.gmra.mxu2 %vm1248_vm15, %v5313_v27  ;;  %v2257_v39 = vmul.f32 %v6386_v6, %v2247_v38 }
 0x25c   :  { %v2942_v40 = vpop.f32.mrf.mxu0 }
 0x25d   :  { %2353 = vst.msk [vmem:[#allocation10 + $0x170] sm:$0xff] %vm1248_vm15, %v2348_v37  ;;  %4710 = vmatmul.msk.f32.gmra.mxu1 %vm1248_vm15, %v2942_v40 }
 0x25e   :  { %v3034_v42 = vpop.f32.mrf.mxu2  ;;  %2262 = vst.msk [vmem:[#allocation10 + $0x158] sm:$0xff] %vm1248_vm15, %v2257_v39 }
 0x25f   :  { %4723 = vmatmul.msk.f32.gmra.mxu3 %vm1248_vm15, %v3034_v42  ;;  %4806 = vmatmul.msk.f32.gmra.mxu0 %vm1248_vm15, %v5313_v27 }
 0x262   :  { %v2339_v45 = vpop.f32.mrf.mxu3  ;;  %v2422_v47 = vpop.f32.mrf.mxu1 }
 0x263   :  { %v2349_v46 = vmul.f32 %v6405_v18, %v2339_v45  ;;  %4842 = vmatmul.msk.f32.vlgmr.msra.gmra.mxu2 %vm1248_vm15, %v5241_v7  ;;  %v2438_v50 = vmul.f32 %v2437_v44, %v2422_v47 }
 0x264   :  { %v3117_v52 = vpop.f32.mrf.mxu0 }
 0x265   :  { %2354 = vst.msk [vmem:[#allocation10 + $0x178] sm:$0xff] %vm1248_vm15, %v2349_v46  ;;  %4733 = vmatmul.msk.f32.vlgmr.msra.gmra.mxu1 %vm1248_vm15, %v3117_v52 }
 0x266   :  { %v3209_v53 = vpop.f32.mrf.mxu2  ;;  %2443 = vst.msk [vmem:[#allocation10 + $0x180] sm:$0xff] %vm1248_vm15, %v2438_v50  ;;  %4781 = vmatpush.msk.msra.mxu1 %vm5474_vm13, %v5013_v49 }
 0x267   :  { %4746 = vmatmul.msk.f32.vlgmr.msra.gmra.mxu3 %vm1248_vm15, %v3209_v53  ;;  %4829 = vmatmul.msk.f32.vlgmr.msra.gmra.mxu0 %vm1248_vm15, %v5241_v7 }
 0x268   :  { %4794 = vmatpush.msk.msra.mxu3 %vm5474_vm13, %v5013_v49  ;;  %4782 = vmatpush.msk.msra.mxu1 %vm5484_vm0, %v5013_v49 }
 0x26a   :  { %v2514_v56 = vpop.f32.mrf.mxu3  ;;  %4795 = vmatpush.msk.msra.mxu3 %vm5484_vm0, %v5013_v49  ;;  %v2425_v58 = vpop.f32.mrf.mxu1  ;;  %4783 = vmatpush.msk.msra.mxu1 %vm5501_vm2, %v5013_v49 }
 0x26b   :  { %v2530_v57 = vmul.f32 %v2529_v55, %v2514_v56  ;;  %4843 = vmatmul.msk.f32.gmra.mxu2 %vm1248_vm15, %v5265_v15  ;;  %v2439_v59 = vmul.f32 %v2437_v44, %v2425_v58 }
 0x26c   :  { %4796 = vmatpush.msk.msra.mxu3 %vm5501_vm2, %v5013_v49  ;;  %v3120_v60 = vpop.f32.mrf.mxu0  ;;  %4784 = vmatpush.msk.msra.mxu1 %vm5514_vm4, %v5013_v49 }
 0x26d   :  { %2535 = vst.msk [vmem:[#allocation10 + $0x1a0] sm:$0xff] %vm1248_vm15, %v2530_v57  ;;  %4734 = vmatmul.msk.f32.gmra.mxu1 %vm1248_vm15, %v3120_v60 }
 0x26e   :  { %v3212_v61 = vpop.f32.mrf.mxu2  ;;  %2444 = vst.msk [vmem:[#allocation10 + $0x188] sm:$0xff] %vm1248_vm15, %v2439_v59  ;;  %4797 = vmatpush.msk.msra.mxu3 %vm5514_vm4, %v5013_v49 }
 0x26f   :  { %4747 = vmatmul.msk.f32.gmra.mxu3 %vm1248_vm15, %v3212_v61  ;;  %4830 = vmatmul.msk.f32.gmra.mxu0 %vm1248_vm15, %v5265_v15 }
 0x272   :  { %v2517_v62 = vpop.f32.mrf.mxu3  ;;  %v2428_v0 = vpop.f32.mrf.mxu1 }
 0x273   :  { %v2531_v63 = vmul.f32 %v2529_v55, %v2517_v62  ;;  %4844 = vmatmul.msk.f32.gmra.mxu2 %vm1248_vm15, %v5295_v22  ;;  %v2440_v48 = vmul.f32 %v2437_v44, %v2428_v0 }
 0x274   :  { %v3123_v3 = vpop.f32.mrf.mxu0 }
 0x275   :  { %2536 = vst.msk [vmem:[#allocation10 + $0x1a8] sm:$0xff] %vm1248_vm15, %v2531_v63  ;;  %4735 = vmatmul.msk.f32.gmra.mxu1 %vm1248_vm15, %v3123_v3 }
 0x276   :  { %v3215_v5 = vpop.f32.mrf.mxu2  ;;  %2445 = vst.msk [vmem:[#allocation10 + $0x190] sm:$0xff] %vm1248_vm15, %v2440_v48 }
 0x277   :  { %4748 = vmatmul.msk.f32.gmra.mxu3 %vm1248_vm15, %v3215_v5  ;;  %4831 = vmatmul.msk.f32.gmra.mxu0 %vm1248_vm15, %v5295_v22  ;;  %v2989_v5 = vstv %s2988_s25  ;;  %s4000_s25 = scvt.s32.f32 %s3999_s23 }
 0x27a   :  { %v2520_v6 = vpop.f32.mrf.mxu3  ;;  %v2431_v9 = vpop.f32.mrf.mxu1 }
 0x27b   :  { %v2532_v51 = vmul.f32 %v2529_v55, %v2520_v6  ;;  %4845 = vmatmul.msk.f32.gmra.mxu2 %vm1248_vm15, %v5313_v27  ;;  %v2441_v11 = vmul.f32 %v2437_v44, %v2431_v9 }
 0x27c   :  { %v3126_v12 = vpop.f32.mrf.mxu0 }
 0x27d   :  { %2537 = vst.msk [vmem:[#allocation10 + $0x1b0] sm:$0xff] %vm1248_vm15, %v2532_v51  ;;  %4736 = vmatmul.msk.f32.gmra.mxu1 %vm1248_vm15, %v3126_v12 }
 0x27e   :  { %v3218_v13 = vpop.f32.mrf.mxu2  ;;  %2446 = vst.msk [vmem:[#allocation10 + $0x198] sm:$0xff] %vm1248_vm15, %v2441_v11 }
 0x27f   :  { %4749 = vmatmul.msk.f32.gmra.mxu3 %vm1248_vm15, %v3218_v13  ;;  %4832 = vmatmul.msk.f32.gmra.mxu0 %vm1248_vm15, %v5313_v27 }
 0x282   :  { %v2523_v16 = vpop.f32.mrf.mxu3  ;;  %v2606_v18 = vpop.f32.mrf.mxu1 }
 0x283   :  { %v2533_v17 = vmul.f32 %v2529_v55, %v2523_v16  ;;  %4868 = vmatmul.msk.f32.vlgmr.msrb.gmra.mxu2 %vm1248_vm15, %v5241_v7  ;;  %v2622_v19 = vmul.f32 %v2621_v14, %v2606_v18 }
 0x284   :  { %v3301_v20 = vpop.f32.mrf.mxu0 }
 0x285   :  { %2538 = vst.msk [vmem:[#allocation10 + $0x1b8] sm:$0xff] %vm1248_vm15, %v2533_v17  ;;  %4759 = vmatmul.msk.f32.vlgmr.msrb.gmra.mxu1 %vm1248_vm15, %v3301_v20 }
 0x286   :  { %v3393_v21 = vpop.f32.mrf.mxu2  ;;  %2627 = vst.msk [vmem:[#allocation10 + $0x1c0] sm:$0xff] %vm1248_vm15, %v2622_v19  ;;  %4807 = vmatpush.msk.msrb.mxu1 %vm5474_vm13, %v5013_v49 }
 0x287   :  { %4772 = vmatmul.msk.f32.vlgmr.msrb.gmra.mxu3 %vm1248_vm15, %v3393_v21  ;;  %4855 = vmatmul.msk.f32.vlgmr.msrb.gmra.mxu0 %vm1248_vm15, %v5241_v7 }
 0x288   :  { %4820 = vmatpush.msk.msrb.mxu3 %vm5474_vm13, %v5013_v49  ;;  %4808 = vmatpush.msk.msrb.mxu1 %vm5484_vm0, %v5013_v49 }
 0x28a   :  { %v2698_v24 = vpop.f32.mrf.mxu3  ;;  %4821 = vmatpush.msk.msrb.mxu3 %vm5484_vm0, %v5013_v49  ;;  %v2609_v26 = vpop.f32.mrf.mxu1  ;;  %4809 = vmatpush.msk.msrb.mxu1 %vm5501_vm2, %v5013_v49 }
 0x28b   :  { %v2714_v25 = vmul.f32 %v2713_v23, %v2698_v24  ;;  %4869 = vmatmul.msk.f32.gmra.mxu2 %vm1248_vm15, %v5265_v15  ;;  %v2623_v7 = vmul.f32 %v2621_v14, %v2609_v26 }
 0x28c   :  { %4822 = vmatpush.msk.msrb.mxu3 %vm5501_vm2, %v5013_v49  ;;  %v3304_v10 = vpop.f32.mrf.mxu0  ;;  %4810 = vmatpush.msk.msrb.mxu1 %vm5514_vm4, %v5013_v49 }
 0x28d   :  { %2719 = vst.msk [vmem:[#allocation10 + $0x1e0] sm:$0xff] %vm1248_vm15, %v2714_v25  ;;  %4760 = vmatmul.msk.f32.gmra.mxu1 %vm1248_vm15, %v3304_v10 }
 0x28e   :  { %v3396_v28 = vpop.f32.mrf.mxu2  ;;  %2628 = vst.msk [vmem:[#allocation10 + $0x1c8] sm:$0xff] %vm1248_vm15, %v2623_v7  ;;  %4823 = vmatpush.msk.msrb.mxu3 %vm5514_vm4, %v5013_v49 }
 0x28f   :  { %4773 = vmatmul.msk.f32.gmra.mxu3 %vm1248_vm15, %v3396_v28  ;;  %4856 = vmatmul.msk.f32.gmra.mxu0 %vm1248_vm15, %v5265_v15 }
 0x292   :  { %v2701_v29 = vpop.f32.mrf.mxu3  ;;  %v2612_v31 = vpop.f32.mrf.mxu1 }
 0x293   :  { %v2715_v30 = vmul.f32 %v2713_v23, %v2701_v29  ;;  %4870 = vmatmul.msk.f32.gmra.mxu2 %vm1248_vm15, %v5295_v22  ;;  %v2624_v32 = vmul.f32 %v2621_v14, %v2612_v31  ;;  %v3173_v29 = vstv %s3172_s19  ;;  %s4184_s19 = scvt.s32.f32 %s4183_s29 }
 0x294   :  { %v3307_v33 = vpop.f32.mrf.mxu0 }
 0x295   :  { %2720 = vst.msk [vmem:[#allocation10 + $0x1e8] sm:$0xff] %vm1248_vm15, %v2715_v30  ;;  %4761 = vmatmul.msk.f32.gmra.mxu1 %vm1248_vm15, %v3307_v33 }
 0x296   :  { %v3399_v34 = vpop.f32.mrf.mxu2  ;;  %2629 = vst.msk [vmem:[#allocation10 + $0x1d0] sm:$0xff] %vm1248_vm15, %v2624_v32 }
 0x297   :  { %4774 = vmatmul.msk.f32.gmra.mxu3 %vm1248_vm15, %v3399_v34  ;;  %4857 = vmatmul.msk.f32.gmra.mxu0 %vm1248_vm15, %v5295_v22  ;;  %v2805_v22 = vstv %s2804_s20  ;;  %s3816_s20 = scvt.s32.f32 %s3815_s18 }
 0x29a   :  { %v2704_v15 = vpop.f32.mrf.mxu3  ;;  %v2615_v36 = vpop.f32.mrf.mxu1 }
 0x29b   :  { %v2716_v35 = vmul.f32 %v2713_v23, %v2704_v15  ;;  %4871 = vmatmul.msk.f32.gmra.mxu2 %vm1248_vm15, %v5313_v27  ;;  %v2625_v37 = vmul.f32 %v2621_v14, %v2615_v36  ;;  %v3081_v14 = vstv %s3080_s28  ;;  %s4092_s28 = scvt.s32.f32 %s4091_s1 }
 0x29c   :  { %v3310_v38 = vpop.f32.mrf.mxu0 }
 0x29d   :  { %2721 = vst.msk [vmem:[#allocation10 + $0x1f0] sm:$0xff] %vm1248_vm15, %v2716_v35  ;;  %4762 = vmatmul.msk.f32.gmra.mxu1 %vm1248_vm15, %v3310_v38  ;;  %v3265_v35 = vstv %s3264_s30 }
 0x29e   :  { %v3402_v39 = vpop.f32.mrf.mxu2  ;;  %2630 = vst.msk [vmem:[#allocation10 + $0x1d8] sm:$0xff] %vm1248_vm15, %v2625_v37 }
 0x29f   :  { %4775 = vmatmul.msk.f32.gmra.mxu3 %vm1248_vm15, %v3402_v39  ;;  %4858 = vmatmul.msk.f32.gmra.mxu0 %vm1248_vm15, %v5313_v27  ;;  %v2897_v27 = vstv %s2896_s22  ;;  %s3908_s22 = scvt.s32.f32 %s3907_s21 }
 0x2a2   :  { %v2707_v40 = vpop.f32.mrf.mxu3  ;;  %v2790_v42 = vpop.f32.mrf.mxu1 }
 0x2a3   :  { %v2717_v41 = vmul.f32 %v2713_v23, %v2707_v40  ;;  %v2806_v43 = vmul.f32 %v2805_v22, %v2790_v42 }
 0x2a4   :  { %v3485_v44 = vpop.f32.mrf.mxu0 }
 0x2a5   :  { %2722 = vst.msk [vmem:[#allocation10 + $0x1f8] sm:$0xff] %vm1248_vm15, %v2717_v41  ;;  %4785 = vmatmul.msk.f32.vlgmr.msra.gmra.mxu1 %vm1248_vm15, %v3485_v44 }
 0x2a6   :  { %v3577_v45 = vpop.f32.mrf.mxu2  ;;  %2811 = vst.msk [vmem:[#allocation10 + $0x200] sm:$0xff] %vm1248_vm15, %v2806_v43  ;;  %4833 = vmatpush.msk.msra.mxu1 %vm5474_vm13, %v5013_v49 }
 0x2a7   :  { %4798 = vmatmul.msk.f32.vlgmr.msra.gmra.mxu3 %vm1248_vm15, %v3577_v45 }
 0x2a8   :  { %4846 = vmatpush.msk.msra.mxu3 %vm5474_vm13, %v5013_v49  ;;  %4834 = vmatpush.msk.msra.mxu1 %vm5484_vm0, %v5013_v49 }
 0x2aa   :  { %v2882_v46 = vpop.f32.mrf.mxu3  ;;  %4847 = vmatpush.msk.msra.mxu3 %vm5484_vm0, %v5013_v49  ;;  %v2793_v50 = vpop.f32.mrf.mxu1  ;;  %4835 = vmatpush.msk.msra.mxu1 %vm5501_vm2, %v5013_v49 }
 0x2ab   :  { %v2898_v47 = vmul.f32 %v2897_v27, %v2882_v46  ;;  %v2807_v52 = vmul.f32 %v2805_v22, %v2793_v50 }
 0x2ac   :  { %4848 = vmatpush.msk.msra.mxu3 %vm5501_vm2, %v5013_v49  ;;  %v3488_v53 = vpop.f32.mrf.mxu0  ;;  %4836 = vmatpush.msk.msra.mxu1 %vm5514_vm4, %v5013_v49 }
 0x2ad   :  { %2903 = vst.msk [vmem:[#allocation10 + $0x220] sm:$0xff] %vm1248_vm15, %v2898_v47  ;;  %4786 = vmatmul.msk.f32.gmra.mxu1 %vm1248_vm15, %v3488_v53 }
 0x2ae   :  { %v3580_v54 = vpop.f32.mrf.mxu2  ;;  %2812 = vst.msk [vmem:[#allocation10 + $0x208] sm:$0xff] %vm1248_vm15, %v2807_v52  ;;  %4849 = vmatpush.msk.msra.mxu3 %vm5514_vm4, %v5013_v49 }
 0x2af   :  { %4799 = vmatmul.msk.f32.gmra.mxu3 %vm1248_vm15, %v3580_v54 }
 0x2b2   :  { %v2885_v55 = vpop.f32.mrf.mxu3  ;;  %v2796_v57 = vpop.f32.mrf.mxu1 }
 0x2b3   :  { %v2899_v56 = vmul.f32 %v2897_v27, %v2885_v55  ;;  %v2808_v58 = vmul.f32 %v2805_v22, %v2796_v57  ;;  %v3357_v55 = vstv %s3356_s6  ;;  %s4214_s6 = sshll.u32 %s6764_s4, 4  ;;  %s4215_s6 = int_to_ptr.hbm [resolvable:$true] %s4214_s6 }
 0x2b4   :  { %v3491_v59 = vpop.f32.mrf.mxu0 }
 0x2b5   :  { %2904 = vst.msk [vmem:[#allocation10 + $0x228] sm:$0xff] %vm1248_vm15, %v2899_v56  ;;  %4787 = vmatmul.msk.f32.gmra.mxu1 %vm1248_vm15, %v3491_v59 }
 0x2b6   :  { %v3583_v60 = vpop.f32.mrf.mxu2  ;;  %2813 = vst.msk [vmem:[#allocation10 + $0x210] sm:$0xff] %vm1248_vm15, %v2808_v58 }
 0x2b7   :  { %4800 = vmatmul.msk.f32.gmra.mxu3 %vm1248_vm15, %v3583_v60 }
 0x2ba   :  { %v2888_v61 = vpop.f32.mrf.mxu3  ;;  %v2799_v63 = vpop.f32.mrf.mxu1 }
 0x2bb   :  { %v2900_v62 = vmul.f32 %v2897_v27, %v2888_v61  ;;  %v2809_v0 = vmul.f32 %v2805_v22, %v2799_v63 }
 0x2bc   :  { %v3494_v48 = vpop.f32.mrf.mxu0 }
 0x2bd   :  { %2905 = vst.msk [vmem:[#allocation10 + $0x230] sm:$0xff] %vm1248_vm15, %v2900_v62  ;;  %4788 = vmatmul.msk.f32.gmra.mxu1 %vm1248_vm15, %v3494_v48  ;;  %v3449_v62 = vstv %s3448_s7 }
 0x2be   :  { %v3586_v3 = vpop.f32.mrf.mxu2  ;;  %2814 = vst.msk [vmem:[#allocation10 + $0x218] sm:$0xff] %vm1248_vm15, %v2809_v0 }
 0x2bf   :  { %4801 = vmatmul.msk.f32.gmra.mxu3 %vm1248_vm15, %v3586_v3 }
 0x2c2   :  { %v2891_v6 = vpop.f32.mrf.mxu3  ;;  %v2974_v9 = vpop.f32.mrf.mxu1 }
 0x2c3   :  { %v2901_v51 = vmul.f32 %v2897_v27, %v2891_v6  ;;  %v2990_v11 = vmul.f32 %v2989_v5, %v2974_v9 }
 0x2c4   :  { %v3669_v12 = vpop.f32.mrf.mxu0 }
 0x2c5   :  { %2906 = vst.msk [vmem:[#allocation10 + $0x238] sm:$0xff] %vm1248_vm15, %v2901_v51  ;;  %4811 = vmatmul.msk.f32.vlgmr.msrb.gmra.mxu1 %vm1248_vm15, %v3669_v12 }
 0x2c6   :  { %v3761_v13 = vpop.f32.mrf.mxu2  ;;  %2995 = vst.msk [vmem:[#allocation10 + $0x240] sm:$0xff] %vm1248_vm15, %v2990_v11  ;;  %4859 = vmatpush.msk.msrb.mxu1 %vm5474_vm13, %v5013_v49 }
 0x2c7   :  { %4824 = vmatmul.msk.f32.vlgmr.msrb.gmra.mxu3 %vm1248_vm15, %v3761_v13 }
 0x2c8   :  { %4872 = vmatpush.msk.msrb.mxu3 %vm5474_vm13, %v5013_v49  ;;  %4860 = vmatpush.msk.msrb.mxu1 %vm5484_vm0, %v5013_v49 }
 0x2ca   :  { %v3066_v16 = vpop.f32.mrf.mxu3  ;;  %4873 = vmatpush.msk.msrb.mxu3 %vm5484_vm0, %v5013_v49  ;;  %v2977_v18 = vpop.f32.mrf.mxu1  ;;  %4861 = vmatpush.msk.msrb.mxu1 %vm5501_vm2, %v5013_v49 }
 0x2cb   :  { %v3082_v17 = vmul.f32 %v3081_v14, %v3066_v16  ;;  %v2991_v19 = vmul.f32 %v2989_v5, %v2977_v18 }
 0x2cc   :  { %4874 = vmatpush.msk.msrb.mxu3 %vm5501_vm2, %v5013_v49  ;;  %v3672_v2 = vpop.f32.mrf.mxu0  ;;  %4862 = vmatpush.msk.msrb.mxu1 %vm5514_vm4, %v5013_v49 }
 0x2cd   :  { %3087 = vst.msk [vmem:[#allocation10 + $0x260] sm:$0xff] %vm1248_vm15, %v3082_v17  ;;  %4812 = vmatmul.msk.f32.gmra.mxu1 %vm1248_vm15, %v3672_v2 }
 0x2ce   :  { %v3764_v8 = vpop.f32.mrf.mxu2  ;;  %2996 = vst.msk [vmem:[#allocation10 + $0x248] sm:$0xff] %vm1248_vm15, %v2991_v19  ;;  %4875 = vmatpush.msk.msrb.mxu3 %vm5514_vm4, %v5013_v49 }
 0x2cf   :  { %4825 = vmatmul.msk.f32.gmra.mxu3 %vm1248_vm15, %v3764_v8 }
 0x2d2   :  { %v3069_v4 = vpop.f32.mrf.mxu3  ;;  %v2980_v21 = vpop.f32.mrf.mxu1 }
 0x2d3   :  { %v3083_v20 = vmul.f32 %v3081_v14, %v3069_v4  ;;  %v2992_v23 = vmul.f32 %v2989_v5, %v2980_v21  ;;  %v3541_v4 = vstv %s3540_s9 }
 0x2d4   :  { %v3675_v24 = vpop.f32.mrf.mxu0 }
 0x2d5   :  { %3088 = vst.msk [vmem:[#allocation10 + $0x268] sm:$0xff] %vm1248_vm15, %v3083_v20  ;;  %4813 = vmatmul.msk.f32.gmra.mxu1 %vm1248_vm15, %v3675_v24 }
 0x2d6   :  { %v3767_v25 = vpop.f32.mrf.mxu2  ;;  %2997 = vst.msk [vmem:[#allocation10 + $0x250] sm:$0xff] %vm1248_vm15, %v2992_v23 }
 0x2d7   :  { %4826 = vmatmul.msk.f32.gmra.mxu3 %vm1248_vm15, %v3767_v25  ;;  %v3633_v25 = vstv %s3632_s11 }
 0x2da   :  { %v3072_v49 = vpop.f32.mrf.mxu3  ;;  %v2983_v26 = vpop.f32.mrf.mxu1 }
 0x2db   :  { %v3084_v1 = vmul.f32 %v3081_v14, %v3072_v49  ;;  %v2993_v7 = vmul.f32 %v2989_v5, %v2983_v26 }
 0x2dc   :  { %v3678_v10 = vpop.f32.mrf.mxu0 }
 0x2dd   :  { %3089 = vst.msk [vmem:[#allocation10 + $0x270] sm:$0xff] %vm1248_vm15, %v3084_v1  ;;  %4814 = vmatmul.msk.f32.gmra.mxu1 %vm1248_vm15, %v3678_v10 }
 0x2de   :  { %v3770_v28 = vpop.f32.mrf.mxu2  ;;  %2998 = vst.msk [vmem:[#allocation10 + $0x258] sm:$0xff] %vm1248_vm15, %v2993_v7 }
 0x2df   :  { %4827 = vmatmul.msk.f32.gmra.mxu3 %vm1248_vm15, %v3770_v28 }
 0x2e2   :  { %v3075_v30 = vpop.f32.mrf.mxu3  ;;  %v3158_v32 = vpop.f32.mrf.mxu1 }
 0x2e3   :  { %v3085_v31 = vmul.f32 %v3081_v14, %v3075_v30  ;;  %v3174_v33 = vmul.f32 %v3173_v29, %v3158_v32 }
 0x2e4   :  { %v3853_v34 = vpop.f32.mrf.mxu0 }
 0x2e5   :  { %3090 = vst.msk [vmem:[#allocation10 + $0x278] sm:$0xff] %vm1248_vm15, %v3085_v31  ;;  %4837 = vmatmul.msk.f32.vlgmr.msra.gmra.mxu1 %vm1248_vm15, %v3853_v34 }
 0x2e6   :  { %v3945_v15 = vpop.f32.mrf.mxu2  ;;  %3179 = vst.msk [vmem:[#allocation10 + $0x280] sm:$0xff] %vm1248_vm15, %v3174_v33 }
 0x2e7   :  { %4850 = vmatmul.msk.f32.vlgmr.msra.gmra.mxu3 %vm1248_vm15, %v3945_v15  ;;  %v3725_v15 = vstv %s3724_s17 }
 0x2ea   :  { %v3250_v36 = vpop.f32.mrf.mxu3  ;;  %v3161_v38 = vpop.f32.mrf.mxu1 }
 0x2eb   :  { %v3266_v37 = vmul.f32 %v3265_v35, %v3250_v36  ;;  %v3175_v39 = vmul.f32 %v3173_v29, %v3161_v38 }
 0x2ec   :  { %v3856_v22 = vpop.f32.mrf.mxu0 }
 0x2ed   :  { %3271 = vst.msk [vmem:[#allocation10 + $0x2a0] sm:$0xff] %vm1248_vm15, %v3266_v37  ;;  %4838 = vmatmul.msk.f32.gmra.mxu1 %vm1248_vm15, %v3856_v22 }
 0x2ee   :  { %v3948_v40 = vpop.f32.mrf.mxu2  ;;  %3180 = vst.msk [vmem:[#allocation10 + $0x288] sm:$0xff] %vm1248_vm15, %v3175_v39  ;;  %v3817_v39 = vstv %s3816_s20 }
 0x2ef   :  { %4851 = vmatmul.msk.f32.gmra.mxu3 %vm1248_vm15, %v3948_v40 }
 0x2f2   :  { %v3253_v41 = vpop.f32.mrf.mxu3  ;;  %v3164_v43 = vpop.f32.mrf.mxu1 }
 0x2f3   :  { %v3267_v42 = vmul.f32 %v3265_v35, %v3253_v41  ;;  %v3176_v44 = vmul.f32 %v3173_v29, %v3164_v43 }
 0x2f4   :  { %v3859_v45 = vpop.f32.mrf.mxu0 }
 0x2f5   :  { %3272 = vst.msk [vmem:[#allocation10 + $0x2a8] sm:$0xff] %vm1248_vm15, %v3267_v42  ;;  %4839 = vmatmul.msk.f32.gmra.mxu1 %vm1248_vm15, %v3859_v45 }
 0x2f6   :  { %v3951_v27 = vpop.f32.mrf.mxu2  ;;  %3181 = vst.msk [vmem:[#allocation10 + $0x290] sm:$0xff] %vm1248_vm15, %v3176_v44 }
 0x2f7   :  { %4852 = vmatmul.msk.f32.gmra.mxu3 %vm1248_vm15, %v3951_v27 }
 0x2fa   :  { %v3256_v46 = vpop.f32.mrf.mxu3  ;;  %v3167_v50 = vpop.f32.mrf.mxu1 }
 0x2fb   :  { %v3268_v47 = vmul.f32 %v3265_v35, %v3256_v46  ;;  %v3177_v52 = vmul.f32 %v3173_v29, %v3167_v50 }
 0x2fc   :  { %v3862_v53 = vpop.f32.mrf.mxu0 }
 0x2fd   :  { %3273 = vst.msk [vmem:[#allocation10 + $0x2b0] sm:$0xff] %vm1248_vm15, %v3268_v47  ;;  %4840 = vmatmul.msk.f32.gmra.mxu1 %vm1248_vm15, %v3862_v53  ;;  %v3909_v53 = vstv %s3908_s22 }
 0x2fe   :  { %v3954_v54 = vpop.f32.mrf.mxu2  ;;  %3182 = vst.msk [vmem:[#allocation10 + $0x298] sm:$0xff] %vm1248_vm15, %v3177_v52 }
 0x2ff   :  { %4853 = vmatmul.msk.f32.gmra.mxu3 %vm1248_vm15, %v3954_v54 }
 0x302   :  { %v3259_v56 = vpop.f32.mrf.mxu3  ;;  %v3342_v58 = vpop.f32.mrf.mxu1 }
 0x303   :  { %v3269_v57 = vmul.f32 %v3265_v35, %v3259_v56  ;;  %v3358_v59 = vmul.f32 %v3357_v55, %v3342_v58  ;;  %v4001_v58 = vstv %s4000_s25 }
 0x304   :  { %v4037_v60 = vpop.f32.mrf.mxu0 }
 0x305   :  { %3274 = vst.msk [vmem:[#allocation10 + $0x2b8] sm:$0xff] %vm1248_vm15, %v3269_v57  ;;  %4863 = vmatmul.msk.f32.vlgmr.msrb.gmra.mxu1 %vm1248_vm15, %v4037_v60 }
 0x306   :  { %v4129_v61 = vpop.f32.mrf.mxu2  ;;  %3363 = vst.msk [vmem:[#allocation10 + $0x2c0] sm:$0xff] %vm1248_vm15, %v3358_v59 }
 0x307   :  { %4876 = vmatmul.msk.f32.vlgmr.msrb.gmra.mxu3 %vm1248_vm15, %v4129_v61 }
 0x30a   :  { %v3434_v63 = vpop.f32.mrf.mxu3  ;;  %v3345_v48 = vpop.f32.mrf.mxu1 }
 0x30b   :  { %v3450_v0 = vmul.f32 %v3449_v62, %v3434_v63  ;;  %v3359_v3 = vmul.f32 %v3357_v55, %v3345_v48 }
 0x30c   :  { %v4040_v5 = vpop.f32.mrf.mxu0 }
 0x30d   :  { %3455 = vst.msk [vmem:[#allocation10 + $0x2e0] sm:$0xff] %vm1248_vm15, %v3450_v0  ;;  %4864 = vmatmul.msk.f32.gmra.mxu1 %vm1248_vm15, %v4040_v5 }
 0x30e   :  { %v4132_v6 = vpop.f32.mrf.mxu2  ;;  %3364 = vst.msk [vmem:[#allocation10 + $0x2c8] sm:$0xff] %vm1248_vm15, %v3359_v3 }
 0x30f   :  { %4877 = vmatmul.msk.f32.gmra.mxu3 %vm1248_vm15, %v4132_v6 }
 0x312   :  { %v3437_v51 = vpop.f32.mrf.mxu3  ;;  %v3348_v11 = vpop.f32.mrf.mxu1 }
 0x313   :  { %v3451_v9 = vmul.f32 %v3449_v62, %v3437_v51  ;;  %v3360_v12 = vmul.f32 %v3357_v55, %v3348_v11  ;;  %v4093_v11 = vstv %s4092_s28 }
 0x314   :  { %v4043_v13 = vpop.f32.mrf.mxu0 }
 0x315   :  { %3456 = vst.msk [vmem:[#allocation10 + $0x2e8] sm:$0xff] %vm1248_vm15, %v3451_v9  ;;  %4865 = vmatmul.msk.f32.gmra.mxu1 %vm1248_vm15, %v4043_v13 }
 0x316   :  { %v4135_v14 = vpop.f32.mrf.mxu2  ;;  %3365 = vst.msk [vmem:[#allocation10 + $0x2d0] sm:$0xff] %vm1248_vm15, %v3360_v12 }
 0x317   :  { %4878 = vmatmul.msk.f32.gmra.mxu3 %vm1248_vm15, %v4135_v14 }
 0x31a   :  { %v3440_v16 = vpop.f32.mrf.mxu3  ;;  %v3351_v18 = vpop.f32.mrf.mxu1 }
 0x31b   :  { %v3452_v17 = vmul.f32 %v3449_v62, %v3440_v16  ;;  %v3361_v19 = vmul.f32 %v3357_v55, %v3351_v18 }
 0x31c   :  { %v4046_v2 = vpop.f32.mrf.mxu0 }
 0x31d   :  { %3457 = vst.msk [vmem:[#allocation10 + $0x2f0] sm:$0xff] %vm1248_vm15, %v3452_v17  ;;  %4866 = vmatmul.msk.f32.gmra.mxu1 %vm1248_vm15, %v4046_v2  ;;  %v4185_v17 = vstv %s4184_s19 }
 0x31e   :  { %v4138_v8 = vpop.f32.mrf.mxu2  ;;  %3366 = vst.msk [vmem:[#allocation10 + $0x2d8] sm:$0xff] %vm1248_vm15, %v3361_v19 }
 0x31f   :  { %4879 = vmatmul.msk.f32.gmra.mxu3 %vm1248_vm15, %v4138_v8 }
 0x322   :  { %v3443_v20 = vpop.f32.mrf.mxu3  ;;  %v3526_v23 = vpop.f32.mrf.mxu1 }
 0x323   :  { %v3453_v21 = vmul.f32 %v3449_v62, %v3443_v20  ;;  %v3542_v24 = vmul.f32 %v3541_v4, %v3526_v23 }
 0x325   :  { %3458 = vst.msk [vmem:[#allocation10 + $0x2f8] sm:$0xff] %vm1248_vm15, %v3453_v21 }
 0x326   :  { %3547 = vst.msk [vmem:[#allocation10 + $0x300] sm:$0xff] %vm1248_vm15, %v3542_v24 }
 0x32a   :  { %v3618_v49 = vpop.f32.mrf.mxu3  ;;  %v3529_v26 = vpop.f32.mrf.mxu1 }
 0x32b   :  { %v3634_v1 = vmul.f32 %v3633_v25, %v3618_v49  ;;  %v3543_v7 = vmul.f32 %v3541_v4, %v3529_v26 }
 0x32d   :  { %3639 = vst.msk [vmem:[#allocation10 + $0x320] sm:$0xff] %vm1248_vm15, %v3634_v1 }
 0x32e   :  { %3548 = vst.msk [vmem:[#allocation10 + $0x308] sm:$0xff] %vm1248_vm15, %v3543_v7 }
 0x332   :  { %v3621_v10 = vpop.f32.mrf.mxu3  ;;  %v3532_v29 = vpop.f32.mrf.mxu1 }
 0x333   :  { %v3635_v28 = vmul.f32 %v3633_v25, %v3621_v10  ;;  %v3544_v30 = vmul.f32 %v3541_v4, %v3532_v29 }
 0x335   :  { %3640 = vst.msk [vmem:[#allocation10 + $0x328] sm:$0xff] %vm1248_vm15, %v3635_v28 }
 0x336   :  { %3549 = vst.msk [vmem:[#allocation10 + $0x310] sm:$0xff] %vm1248_vm15, %v3544_v30 }
 0x33a   :  { %v3624_v31 = vpop.f32.mrf.mxu3  ;;  %v3535_v33 = vpop.f32.mrf.mxu1 }
 0x33b   :  { %v3636_v32 = vmul.f32 %v3633_v25, %v3624_v31  ;;  %v3545_v34 = vmul.f32 %v3541_v4, %v3535_v33 }
 0x33d   :  { %3641 = vst.msk [vmem:[#allocation10 + $0x330] sm:$0xff] %vm1248_vm15, %v3636_v32 }
 0x33e   :  { %3550 = vst.msk [vmem:[#allocation10 + $0x318] sm:$0xff] %vm1248_vm15, %v3545_v34 }
 0x342   :  { %v3627_v35 = vpop.f32.mrf.mxu3  ;;  %v3710_v37 = vpop.f32.mrf.mxu1 }
 0x343   :  { %v3637_v36 = vmul.f32 %v3633_v25, %v3627_v35  ;;  %v3726_v38 = vmul.f32 %v3725_v15, %v3710_v37 }
 0x345   :  { %3642 = vst.msk [vmem:[#allocation10 + $0x338] sm:$0xff] %vm1248_vm15, %v3637_v36 }
 0x346   :  { %3731 = vst.msk [vmem:[#allocation10 + $0x340] sm:$0xff] %vm1248_vm15, %v3726_v38 }
 0x34a   :  { %v3802_v22 = vpop.f32.mrf.mxu3  ;;  %v3713_v41 = vpop.f32.mrf.mxu1 }
 0x34b   :  { %v3818_v40 = vmul.f32 %v3817_v39, %v3802_v22  ;;  %v3727_v42 = vmul.f32 %v3725_v15, %v3713_v41 }
 0x34d   :  { %3823 = vst.msk [vmem:[#allocation10 + $0x360] sm:$0xff] %vm1248_vm15, %v3818_v40 }
 0x34e   :  { %3732 = vst.msk [vmem:[#allocation10 + $0x348] sm:$0xff] %vm1248_vm15, %v3727_v42 }
 0x352   :  { %v3805_v43 = vpop.f32.mrf.mxu3  ;;  %v3716_v45 = vpop.f32.mrf.mxu1 }
 0x353   :  { %v3819_v44 = vmul.f32 %v3817_v39, %v3805_v43  ;;  %v3728_v27 = vmul.f32 %v3725_v15, %v3716_v45 }
 0x355   :  { %3824 = vst.msk [vmem:[#allocation10 + $0x368] sm:$0xff] %vm1248_vm15, %v3819_v44 }
 0x356   :  { %3733 = vst.msk [vmem:[#allocation10 + $0x350] sm:$0xff] %vm1248_vm15, %v3728_v27 }
 0x35a   :  { %v3808_v46 = vpop.f32.mrf.mxu3  ;;  %v3719_v50 = vpop.f32.mrf.mxu1 }
 0x35b   :  { %v3820_v47 = vmul.f32 %v3817_v39, %v3808_v46  ;;  %v3729_v52 = vmul.f32 %v3725_v15, %v3719_v50 }
 0x35d   :  { %3825 = vst.msk [vmem:[#allocation10 + $0x370] sm:$0xff] %vm1248_vm15, %v3820_v47 }
 0x35e   :  { %3734 = vst.msk [vmem:[#allocation10 + $0x358] sm:$0xff] %vm1248_vm15, %v3729_v52 }
 0x362   :  { %v3811_v54 = vpop.f32.mrf.mxu3  ;;  %v3894_v56 = vpop.f32.mrf.mxu1 }
 0x363   :  { %v3821_v55 = vmul.f32 %v3817_v39, %v3811_v54  ;;  %v3910_v57 = vmul.f32 %v3909_v53, %v3894_v56 }
 0x365   :  { %3826 = vst.msk [vmem:[#allocation10 + $0x378] sm:$0xff] %vm1248_vm15, %v3821_v55 }
 0x366   :  { %3915 = vst.msk [vmem:[#allocation10 + $0x380] sm:$0xff] %vm1248_vm15, %v3910_v57 }
 0x36a   :  { %v3986_v59 = vpop.f32.mrf.mxu3  ;;  %v3897_v61 = vpop.f32.mrf.mxu1 }
 0x36b   :  { %v4002_v60 = vmul.f32 %v4001_v58, %v3986_v59  ;;  %v3911_v62 = vmul.f32 %v3909_v53, %v3897_v61 }
 0x36d   :  { %4007 = vst.msk [vmem:[#allocation10 + $0x3a0] sm:$0xff] %vm1248_vm15, %v4002_v60 }
 0x36e   :  { %3916 = vst.msk [vmem:[#allocation10 + $0x388] sm:$0xff] %vm1248_vm15, %v3911_v62 }
 0x372   :  { %v3989_v63 = vpop.f32.mrf.mxu3  ;;  %v3900_v48 = vpop.f32.mrf.mxu1 }
 0x373   :  { %v4003_v0 = vmul.f32 %v4001_v58, %v3989_v63  ;;  %v3912_v3 = vmul.f32 %v3909_v53, %v3900_v48 }
 0x375   :  { %4008 = vst.msk [vmem:[#allocation10 + $0x3a8] sm:$0xff] %vm1248_vm15, %v4003_v0 }
 0x376   :  { %3917 = vst.msk [vmem:[#allocation10 + $0x390] sm:$0xff] %vm1248_vm15, %v3912_v3 }
 0x37a   :  { %v3992_v5 = vpop.f32.mrf.mxu3  ;;  %v3903_v51 = vpop.f32.mrf.mxu1 }
 0x37b   :  { %v4004_v6 = vmul.f32 %v4001_v58, %v3992_v5  ;;  %v3913_v9 = vmul.f32 %v3909_v53, %v3903_v51 }
 0x37d   :  { %4009 = vst.msk [vmem:[#allocation10 + $0x3b0] sm:$0xff] %vm1248_vm15, %v4004_v6 }
 0x37e   :  { %3918 = vst.msk [vmem:[#allocation10 + $0x398] sm:$0xff] %vm1248_vm15, %v3913_v9 }
 0x382   :  { %v3995_v12 = vpop.f32.mrf.mxu3  ;;  %v4078_v14 = vpop.f32.mrf.mxu1 }
 0x383   :  { %v4005_v13 = vmul.f32 %v4001_v58, %v3995_v12  ;;  %v4094_v16 = vmul.f32 %v4093_v11, %v4078_v14 }
 0x385   :  { %4010 = vst.msk [vmem:[#allocation10 + $0x3b8] sm:$0xff] %vm1248_vm15, %v4005_v13 }
 0x386   :  { %4099 = vst.msk [vmem:[#allocation10 + $0x3c0] sm:$0xff] %vm1248_vm15, %v4094_v16 }
 0x38a   :  { %v4170_v18 = vpop.f32.mrf.mxu3  ;;  %v4081_v2 = vpop.f32.mrf.mxu1 }
 0x38b   :  { %v4186_v19 = vmul.f32 %v4185_v17, %v4170_v18  ;;  %v4095_v8 = vmul.f32 %v4093_v11, %v4081_v2 }
 0x38d   :  { %4191 = vst.msk [vmem:[#allocation10 + $0x3e0] sm:$0xff] %vm1248_vm15, %v4186_v19 }
 0x38e   :  { %4100 = vst.msk [vmem:[#allocation10 + $0x3c8] sm:$0xff] %vm1248_vm15, %v4095_v8 }
 0x392   :  { %v4173_v4 = vpop.f32.mrf.mxu3  ;;  %v4084_v21 = vpop.f32.mrf.mxu1 }
 0x393   :  { %v4187_v20 = vmul.f32 %v4185_v17, %v4173_v4  ;;  %v4096_v23 = vmul.f32 %v4093_v11, %v4084_v21 }
 0x395   :  { %4192 = vst.msk [vmem:[#allocation10 + $0x3e8] sm:$0xff] %vm1248_vm15, %v4187_v20 }
 0x396   :  { %4101 = vst.msk [vmem:[#allocation10 + $0x3d0] sm:$0xff] %vm1248_vm15, %v4096_v23 }
 0x39a   :  { %v4176_v24 = vpop.f32.mrf.mxu3  ;;  %v4087_v49 = vpop.f32.mrf.mxu1 }
 0x39b   :  { %v4188_v25 = vmul.f32 %v4185_v17, %v4176_v24  ;;  %v4097_v1 = vmul.f32 %v4093_v11, %v4087_v49 }
 0x39d   :  { %4193 = vst.msk [vmem:[#allocation10 + $0x3f0] sm:$0xff] %vm1248_vm15, %v4188_v25 }
 0x39e   :  { %4102 = vst.msk [vmem:[#allocation10 + $0x3d8] sm:$0xff] %vm1248_vm15, %v4097_v1 }
 0x3a2   :  { %v4179_v26 = vpop.f32.mrf.mxu3 }
 0x3a3   :  { %v4189_v7 = vmul.f32 %v4185_v17, %v4179_v26 }
 0x3a5   :  { %4194 = vst.msk [vmem:[#allocation10 + $0x3f8] sm:$0xff] %vm1248_vm15, %v4189_v7 }
 0x3a6   :  { %4220 = dma.vmem_to_hbm [thread:$0]  %s4213_s2, 16384, %s4215_s6, [#allocation11], %s5009_s26, %s5009_s26, %s5010_s27  }
 0x3a7   :  { %5003 = dma.done.wait [#allocation6], 4096  }
 0x3a8   :  { %5004 = vsyncadd [#allocation6], 4294963200 }
 0x3a9   :  { %5005 = dma.done.wait [#allocation11], 16384  }
 0x3aa   :  { %5006 = vsyncadd [#allocation11], 4294950912 }
 0x3ab   :  { %4229 = vsyncpa [#allocation5], 1 }
 0x3ac   :  { %4230 = vsyncpa [#allocation8], 1 }
 0x3ad   :  { %4231 = vsyncpa [#allocation6], 1 }
 0x3ae   :  { %4232 = vsyncpa [#allocation11], 1 }

</bundles_post_ra>
